<compile_context>
chip_gen: v7x
topology: tpu7x:2x2x1
jax: 0.10.0
libtpu: 0.0.40
codegen_flags: <defaults>
</compile_context>

<pallas_src>
import numpy as np
import jax
import jax.numpy as jnp
from jax import lax
from jax.experimental import pallas as pl
from jax.experimental.pallas import tpu as pltpu

LANE = 128
SUBLANE = 8


def _round_up(n, m):
    return ((n + m - 1) // m) * m


# ----------------------------------------------------------------------------
# Host-side constant construction.
# ----------------------------------------------------------------------------
def _build_tap_matrices(Hin, Win, stride, pad_h, pad_w, k=3):
    """E[t, p, q] = 1 iff output spatial position p reads input position q via tap t."""
    Hout = (Hin + 2 * pad_h - k) // stride + 1
    Wout = (Win + 2 * pad_w - k) // stride + 1
    E = np.zeros((k * k, Hout * Wout, Hin * Win), np.float32)
    for ki in range(k):
        for kj in range(k):
            t = ki * k + kj
            for oh in range(Hout):
                ih = oh * stride + ki - pad_h
                if ih < 0 or ih >= Hin:
                    continue
                for ow in range(Wout):
                    iw = ow * stride + kj - pad_w
                    if iw < 0 or iw >= Win:
                        continue
                    E[t, oh * Wout + ow, ih * Win + iw] = 1.0
    return E, Hout, Wout


def _fold_conv(E, w_oihw, b):
    """Fold a 3x3 conv into one dense matrix over channels-last flattened activations."""
    w = np.asarray(w_oihw, np.float32)
    b = np.asarray(b, np.float32)
    Cout, Cin, kh, kw = w.shape
    Wt = np.transpose(w, (2, 3, 1, 0)).reshape(kh * kw, Cin, Cout)
    P, Q = E.shape[1], E.shape[2]
    # At most one kernel tap connects any (p, q) pair, so this sum over t is exact.
    M = np.einsum("tpq,tco->qcpo", E, Wt).reshape(Q * Cin, P * Cout)
    bias = np.tile(b.reshape(1, Cout), (1, P))
    return M.astype(np.float32), bias.astype(np.float32)


def prepare_inputs(p, H, W):
    """Fold all parameters into lane-dense (128-multiple) matrices for the fused kernel."""
    conv_cfgs = [("c1", 2, 1, 1), ("c2", 2, 0, 1), ("c3", 2, 1, 1), ("c4", 1, 1, 1)]
    arrays = []
    h, w = H, W
    cin0 = int(p["c1_w"].shape[1])
    k_in = h * w * cin0
    k_in_pad = _round_up(k_in, LANE)
    prev_raw, prev_pad = k_in, k_in_pad
    for name, stride, ph, pw in conv_cfgs:
        E, h, w = _build_tap_matrices(h, w, stride, ph, pw)
        M, bias = _fold_conv(E, p[name + "_w"], p[name + "_b"])
        n_raw = M.shape[1]
        n_pad = _round_up(n_raw, LANE)
        Mp = np.zeros((prev_pad, n_pad), np.float32)
        Mp[:prev_raw, :n_raw] = M
        bp = np.zeros((1, n_pad), np.float32)
        bp[0, :n_raw] = bias[0]
        arrays += [jnp.asarray(Mp), jnp.asarray(bp)]
        prev_raw, prev_pad = n_raw, n_pad

    # ---- head: "multiple" 1x1 conv, bmm, 3-layer regress --------------------
    C = int(p["c4_w"].shape[0])            # out_channel
    L = h * w                              # spatial positions after conv4 (layout p*C + c)
    CL_pad = prev_pad
    mw = np.asarray(p["m_w"], np.float32)
    mb = np.asarray(p["m_b"], np.float32)
    N2 = _round_up(L, LANE)
    Wm = np.zeros((CL_pad, N2), np.float32)       # out_2 = ReLU(a @ Wm + bm)
    Rb = np.zeros((N2, CL_pad), np.float32)       # broadcast out_2 back over channels
    for pp in range(L):
        Wm[pp * C:(pp + 1) * C, pp] = mw[0]
        Rb[pp, pp * C:(pp + 1) * C] = 1.0
    bm = np.zeros((1, N2), np.float32)
    bm[0, :L] = mb[0, 0]

    r1w, r1b = np.asarray(p["r1_w"], np.float32), np.asarray(p["r1_b"], np.float32)
    r2w, r2b = np.asarray(p["r2_w"], np.float32), np.asarray(p["r2_b"], np.float32)
    r3w, r3b = np.asarray(p["r3_w"], np.float32), np.asarray(p["r3_b"], np.float32)
    H1, H2, NO = r1w.shape[0], r2w.shape[0], r3w.shape[0]
    H1p, H2p, NOp = _round_up(H1, LANE), _round_up(H2, LANE), _round_up(NO, LANE)
    # Fold the bmm position-sum into the first regress weight (rows tiled over positions).
    wr1 = np.zeros((CL_pad, H1p), np.float32)
    for pp in range(L):
        wr1[pp * C:(pp + 1) * C, :H1] = r1w.T
    br1 = np.zeros((1, H1p), np.float32); br1[0, :H1] = r1b[0]
    wr2 = np.zeros((H1p, H2p), np.float32); wr2[:H1, :H2] = r2w.T
    br2 = np.zeros((1, H2p), np.float32); br2[0, :H2] = r2b[0]
    wr3 = np.zeros((H2p, NOp), np.float32); wr3[:H2, :NO] = r3w.T
    br3 = np.zeros((1, NOp), np.float32); br3[0, :NO] = r3b[0]
    arrays += [jnp.asarray(a) for a in (Wm, bm, Rb, wr1, br1, wr2, br2, wr3, br3)]

    meta = dict(k_in=k_in, k_in_pad=k_in_pad, n_out=NO, n_out_pad=NOp)
    return arrays, meta


def _batch_tiling(B):
    """Batch rows live in the matmul sublane (M) dim; chunks are 8-aligned and we keep
    >= 2 grid steps (v7x dual TensorCore) whenever each chunk still has >= 8 rows."""
    b_pad = _round_up(max(B, 1), SUBLANE)
    if b_pad >= 2 * SUBLANE:
        bt = _round_up((b_pad + 1) // 2, SUBLANE)
        b_pad = _round_up(b_pad, bt)
    else:
        bt = b_pad
    return b_pad, bt


# ----------------------------------------------------------------------------
# Fused kernel: whole forward pass on a (Bt, features) batch chunk, all in VMEM.
# ----------------------------------------------------------------------------
def _fused_kernel(x_ref,
                  m1_ref, b1_ref, m2_ref, b2_ref, m3_ref, b3_ref, m4_ref, b4_ref,
                  wm_ref, bm_ref, rb_ref,
                  wr1_ref, br1_ref, wr2_ref, br2_ref, wr3_ref, br3_ref,
                  o_ref):
    def lrelu(v):
        return jnp.where(v > 0, v, 0.1 * v)

    def dense(a, w_ref, b_ref):
        return jnp.dot(a, w_ref[...], preferred_element_type=jnp.float32) + b_ref[...]

    a = x_ref[...]                                   # (Bt, H*W*Cin)
    a = lrelu(dense(a, m1_ref, b1_ref))              # conv1 -> (Bt, 512)
    a = lrelu(dense(a, m2_ref, b2_ref))              # conv2 -> (Bt, 256)  (192 valid)
    a = lrelu(dense(a, m3_ref, b3_ref))              # conv3 -> (Bt, 128)
    a = lrelu(dense(a, m4_ref, b4_ref))              # conv4 -> (Bt, 256)  == out_1 (pos-major, ch-minor)

    # "multiple": per-position 1x1 conv + ReLU, as one matmul (lane-padded to 128)
    out2 = jnp.maximum(dense(a, wm_ref, bm_ref), 0.0)                       # (Bt, 128)
    # bmm: broadcast out_2 back over channels; the position-sum is folded into wr1.
    out2b = jnp.dot(out2, rb_ref[...], preferred_element_type=jnp.float32)  # (Bt, 256)
    h = lrelu(dense(out2b * a, wr1_ref, br1_ref))    # regress layer 1 -> (Bt, 128)
    h = lrelu(dense(h, wr2_ref, br2_ref))            # regress layer 2 -> (Bt, 128)
    o_ref[...] = dense(h, wr3_ref, br3_ref)          # regress layer 3, lane-dense store


# ----------------------------------------------------------------------------
# Wrapper: single pallas_call over batch chunks.
# ----------------------------------------------------------------------------
def regress_motivation_forward(x, prep, meta):
    B, Cin, H, W = x.shape
    k_in, k_in_pad = meta["k_in"], meta["k_in_pad"]
    n_out, n_out_pad = meta["n_out"], meta["n_out_pad"]

    x_cl = jnp.transpose(x, (0, 2, 3, 1)).reshape(B, k_in)       # channels-last, once
    b_pad, bt = _batch_tiling(B)
    x_p = jnp.zeros((b_pad, k_in_pad), jnp.float32).at[:B, :k_in].set(x_cl)

    in_specs = [pl.BlockSpec((bt, k_in_pad), lambda i: (i, 0))]
    for a in prep:
        in_specs.append(pl.BlockSpec(a.shape, lambda i: (0, 0)))

    flops = 2 * b_pad * sum(int(a.shape[0]) * int(a.shape[1]) for a in prep
                            if a.shape[0] > 1)
    bytes_accessed = 4 * (sum(int(a.size) for a in prep) + int(x_p.size)
                          + b_pad * n_out_pad)

    out_pad = pl.pallas_call(
        _fused_kernel,
        out_shape=jax.ShapeDtypeStruct((b_pad, n_out_pad), jnp.float32),
        grid=(b_pad // bt,),
        in_specs=in_specs,
        out_specs=pl.BlockSpec((bt, n_out_pad), lambda i: (i, 0)),
        compiler_params=pltpu.CompilerParams(dimension_semantics=("parallel",)),
        cost_estimate=pl.CostEstimate(flops=flops, transcendentals=0,
                                      bytes_accessed=int(bytes_accessed)),
    )(x_p, *prep)
    return out_pad[:B, :n_out].reshape(B, n_out, 1)


# ----------------------------------------------------------------------------
# Deterministic parameter init (PyTorch-like uniform(-1/sqrt(fan_in), ...))
# ----------------------------------------------------------------------------
def init_params(key, in_channel, out_channel):
    def conv2d_init(k, cout, cin, ksz=3):
        k1, k2 = jax.random.split(k)
        bound = 1.0 / (cin * ksz * ksz) ** 0.5
        w = jax.random.uniform(k1, (cout, cin, ksz, ksz), jnp.float32, -bound, bound)
        b = jax.random.uniform(k2, (cout,), jnp.float32, -bound, bound)
        return w, b

    def dense_init(k, cout, cin):
        k1, k2 = jax.random.split(k)
        bound = 1.0 / cin ** 0.5
        w = jax.random.uniform(k1, (cout, cin), jnp.float32, -bound, bound)
        b = jax.random.uniform(k2, (1, cout), jnp.float32, -bound, bound)
        return w, b

    ks = jax.random.split(key, 8)
    p = {}
    p["c1_w"], p["c1_b"] = conv2d_init(ks[0], 8, in_channel)
    p["c2_w"], p["c2_b"] = conv2d_init(ks[1], 16, 8)
    p["c3_w"], p["c3_b"] = conv2d_init(ks[2], 32, 16)
    p["c4_w"], p["c4_b"] = conv2d_init(ks[3], out_channel, 32)
    p["m_w"], p["m_b"] = dense_init(ks[4], 1, out_channel)
    p["r1_w"], p["r1_b"] = dense_init(ks[5], 32, out_channel)
    p["r2_w"], p["r2_b"] = dense_init(ks[6], 16, 32)
    p["r3_w"], p["r3_b"] = dense_init(ks[7], 4, 16)
    return p


# ----------------------------------------------------------------------------
# Pure-JAX reference (verification only)
# ----------------------------------------------------------------------------
def reference_forward(x, p):
    def convf(x, w, b, stride, pad):
        y = lax.conv_general_dilated(
            x, w, (stride, stride), pad,
            dimension_numbers=("NCHW", "OIHW", "NCHW"))
        return y + b.reshape(1, -1, 1, 1)

    def lrelu(v):
        return jnp.where(v > 0, v, 0.1 * v)

    y = lrelu(convf(x, p["c1_w"], p["c1_b"], 2, [(1, 1), (1, 1)]))
    y = lrelu(convf(y, p["c2_w"], p["c2_b"], 2, [(0, 0), (1, 1)]))
    y = lrelu(convf(y, p["c3_w"], p["c3_b"], 2, [(1, 1), (1, 1)]))
    y = lrelu(convf(y, p["c4_w"], p["c4_b"], 1, [(1, 1), (1, 1)]))
    B, C, H, W = y.shape
    out1 = y.reshape(B, C, H * W)
    out2 = jax.nn.relu(jnp.einsum("oc,bcl->bol", p["m_w"], out1)
                       + p["m_b"].reshape(1, 1, 1))
    out3 = jnp.einsum("bol,bcl->boc", out2, out1)[:, 0, :]
    h1 = lrelu(out3 @ p["r1_w"].T + p["r1_b"])
    h2 = lrelu(h1 @ p["r2_w"].T + p["r2_b"])
    o = h2 @ p["r3_w"].T + p["r3_b"]
    return o.reshape(B, 4, 1)


if __name__ == "__main__":
    key = jax.random.PRNGKey(0)
    in_channel, out_channel = 4, 64
    B, H, W = 2, 16, 16

    kx, kp = jax.random.split(key)
    x = jax.random.normal(kx, (B, in_channel, H, W), jnp.float32)
    params = init_params(kp, in_channel, out_channel)
    prep, meta = prepare_inputs(params, H, W)

    fwd = jax.jit(lambda inp: regress_motivation_forward(inp, prep, meta))
    out = jax.block_until_ready(fwd(x))

    ref = reference_forward(x, params)
    assert out.shape == (B, 4, 1), out.shape
    assert bool(jnp.all(jnp.isfinite(out)))
    assert jnp.allclose(out, ref, rtol=1e-3, atol=1e-3), (out, ref)

    print("KERNEL_OK")
</pallas_src>

<mosaic_0001>
module attributes {stable_mosaic.version = 11 : i64} {
  func.func @_fused_kernel(%arg0: i32, %arg1: memref<8x1024xf32, #tpu.memory_space<vmem>>, %arg2: memref<1024x512xf32, #tpu.memory_space<vmem>>, %arg3: memref<1x512xf32, #tpu.memory_space<vmem>>, %arg4: memref<512x256xf32, #tpu.memory_space<vmem>>, %arg5: memref<1x256xf32, #tpu.memory_space<vmem>>, %arg6: memref<256x128xf32, #tpu.memory_space<vmem>>, %arg7: memref<1x128xf32, #tpu.memory_space<vmem>>, %arg8: memref<128x256xf32, #tpu.memory_space<vmem>>, %arg9: memref<1x256xf32, #tpu.memory_space<vmem>>, %arg10: memref<256x128xf32, #tpu.memory_space<vmem>>, %arg11: memref<1x128xf32, #tpu.memory_space<vmem>>, %arg12: memref<128x256xf32, #tpu.memory_space<vmem>>, %arg13: memref<256x128xf32, #tpu.memory_space<vmem>>, %arg14: memref<1x128xf32, #tpu.memory_space<vmem>>, %arg15: memref<128x128xf32, #tpu.memory_space<vmem>>, %arg16: memref<1x128xf32, #tpu.memory_space<vmem>>, %arg17: memref<128x128xf32, #tpu.memory_space<vmem>>, %arg18: memref<1x128xf32, #tpu.memory_space<vmem>>, %arg19: memref<8x128xf32, #tpu.memory_space<vmem>>) attributes {dimension_semantics = [#tpu.dimension_semantics<parallel>], iteration_bounds = array<i64: 1>, scalar_prefetch = 0 : i64, scratch_operands = 0 : i64, tpu.core_type = #tpu.core_type<tc>, window_params = [{transform_indices = @transform_0, window_bounds = array<i64: 8, 1024>}, {pipeline_mode = #tpu.pipeline_mode<synchronous>, transform_indices = @transform_1, window_bounds = array<i64: 1024, 512>}, {pipeline_mode = #tpu.pipeline_mode<synchronous>, transform_indices = @transform_2, window_bounds = array<i64: 1, 512>}, {pipeline_mode = #tpu.pipeline_mode<synchronous>, transform_indices = @transform_3, window_bounds = array<i64: 512, 256>}, {pipeline_mode = #tpu.pipeline_mode<synchronous>, transform_indices = @transform_4, window_bounds = array<i64: 1, 256>}, {pipeline_mode = #tpu.pipeline_mode<synchronous>, transform_indices = @transform_5, window_bounds = array<i64: 256, 128>}, {pipeline_mode = #tpu.pipeline_mode<synchronous>, transform_indices = @transform_6, window_bounds = array<i64: 1, 128>}, {pipeline_mode = #tpu.pipeline_mode<synchronous>, transform_indices = @transform_7, window_bounds = array<i64: 128, 256>}, {pipeline_mode = #tpu.pipeline_mode<synchronous>, transform_indices = @transform_8, window_bounds = array<i64: 1, 256>}, {pipeline_mode = #tpu.pipeline_mode<synchronous>, transform_indices = @transform_9, window_bounds = array<i64: 256, 128>}, {pipeline_mode = #tpu.pipeline_mode<synchronous>, transform_indices = @transform_10, window_bounds = array<i64: 1, 128>}, {pipeline_mode = #tpu.pipeline_mode<synchronous>, transform_indices = @transform_11, window_bounds = array<i64: 128, 256>}, {pipeline_mode = #tpu.pipeline_mode<synchronous>, transform_indices = @transform_12, window_bounds = array<i64: 256, 128>}, {pipeline_mode = #tpu.pipeline_mode<synchronous>, transform_indices = @transform_13, window_bounds = array<i64: 1, 128>}, {pipeline_mode = #tpu.pipeline_mode<synchronous>, transform_indices = @transform_14, window_bounds = array<i64: 128, 128>}, {pipeline_mode = #tpu.pipeline_mode<synchronous>, transform_indices = @transform_15, window_bounds = array<i64: 1, 128>}, {pipeline_mode = #tpu.pipeline_mode<synchronous>, transform_indices = @transform_16, window_bounds = array<i64: 128, 128>}, {pipeline_mode = #tpu.pipeline_mode<synchronous>, transform_indices = @transform_17, window_bounds = array<i64: 1, 128>}, {transform_indices = @transform_18, window_bounds = array<i64: 8, 128>}]} {
    %c0 = arith.constant 0 : index
    %c0_0 = arith.constant 0 : index
    %0 = vector.load %arg1[%c0, %c0_0] : memref<8x1024xf32, #tpu.memory_space<vmem>>, vector<8x1024xf32>
    %c0_1 = arith.constant 0 : index
    %c0_2 = arith.constant 0 : index
    %1 = vector.load %arg2[%c0_1, %c0_2] : memref<1024x512xf32, #tpu.memory_space<vmem>>, vector<1024x512xf32>
    %cst = arith.constant dense<0.000000e+00> : vector<8x512xf32>
    %2 = tpu.matmul %0, %1, %cst {dimension_numbers = #tpu.dot_dimension_numbers<[1], [0], [0], [1], [0, 0, 1, 1], [], []>} : vector<8x1024xf32>, vector<1024x512xf32>, vector<8x512xf32> -> vector<8x512xf32>
    %c0_3 = arith.constant 0 : index
    %c0_4 = arith.constant 0 : index
    %3 = vector.load %arg3[%c0_3, %c0_4] : memref<1x512xf32, #tpu.memory_space<vmem>>, vector<1x512xf32>
    %4 = vector.broadcast %3 : vector<1x512xf32> to vector<8x512xf32>
    %5 = arith.addf %2, %4 : vector<8x512xf32>
    %cst_5 = arith.constant 0.000000e+00 : f32
    %6 = vector.broadcast %cst_5 : f32 to vector<8x512xf32>
    %7 = arith.cmpf ogt, %5, %6 : vector<8x512xf32>
    %cst_6 = arith.constant 1.000000e-01 : f32
    %8 = vector.broadcast %cst_6 : f32 to vector<8x512xf32>
    %9 = arith.mulf %8, %5 : vector<8x512xf32>
    %10 = arith.select %7, %5, %9 : vector<8x512xi1>, vector<8x512xf32>
    %c0_7 = arith.constant 0 : index
    %c0_8 = arith.constant 0 : index
    %11 = vector.load %arg4[%c0_7, %c0_8] : memref<512x256xf32, #tpu.memory_space<vmem>>, vector<512x256xf32>
    %cst_9 = arith.constant dense<0.000000e+00> : vector<8x256xf32>
    %12 = tpu.matmul %10, %11, %cst_9 {dimension_numbers = #tpu.dot_dimension_numbers<[1], [0], [0], [1], [0, 0, 1, 1], [], []>} : vector<8x512xf32>, vector<512x256xf32>, vector<8x256xf32> -> vector<8x256xf32>
    %c0_10 = arith.constant 0 : index
    %c0_11 = arith.constant 0 : index
    %13 = vector.load %arg5[%c0_10, %c0_11] : memref<1x256xf32, #tpu.memory_space<vmem>>, vector<1x256xf32>
    %14 = vector.broadcast %13 : vector<1x256xf32> to vector<8x256xf32>
    %15 = arith.addf %12, %14 : vector<8x256xf32>
    %cst_12 = arith.constant 0.000000e+00 : f32
    %16 = vector.broadcast %cst_12 : f32 to vector<8x256xf32>
    %17 = arith.cmpf ogt, %15, %16 : vector<8x256xf32>
    %cst_13 = arith.constant 1.000000e-01 : f32
    %18 = vector.broadcast %cst_13 : f32 to vector<8x256xf32>
    %19 = arith.mulf %18, %15 : vector<8x256xf32>
    %20 = arith.select %17, %15, %19 : vector<8x256xi1>, vector<8x256xf32>
    %c0_14 = arith.constant 0 : index
    %c0_15 = arith.constant 0 : index
    %21 = vector.load %arg6[%c0_14, %c0_15] : memref<256x128xf32, #tpu.memory_space<vmem>>, vector<256x128xf32>
    %cst_16 = arith.constant dense<0.000000e+00> : vector<8x128xf32>
    %22 = tpu.matmul %20, %21, %cst_16 {dimension_numbers = #tpu.dot_dimension_numbers<[1], [0], [0], [1], [0, 0, 1, 1], [], []>} : vector<8x256xf32>, vector<256x128xf32>, vector<8x128xf32> -> vector<8x128xf32>
    %c0_17 = arith.constant 0 : index
    %c0_18 = arith.constant 0 : index
    %23 = vector.load %arg7[%c0_17, %c0_18] : memref<1x128xf32, #tpu.memory_space<vmem>>, vector<1x128xf32>
    %24 = vector.broadcast %23 : vector<1x128xf32> to vector<8x128xf32>
    %25 = arith.addf %22, %24 : vector<8x128xf32>
    %cst_19 = arith.constant 0.000000e+00 : f32
    %26 = vector.broadcast %cst_19 : f32 to vector<8x128xf32>
    %27 = arith.cmpf ogt, %25, %26 : vector<8x128xf32>
    %cst_20 = arith.constant 1.000000e-01 : f32
    %28 = vector.broadcast %cst_20 : f32 to vector<8x128xf32>
    %29 = arith.mulf %28, %25 : vector<8x128xf32>
    %30 = arith.select %27, %25, %29 : vector<8x128xi1>, vector<8x128xf32>
    %c0_21 = arith.constant 0 : index
    %c0_22 = arith.constant 0 : index
    %31 = vector.load %arg8[%c0_21, %c0_22] : memref<128x256xf32, #tpu.memory_space<vmem>>, vector<128x256xf32>
    %cst_23 = arith.constant dense<0.000000e+00> : vector<8x256xf32>
    %32 = tpu.matmul %30, %31, %cst_23 {dimension_numbers = #tpu.dot_dimension_numbers<[1], [0], [0], [1], [0, 0, 1, 1], [], []>} : vector<8x128xf32>, vector<128x256xf32>, vector<8x256xf32> -> vector<8x256xf32>
    %c0_24 = arith.constant 0 : index
    %c0_25 = arith.constant 0 : index
    %33 = vector.load %arg9[%c0_24, %c0_25] : memref<1x256xf32, #tpu.memory_space<vmem>>, vector<1x256xf32>
    %34 = vector.broadcast %33 : vector<1x256xf32> to vector<8x256xf32>
    %35 = arith.addf %32, %34 : vector<8x256xf32>
    %cst_26 = arith.constant 0.000000e+00 : f32
    %36 = vector.broadcast %cst_26 : f32 to vector<8x256xf32>
    %37 = arith.cmpf ogt, %35, %36 : vector<8x256xf32>
    %cst_27 = arith.constant 1.000000e-01 : f32
    %38 = vector.broadcast %cst_27 : f32 to vector<8x256xf32>
    %39 = arith.mulf %38, %35 : vector<8x256xf32>
    %40 = arith.select %37, %35, %39 : vector<8x256xi1>, vector<8x256xf32>
    %c0_28 = arith.constant 0 : index
    %c0_29 = arith.constant 0 : index
    %41 = vector.load %arg10[%c0_28, %c0_29] : memref<256x128xf32, #tpu.memory_space<vmem>>, vector<256x128xf32>
    %cst_30 = arith.constant dense<0.000000e+00> : vector<8x128xf32>
    %42 = tpu.matmul %40, %41, %cst_30 {dimension_numbers = #tpu.dot_dimension_numbers<[1], [0], [0], [1], [0, 0, 1, 1], [], []>} : vector<8x256xf32>, vector<256x128xf32>, vector<8x128xf32> -> vector<8x128xf32>
    %c0_31 = arith.constant 0 : index
    %c0_32 = arith.constant 0 : index
    %43 = vector.load %arg11[%c0_31, %c0_32] : memref<1x128xf32, #tpu.memory_space<vmem>>, vector<1x128xf32>
    %44 = vector.broadcast %43 : vector<1x128xf32> to vector<8x128xf32>
    %45 = arith.addf %42, %44 : vector<8x128xf32>
    %cst_33 = arith.constant 0.000000e+00 : f32
    %46 = vector.broadcast %cst_33 : f32 to vector<8x128xf32>
    %47 = arith.maximumf %45, %46 : vector<8x128xf32>
    %c0_34 = arith.constant 0 : index
    %c0_35 = arith.constant 0 : index
    %48 = vector.load %arg12[%c0_34, %c0_35] : memref<128x256xf32, #tpu.memory_space<vmem>>, vector<128x256xf32>
    %cst_36 = arith.constant dense<0.000000e+00> : vector<8x256xf32>
    %49 = tpu.matmul %47, %48, %cst_36 {dimension_numbers = #tpu.dot_dimension_numbers<[1], [0], [0], [1], [0, 0, 1, 1], [], []>} : vector<8x128xf32>, vector<128x256xf32>, vector<8x256xf32> -> vector<8x256xf32>
    %50 = arith.mulf %49, %40 : vector<8x256xf32>
    %c0_37 = arith.constant 0 : index
    %c0_38 = arith.constant 0 : index
    %51 = vector.load %arg13[%c0_37, %c0_38] : memref<256x128xf32, #tpu.memory_space<vmem>>, vector<256x128xf32>
    %cst_39 = arith.constant dense<0.000000e+00> : vector<8x128xf32>
    %52 = tpu.matmul %50, %51, %cst_39 {dimension_numbers = #tpu.dot_dimension_numbers<[1], [0], [0], [1], [0, 0, 1, 1], [], []>} : vector<8x256xf32>, vector<256x128xf32>, vector<8x128xf32> -> vector<8x128xf32>
    %c0_40 = arith.constant 0 : index
    %c0_41 = arith.constant 0 : index
    %53 = vector.load %arg14[%c0_40, %c0_41] : memref<1x128xf32, #tpu.memory_space<vmem>>, vector<1x128xf32>
    %54 = vector.broadcast %53 : vector<1x128xf32> to vector<8x128xf32>
    %55 = arith.addf %52, %54 : vector<8x128xf32>
    %cst_42 = arith.constant 0.000000e+00 : f32
    %56 = vector.broadcast %cst_42 : f32 to vector<8x128xf32>
    %57 = arith.cmpf ogt, %55, %56 : vector<8x128xf32>
    %cst_43 = arith.constant 1.000000e-01 : f32
    %58 = vector.broadcast %cst_43 : f32 to vector<8x128xf32>
    %59 = arith.mulf %58, %55 : vector<8x128xf32>
    %60 = arith.select %57, %55, %59 : vector<8x128xi1>, vector<8x128xf32>
    %c0_44 = arith.constant 0 : index
    %c0_45 = arith.constant 0 : index
    %61 = vector.load %arg15[%c0_44, %c0_45] : memref<128x128xf32, #tpu.memory_space<vmem>>, vector<128x128xf32>
    %cst_46 = arith.constant dense<0.000000e+00> : vector<8x128xf32>
    %62 = tpu.matmul %60, %61, %cst_46 {dimension_numbers = #tpu.dot_dimension_numbers<[1], [0], [0], [1], [0, 0, 1, 1], [], []>} : vector<8x128xf32>, vector<128x128xf32>, vector<8x128xf32> -> vector<8x128xf32>
    %c0_47 = arith.constant 0 : index
    %c0_48 = arith.constant 0 : index
    %63 = vector.load %arg16[%c0_47, %c0_48] : memref<1x128xf32, #tpu.memory_space<vmem>>, vector<1x128xf32>
    %64 = vector.broadcast %63 : vector<1x128xf32> to vector<8x128xf32>
    %65 = arith.addf %62, %64 : vector<8x128xf32>
    %cst_49 = arith.constant 0.000000e+00 : f32
    %66 = vector.broadcast %cst_49 : f32 to vector<8x128xf32>
    %67 = arith.cmpf ogt, %65, %66 : vector<8x128xf32>
    %cst_50 = arith.constant 1.000000e-01 : f32
    %68 = vector.broadcast %cst_50 : f32 to vector<8x128xf32>
    %69 = arith.mulf %68, %65 : vector<8x128xf32>
    %70 = arith.select %67, %65, %69 : vector<8x128xi1>, vector<8x128xf32>
    %c0_51 = arith.constant 0 : index
    %c0_52 = arith.constant 0 : index
    %71 = vector.load %arg17[%c0_51, %c0_52] : memref<128x128xf32, #tpu.memory_space<vmem>>, vector<128x128xf32>
    %cst_53 = arith.constant dense<0.000000e+00> : vector<8x128xf32>
    %72 = tpu.matmul %70, %71, %cst_53 {dimension_numbers = #tpu.dot_dimension_numbers<[1], [0], [0], [1], [0, 0, 1, 1], [], []>} : vector<8x128xf32>, vector<128x128xf32>, vector<8x128xf32> -> vector<8x128xf32>
    %c0_54 = arith.constant 0 : index
    %c0_55 = arith.constant 0 : index
    %73 = vector.load %arg18[%c0_54, %c0_55] : memref<1x128xf32, #tpu.memory_space<vmem>>, vector<1x128xf32>
    %74 = vector.broadcast %73 : vector<1x128xf32> to vector<8x128xf32>
    %75 = arith.addf %72, %74 : vector<8x128xf32>
    %c0_56 = arith.constant 0 : index
    %c0_57 = arith.constant 0 : index
    %76 = vector.load %arg19[%c0_56, %c0_57] : memref<8x128xf32, #tpu.memory_space<vmem>>, vector<8x128xf32>
    tpu.vector_store %arg19[%c0_56, %c0_57], %75 {strides = array<i32>} : memref<8x128xf32, #tpu.memory_space<vmem>>, vector<8x128xf32>,
    return
  }
  func.func @transform_0(%arg0: i32) -> (i32, i32) {
    %c0_i32 = arith.constant 0 : i32
    %c0_i32_0 = arith.constant 0 : i32
    return %arg0, %c0_i32 : i32, i32
  }
  func.func @transform_1(%arg0: i32) -> (i32, i32) {
    %c0_i32 = arith.constant 0 : i32
    %c0_i32_0 = arith.constant 0 : i32
    %c0_i32_1 = arith.constant 0 : i32
    return %c0_i32, %c0_i32_0 : i32, i32
  }
  func.func @transform_2(%arg0: i32) -> (i32, i32) {
    %c0_i32 = arith.constant 0 : i32
    %c0_i32_0 = arith.constant 0 : i32
    %c0_i32_1 = arith.constant 0 : i32
    return %c0_i32, %c0_i32_0 : i32, i32
  }
  func.func @transform_3(%arg0: i32) -> (i32, i32) {
    %c0_i32 = arith.constant 0 : i32
    %c0_i32_0 = arith.constant 0 : i32
    %c0_i32_1 = arith.constant 0 : i32
    return %c0_i32, %c0_i32_0 : i32, i32
  }
  func.func @transform_4(%arg0: i32) -> (i32, i32) {
    %c0_i32 = arith.constant 0 : i32
    %c0_i32_0 = arith.constant 0 : i32
    %c0_i32_1 = arith.constant 0 : i32
    return %c0_i32, %c0_i32_0 : i32, i32
  }
  func.func @transform_5(%arg0: i32) -> (i32, i32) {
    %c0_i32 = arith.constant 0 : i32
    %c0_i32_0 = arith.constant 0 : i32
    %c0_i32_1 = arith.constant 0 : i32
    return %c0_i32, %c0_i32_0 : i32, i32
  }
  func.func @transform_6(%arg0: i32) -> (i32, i32) {
    %c0_i32 = arith.constant 0 : i32
    %c0_i32_0 = arith.constant 0 : i32
    %c0_i32_1 = arith.constant 0 : i32
    return %c0_i32, %c0_i32_0 : i32, i32
  }
  func.func @transform_7(%arg0: i32) -> (i32, i32) {
    %c0_i32 = arith.constant 0 : i32
    %c0_i32_0 = arith.constant 0 : i32
    %c0_i32_1 = arith.constant 0 : i32
    return %c0_i32, %c0_i32_0 : i32, i32
  }
  func.func @transform_8(%arg0: i32) -> (i32, i32) {
    %c0_i32 = arith.constant 0 : i32
    %c0_i32_0 = arith.constant 0 : i32
    %c0_i32_1 = arith.constant 0 : i32
    return %c0_i32, %c0_i32_0 : i32, i32
  }
  func.func @transform_9(%arg0: i32) -> (i32, i32) {
    %c0_i32 = arith.constant 0 : i32
    %c0_i32_0 = arith.constant 0 : i32
    %c0_i32_1 = arith.constant 0 : i32
    return %c0_i32, %c0_i32_0 : i32, i32
  }
  func.func @transform_10(%arg0: i32) -> (i32, i32) {
    %c0_i32 = arith.constant 0 : i32
    %c0_i32_0 = arith.constant 0 : i32
    %c0_i32_1 = arith.constant 0 : i32
    return %c0_i32, %c0_i32_0 : i32, i32
  }
  func.func @transform_11(%arg0: i32) -> (i32, i32) {
    %c0_i32 = arith.constant 0 : i32
    %c0_i32_0 = arith.constant 0 : i32
    %c0_i32_1 = arith.constant 0 : i32
    return %c0_i32, %c0_i32_0 : i32, i32
  }
  func.func @transform_12(%arg0: i32) -> (i32, i32) {
    %c0_i32 = arith.constant 0 : i32
    %c0_i32_0 = arith.constant 0 : i32
    %c0_i32_1 = arith.constant 0 : i32
    return %c0_i32, %c0_i32_0 : i32, i32
  }
  func.func @transform_13(%arg0: i32) -> (i32, i32) {
    %c0_i32 = arith.constant 0 : i32
    %c0_i32_0 = arith.constant 0 : i32
    %c0_i32_1 = arith.constant 0 : i32
    return %c0_i32, %c0_i32_0 : i32, i32
  }
  func.func @transform_14(%arg0: i32) -> (i32, i32) {
    %c0_i32 = arith.constant 0 : i32
    %c0_i32_0 = arith.constant 0 : i32
    %c0_i32_1 = arith.constant 0 : i32
    return %c0_i32, %c0_i32_0 : i32, i32
  }
  func.func @transform_15(%arg0: i32) -> (i32, i32) {
    %c0_i32 = arith.constant 0 : i32
    %c0_i32_0 = arith.constant 0 : i32
    %c0_i32_1 = arith.constant 0 : i32
    return %c0_i32, %c0_i32_0 : i32, i32
  }
  func.func @transform_16(%arg0: i32) -> (i32, i32) {
    %c0_i32 = arith.constant 0 : i32
    %c0_i32_0 = arith.constant 0 : i32
    %c0_i32_1 = arith.constant 0 : i32
    return %c0_i32, %c0_i32_0 : i32, i32
  }
  func.func @transform_17(%arg0: i32) -> (i32, i32) {
    %c0_i32 = arith.constant 0 : i32
    %c0_i32_0 = arith.constant 0 : i32
    %c0_i32_1 = arith.constant 0 : i32
    return %c0_i32, %c0_i32_0 : i32, i32
  }
  func.func @transform_18(%arg0: i32) -> (i32, i32) {
    %c0_i32 = arith.constant 0 : i32
    %c0_i32_0 = arith.constant 0 : i32
    return %arg0, %c0_i32 : i32, i32
  }
}

</mosaic_0001>

<bundles_post_ra>
// kernel: _lambda_.1
= control target key start
LH: loop header
LB: loop body
LE: loop exit
PB: predicated region body
PF: predicated region fallthrough
CT: control target
= control target key end

     0   :  { %s4389_s0 = inlined_call_operand.vmem [shape: f32[8,1024], index: 0, kind: input, shape index: {}]   ;;  %s4390_s1 = inlined_call_operand.hbm [shape: f32[1024,512], index: 1, kind: input, shape index: {}]   ;;  %s4391_s2 = inlined_call_operand.hbm [shape: f32[1,512], index: 2, kind: input, shape index: {}]   ;;  %s4392_s3 = inlined_call_operand.hbm [shape: f32[512,256], index: 3, kind: input, shape index: {}]   ;;  %s4393_s4 = inlined_call_operand.hbm [shape: f32[1,256], index: 4, kind: input, shape index: {}]   ;;  %s4394_s5 = inlined_call_operand.hbm [shape: f32[256,128], index: 5, kind: input, shape index: {}]   ;;  %s4395_s6 = inlined_call_operand.hbm [shape: f32[1,128], index: 6, kind: input, shape index: {}]   ;;  %s4396_s7 = inlined_call_operand.hbm [shape: f32[128,256], index: 7, kind: input, shape index: {}]   ;;  %s4397_s8 = inlined_call_operand.hbm [shape: f32[1,256], index: 8, kind: input, shape index: {}]   ;;  %s4398_s9 = inlined_call_operand.hbm [shape: f32[256,128], index: 9, kind: input, shape index: {}]   ;;  %s4399_s10 = inlined_call_operand.hbm [shape: f32[1,128], index: 10, kind: input, shape index: {}]   ;;  %s4400_s11 = inlined_call_operand.hbm [shape: f32[128,256], index: 11, kind: input, shape index: {}]   ;;  %s4401_s12 = inlined_call_operand.hbm [shape: f32[256,128], index: 12, kind: input, shape index: {}]   ;;  %s4402_s13 = inlined_call_operand.hbm [shape: f32[1,128], index: 13, kind: input, shape index: {}]   ;;  %s4403_s14 = inlined_call_operand.hbm [shape: f32[128,128], index: 14, kind: input, shape index: {}]   ;;  %s4404_s15 = inlined_call_operand.hbm [shape: f32[1,128], index: 15, kind: input, shape index: {}]   ;;  %s4405_s16 = inlined_call_operand.hbm [shape: f32[128,128], index: 16, kind: input, shape index: {}]   ;;  %s4406_s17 = inlined_call_operand.hbm [shape: f32[1,128], index: 17, kind: input, shape index: {}]   ;;  %s4407_s18 = inlined_call_operand.vmem [shape: f32[8,128], index: 18, kind: output, shape index: {}]  }
   0x1   :  { %4411 = sst [smem:[#allocation37_spill]] %s4389_s0 }
   0x2   :  { %4412 = sst [smem:[#allocation38_spill]] %s4390_s1 }
   0x3   :  { %4413 = sst [smem:[#allocation39_spill]] %s4391_s2 }
   0x4   :  { %23 = vsyncpa [#allocation3], 0 }
   0x5   :  { %24 = vsyncpa [#allocation5], 0 }
   0x6   :  { %25 = vsyncpa [#allocation8], 0 }
   0x7   :  { %26 = vsyncpa [#allocation11], 0 }
   0x8   :  { %27 = vsyncpa [#allocation14], 0 }
   0x9   :  { %28 = vsyncpa [#allocation17], 0 }
   0xa   :  { %29 = vsyncpa [#allocation20], 0 }
   0xb   :  { %30 = vsyncpa [#allocation23], 0 }
   0xc   :  { %31 = vsyncpa [#allocation26], 0  ;;  %s3946_s27 = smov [#allocation4]   ;;  %s3947_s29 = smov [#allocation7]  }
   0xd   :  { %s52_s28 = sshll.u32 %s3946_s27, 4  ;;  %s74_s30 = sshll.u32 %s3947_s29, 4  ;;  %s53_s28 = int_to_ptr.vmem [resolvable:$true] %s52_s28  ;;  %s75_s30 = int_to_ptr.vmem [resolvable:$true] %s74_s30 }
   0xe   :  { %s4414_s1 = sld [smem:[#allocation39_spill]] }
  0x14   :  { %s3554_s20 = scalar_lea.hbm %s4414_s1, 64 }
  0x15   :  { %p3555_p0 = scmp.ne.s32.totalorder %s4414_s1, %s3554_s20  ;;  %p3558_p1 = scmp.lt.u32.totalorder %s3554_s20, %s4414_s1 }
  0x17   :  { %p3560_p2 = pnand %p3558_p1, %p3555_p0 }
  0x19   :  { %3563 = shalt.err (!%p3560_p2)
}
  0x1a   :  { %s3564_s24 = scalar_lea.vmem %s53_s28, 64  ;;  %p3569_p4 = scmp.lt.s32.totalorder %s53_s28, %s53_s28 }
  0x1b   :  { %p3565_p3 = scmp.ne.s32.totalorder %s53_s28, %s3564_s24  ;;  %p3570_p5 = scmp.lt.s32.totalorder %s3564_s24, %s3564_s24 }
  0x1d   :  { %p3571_p6 = por %p3570_p5, %p3569_p4 }
  0x1f   :  { %p3572_p7 = pnand %p3571_p6, %p3565_p3 }
  0x21   :  { %3575 = shalt.err (!%p3572_p7)
}
  0x22   :  { %55 = dma.hbm_to_vmem [thread:$0]  %s4414_s1, 64, %s53_s28, [#allocation5]  }
  0x23   :  { %s3576_s0 = scalar_lea.hbm %s4393_s4, 32 }
  0x24   :  { %p3577_p8 = scmp.ne.s32.totalorder %s4393_s4, %s3576_s0  ;;  %p3580_p9 = scmp.lt.u32.totalorder %s3576_s0, %s4393_s4 }
  0x26   :  { %p3582_p10 = pnand %p3580_p9, %p3577_p8 }
  0x28   :  { %3585 = shalt.err (!%p3582_p10)
}
  0x29   :  { %s3586_s2 = scalar_lea.vmem %s75_s30, 32  ;;  %p3591_p12 = scmp.lt.s32.totalorder %s75_s30, %s75_s30 }
  0x2a   :  { %p3587_p11 = scmp.ne.s32.totalorder %s75_s30, %s3586_s2  ;;  %p3592_p13 = scmp.lt.s32.totalorder %s3586_s2, %s3586_s2 }
  0x2c   :  { %p3593_p0 = por %p3592_p13, %p3591_p12 }
  0x2e   :  { %p3594_p1 = pnand %p3593_p0, %p3587_p11 }
  0x30   :  { %3597 = shalt.err (!%p3594_p1)
}
  0x31   :  { %77 = dma.hbm_to_vmem [thread:$0]  %s4393_s4, 32, %s75_s30, [#allocation8]  }
  0x32   :  { %s3948_s23 = smov [#allocation10]   ;;  %s3949_s25 = smov [#allocation13]  }
  0x33   :  { %s96_s24 = sshll.u32 %s3948_s23, 4  ;;  %s118_s26 = sshll.u32 %s3949_s25, 4  ;;  %s97_s24 = int_to_ptr.vmem [resolvable:$true] %s96_s24  ;;  %s119_s26 = int_to_ptr.vmem [resolvable:$true] %s118_s26 }
  0x34   :  { %s3598_s0 = scalar_lea.hbm %s4395_s6, 16 }
  0x35   :  { %p3599_p2 = scmp.ne.s32.totalorder %s4395_s6, %s3598_s0  ;;  %p3602_p3 = scmp.lt.u32.totalorder %s3598_s0, %s4395_s6 }
  0x37   :  { %p3604_p4 = pnand %p3602_p3, %p3599_p2 }
  0x39   :  { %3607 = shalt.err (!%p3604_p4)
}
  0x3a   :  { %s3608_s4 = scalar_lea.vmem %s97_s24, 16  ;;  %s3612_s30 = scalar_lea.vmem %s97_s24, 32 }
  0x3b   :  { %p3609_p5 = scmp.ne.s32.totalorder %s97_s24, %s3608_s4  ;;  %p3613_p6 = scmp.lt.s32.totalorder %s97_s24, %s97_s24 }
  0x3c   :  { %p3614_p7 = scmp.lt.s32.totalorder %s3612_s30, %s3608_s4 }
  0x3e   :  { %p3615_p8 = por %p3614_p7, %p3613_p6 }
  0x40   :  { %p3616_p9 = pnand %p3615_p8, %p3609_p5 }
  0x42   :  { %3619 = shalt.err (!%p3616_p9)
}
  0x43   :  { %99 = dma.hbm_to_vmem [thread:$0]  %s4395_s6, 16, %s97_s24, [#allocation11]  }
  0x44   :  { %s3620_s25 = scalar_lea.hbm %s4397_s8, 32 }
  0x45   :  { %p3621_p10 = scmp.ne.s32.totalorder %s4397_s8, %s3620_s25  ;;  %p3624_p11 = scmp.lt.u32.totalorder %s3620_s25, %s4397_s8 }
  0x47   :  { %p3626_p12 = pnand %p3624_p11, %p3621_p10 }
  0x49   :  { %3629 = shalt.err (!%p3626_p12)
}
  0x4a   :  { %s3630_s21 = scalar_lea.vmem %s119_s26, 32  ;;  %p3635_p0 = scmp.lt.s32.totalorder %s119_s26, %s119_s26 }
  0x4b   :  { %p3631_p13 = scmp.ne.s32.totalorder %s119_s26, %s3630_s21  ;;  %p3636_p1 = scmp.lt.s32.totalorder %s3630_s21, %s3630_s21 }
  0x4d   :  { %p3637_p2 = por %p3636_p1, %p3635_p0 }
  0x4f   :  { %p3638_p3 = pnand %p3637_p2, %p3631_p13 }
  0x51   :  { %3641 = shalt.err (!%p3638_p3)
}
  0x52   :  { %121 = dma.hbm_to_vmem [thread:$0]  %s4397_s8, 32, %s119_s26, [#allocation14]  }
  0x53   :  { %s3950_s20 = smov [#allocation16]   ;;  %s3642_s2 = scalar_lea.hbm %s4399_s10, 16 }
  0x54   :  { %s140_s22 = sshll.u32 %s3950_s20, 4  ;;  %p3643_p4 = scmp.ne.s32.totalorder %s4399_s10, %s3642_s2  ;;  %s141_s22 = int_to_ptr.vmem [resolvable:$true] %s140_s22 }
  0x55   :  { %p3646_p5 = scmp.lt.u32.totalorder %s3642_s2, %s4399_s10 }
  0x57   :  { %p3648_p6 = pnand %p3646_p5, %p3643_p4 }
  0x59   :  { %3651 = shalt.err (!%p3648_p6)
}
  0x5a   :  { %s3652_s27 = scalar_lea.vmem %s141_s22, 16  ;;  %s3656_s8 = scalar_lea.vmem %s141_s22, 32 }
  0x5b   :  { %p3653_p7 = scmp.ne.s32.totalorder %s141_s22, %s3652_s27  ;;  %p3657_p8 = scmp.lt.s32.totalorder %s141_s22, %s141_s22 }
  0x5c   :  { %p3658_p9 = scmp.lt.s32.totalorder %s3656_s8, %s3652_s27 }
  0x5e   :  { %p3659_p10 = por %p3658_p9, %p3657_p8 }
  0x60   :  { %p3660_p11 = pnand %p3659_p10, %p3653_p7 }
  0x62   :  { %3663 = shalt.err (!%p3660_p11)
}
  0x63   :  { %143 = dma.hbm_to_vmem [thread:$0]  %s4399_s10, 16, %s141_s22, [#allocation17]  }
  0x64   :  { %s3951_s0 = smov [#allocation19]   ;;  %s3952_s21 = smov [#allocation22]  }
  0x65   :  { %s161_s19 = sshll.u32 %s3951_s0, 4  ;;  %s183_s6 = sshll.u32 %s3952_s21, 4  ;;  %s162_s19 = int_to_ptr.vmem [resolvable:$true] %s161_s19  ;;  %s184_s6 = int_to_ptr.vmem [resolvable:$true] %s183_s6 }
  0x66   :  { %s3664_s4 = scalar_lea.hbm %s4401_s12, 4096 }
  0x67   :  { %p3665_p12 = scmp.ne.s32.totalorder %s4401_s12, %s3664_s4  ;;  %p3668_p13 = scmp.lt.u32.totalorder %s3664_s4, %s4401_s12 }
  0x69   :  { %p3670_p0 = pnand %p3668_p13, %p3665_p12 }
  0x6b   :  { %3673 = shalt.err (!%p3670_p0)
}
  0x6c   :  { %s3674_s10 = scalar_lea.vmem %s162_s19, 4096  ;;  %p3679_p2 = scmp.lt.s32.totalorder %s162_s19, %s162_s19 }
  0x6d   :  { %p3675_p1 = scmp.ne.s32.totalorder %s162_s19, %s3674_s10  ;;  %p3680_p3 = scmp.lt.s32.totalorder %s3674_s10, %s3674_s10 }
  0x6f   :  { %p3681_p4 = por %p3680_p3, %p3679_p2 }
  0x71   :  { %p3682_p5 = pnand %p3681_p4, %p3675_p1 }
  0x73   :  { %3685 = shalt.err (!%p3682_p5)
}
  0x74   :  { %s3953_s22 = smov 128   ;;  %s3954_s23 = smov 8  }
  0x75   :  { %167 = dma.hbm_to_vmem [thread:$0]  %s4401_s12, 4096, %s162_s19, [#allocation20], %s3953_s22, %s3953_s22, %s3954_s23  }
  0x76   :  { %s3686_s29 = scalar_lea.hbm %s4403_s14, 2048 }
  0x77   :  { %p3687_p6 = scmp.ne.s32.totalorder %s4403_s14, %s3686_s29  ;;  %p3690_p7 = scmp.lt.u32.totalorder %s3686_s29, %s4403_s14 }
  0x79   :  { %p3692_p8 = pnand %p3690_p7, %p3687_p6 }
  0x7b   :  { %3695 = shalt.err (!%p3692_p8)
}
  0x7c   :  { %s3696_s4 = scalar_lea.vmem %s184_s6, 2048  ;;  %p3701_p10 = scmp.lt.s32.totalorder %s184_s6, %s184_s6 }
  0x7d   :  { %p3697_p9 = scmp.ne.s32.totalorder %s184_s6, %s3696_s4  ;;  %p3702_p11 = scmp.lt.s32.totalorder %s3696_s4, %s3696_s4 }
  0x7f   :  { %p3703_p12 = por %p3702_p11, %p3701_p10 }
  0x81   :  { %p3704_p13 = pnand %p3703_p12, %p3697_p9 }
  0x83   :  { %3707 = shalt.err (!%p3704_p13)
}
  0x84   :  { %189 = dma.hbm_to_vmem [thread:$0]  %s4403_s14, 2048, %s184_s6, [#allocation23], %s3953_s22, %s3953_s22, %s3954_s23  }
  0x85   :  { %s3955_s30 = smov [#allocation25]   ;;  %s3956_s28 = smov [#allocation2]  }
  0x86   :  { %s205_s2 = sshll.u32 %s3955_s30, 4  ;;  %s39_s1 = sshll.u32 %s3956_s28, 4  ;;  %s206_s2 = int_to_ptr.vmem [resolvable:$true] %s205_s2  ;;  %s40_s1 = int_to_ptr.vmem [resolvable:$true] %s39_s1 }
  0x87   :  { %s3708_s27 = scalar_lea.hbm %s4405_s16, 2048 }
  0x88   :  { %p3709_p0 = scmp.ne.s32.totalorder %s4405_s16, %s3708_s27  ;;  %p3712_p1 = scmp.lt.u32.totalorder %s3708_s27, %s4405_s16 }
  0x8a   :  { %p3714_p2 = pnand %p3712_p1, %p3709_p0 }
  0x8c   :  { %3717 = shalt.err (!%p3714_p2)
}
  0x8d   :  { %s3718_s14 = scalar_lea.vmem %s206_s2, 2048  ;;  %p3723_p4 = scmp.lt.s32.totalorder %s206_s2, %s206_s2 }
  0x8e   :  { %p3719_p3 = scmp.ne.s32.totalorder %s206_s2, %s3718_s14  ;;  %p3724_p5 = scmp.lt.s32.totalorder %s3718_s14, %s3718_s14 }
  0x90   :  { %p3725_p6 = por %p3724_p5, %p3723_p4 }
  0x92   :  { %p3726_p7 = pnand %p3725_p6, %p3719_p3 }
  0x94   :  { %3729 = shalt.err (!%p3726_p7)
}
  0x95   :  { %211 = dma.hbm_to_vmem [thread:$0]  %s4405_s16, 2048, %s206_s2, [#allocation26], %s3953_s22, %s3953_s22, %s3954_s23  }
  0x96   :  { %s4415_s4 = sld [smem:[#allocation38_spill]] }
  0x9c   :  { %s3730_s12 = scalar_lea.hbm %s4415_s4, 65536 }
  0x9d   :  { %p3731_p8 = scmp.ne.s32.totalorder %s4415_s4, %s3730_s12  ;;  %p3734_p9 = scmp.lt.u32.totalorder %s3730_s12, %s4415_s4 }
  0x9f   :  { %p3736_p10 = pnand %p3734_p9, %p3731_p8 }
  0xa1   :  { %3739 = shalt.err (!%p3736_p10)
}
  0xa2   :  { %s3740_s25 = scalar_lea.vmem %s40_s1, 65536  ;;  %p3745_p12 = scmp.lt.s32.totalorder %s40_s1, %s40_s1 }
  0xa3   :  { %p3741_p11 = scmp.ne.s32.totalorder %s40_s1, %s3740_s25  ;;  %p3746_p13 = scmp.lt.s32.totalorder %s3740_s25, %s3740_s25 }
  0xa5   :  { %p3747_p0 = por %p3746_p13, %p3745_p12 }
  0xa7   :  { %p3748_p1 = pnand %p3747_p0, %p3741_p11 }
  0xa9   :  { %3751 = shalt.err (!%p3748_p1)
}
  0xaa   :  { %s3957_s16 = smov 512   ;;  %s3958_s2 = smov 32  }
  0xab   :  { %45 = dma.hbm_to_vmem [thread:$0]  %s4415_s4, 65536, %s40_s1, [#allocation3], %s3957_s16, %s3957_s16, %s3958_s2  }
  0xac   :  { %s3959_s26 = smov [#allocation6]   ;;  %s3752_s6 = scalar_lea.hbm %s4392_s3, 16384 }
  0xad   :  { %s61_s29 = sshll.u32 %s3959_s26, 4  ;;  %p3753_p2 = scmp.ne.s32.totalorder %s4392_s3, %s3752_s6  ;;  %s62_s29 = int_to_ptr.vmem [resolvable:$true] %s61_s29 }
  0xae   :  { %p3756_p3 = scmp.lt.u32.totalorder %s3752_s6, %s4392_s3 }
  0xb0   :  { %p3758_p4 = pnand %p3756_p3, %p3753_p2 }
  0xb2   :  { %3761 = shalt.err (!%p3758_p4)
}
  0xb3   :  { %s3762_s19 = scalar_lea.vmem %s62_s29, 16384  ;;  %p3767_p6 = scmp.lt.s32.totalorder %s62_s29, %s62_s29 }
  0xb4   :  { %p3763_p5 = scmp.ne.s32.totalorder %s62_s29, %s3762_s19  ;;  %p3768_p7 = scmp.lt.s32.totalorder %s3762_s19, %s3762_s19 }
  0xb6   :  { %p3769_p8 = por %p3768_p7, %p3767_p6 }
  0xb8   :  { %p3770_p9 = pnand %p3769_p8, %p3763_p5 }
  0xba   :  { %3773 = shalt.err (!%p3770_p9)
}
  0xbb   :  { %s3960_s1 = smov 256   ;;  %s3961_s4 = smov 16  }
  0xbc   :  { %67 = dma.hbm_to_vmem [thread:$0]  %s4392_s3, 16384, %s62_s29, [#allocation5], %s3960_s1, %s3960_s1, %s3961_s4  }
  0xbd   :  { %s3962_s10 = smov [#allocation9]   ;;  %s3963_s16 = smov [#allocation12]  }
  0xbe   :  { %s83_s25 = sshll.u32 %s3962_s10, 4  ;;  %s105_s2 = sshll.u32 %s3963_s16, 4  ;;  %s84_s25 = int_to_ptr.vmem [resolvable:$true] %s83_s25  ;;  %s4199_s2 = int_to_ptr.vmem [resolvable:$true] %s105_s2 }
  0xbf   :  { %s3774_s26 = scalar_lea.hbm %s4394_s5, 4096 }
  0xc0   :  { %p3775_p10 = scmp.ne.s32.totalorder %s4394_s5, %s3774_s26  ;;  %p3778_p11 = scmp.lt.u32.totalorder %s3774_s26, %s4394_s5 }
  0xc2   :  { %p3780_p12 = pnand %p3778_p11, %p3775_p10 }
  0xc4   :  { %3783 = shalt.err (!%p3780_p12)
}
  0xc5   :  { %s3784_s3 = scalar_lea.vmem %s84_s25, 4096  ;;  %p3789_p0 = scmp.lt.s32.totalorder %s84_s25, %s84_s25 }
  0xc6   :  { %p3785_p13 = scmp.ne.s32.totalorder %s84_s25, %s3784_s3  ;;  %p3790_p1 = scmp.lt.s32.totalorder %s3784_s3, %s3784_s3 }
  0xc8   :  { %p3791_p2 = por %p3790_p1, %p3789_p0 }
  0xca   :  { %p3792_p3 = pnand %p3791_p2, %p3785_p13 }
  0xcc   :  { %3795 = shalt.err (!%p3792_p3)
}
  0xcd   :  { %89 = dma.hbm_to_vmem [thread:$0]  %s4394_s5, 4096, %s84_s25, [#allocation8], %s3953_s22, %s3953_s22, %s3954_s23  }
  0xce   :  { %s3796_s19 = scalar_lea.hbm %s4396_s7, 4096 }
  0xcf   :  { %p3797_p4 = scmp.ne.s32.totalorder %s4396_s7, %s3796_s19  ;;  %p3800_p5 = scmp.lt.u32.totalorder %s3796_s19, %s4396_s7 }
  0xd1   :  { %p3802_p6 = pnand %p3800_p5, %p3797_p4 }
  0xd3   :  { %3805 = shalt.err (!%p3802_p6)
}
  0xd4   :  { %s3806_s27 = scalar_lea.vmem %s4199_s2, 4096  ;;  %p3811_p8 = scmp.lt.s32.totalorder %s4199_s2, %s4199_s2 }
  0xd5   :  { %p3807_p7 = scmp.ne.s32.totalorder %s4199_s2, %s3806_s27  ;;  %p3812_p9 = scmp.lt.s32.totalorder %s3806_s27, %s3806_s27 }
  0xd7   :  { %p3813_p10 = por %p3812_p9, %p3811_p8 }
  0xd9   :  { %p3814_p11 = pnand %p3813_p10, %p3807_p7 }
  0xdb   :  { %3817 = shalt.err (!%p3814_p11)
}
  0xdc   :  { %111 = dma.hbm_to_vmem [thread:$0]  %s4396_s7, 4096, %s4199_s2, [#allocation11], %s3960_s1, %s3960_s1, %s3961_s4  }
  0xdd   :  { %s3964_s8 = smov [#allocation15]   ;;  %s3965_s0 = smov [#allocation18]  }
  0xde   :  { %s127_s26 = sshll.u32 %s3964_s8, 4  ;;  %s149_s14 = sshll.u32 %s3965_s0, 4  ;;  %s128_s26 = int_to_ptr.vmem [resolvable:$true] %s127_s26  ;;  %s4236_s14 = int_to_ptr.vmem [resolvable:$true] %s149_s14 }
  0xdf   :  { %s3818_s3 = scalar_lea.hbm %s4398_s9, 4096 }
  0xe0   :  { %p3819_p12 = scmp.ne.s32.totalorder %s4398_s9, %s3818_s3  ;;  %p3822_p13 = scmp.lt.u32.totalorder %s3818_s3, %s4398_s9 }
  0xe2   :  { %p3824_p0 = pnand %p3822_p13, %p3819_p12 }
  0xe4   :  { %3827 = shalt.err (!%p3824_p0)
}
  0xe5   :  { %s3828_s7 = scalar_lea.vmem %s128_s26, 4096  ;;  %p3833_p2 = scmp.lt.s32.totalorder %s128_s26, %s128_s26 }
  0xe6   :  { %p3829_p1 = scmp.ne.s32.totalorder %s128_s26, %s3828_s7  ;;  %p3834_p3 = scmp.lt.s32.totalorder %s3828_s7, %s3828_s7 }
  0xe8   :  { %p3835_p4 = por %p3834_p3, %p3833_p2 }
  0xea   :  { %p3836_p5 = pnand %p3835_p4, %p3829_p1 }
  0xec   :  { %3839 = shalt.err (!%p3836_p5)
}
  0xed   :  { %133 = dma.hbm_to_vmem [thread:$0]  %s4398_s9, 4096, %s128_s26, [#allocation14], %s3953_s22, %s3953_s22, %s3954_s23  }
  0xee   :  { %s3840_s10 = scalar_lea.hbm %s4400_s11, 4096 }
  0xef   :  { %p3841_p6 = scmp.ne.s32.totalorder %s4400_s11, %s3840_s10  ;;  %p3844_p7 = scmp.lt.u32.totalorder %s3840_s10, %s4400_s11 }
  0xf1   :  { %p3846_p8 = pnand %p3844_p7, %p3841_p6 }
  0xf3   :  { %3849 = shalt.err (!%p3846_p8)
}
  0xf4   :  { %s3850_s8 = scalar_lea.vmem %s4236_s14, 4096  ;;  %p3855_p10 = scmp.lt.s32.totalorder %s4236_s14, %s4236_s14 }
  0xf5   :  { %p3851_p9 = scmp.ne.s32.totalorder %s4236_s14, %s3850_s8  ;;  %p3856_p11 = scmp.lt.s32.totalorder %s3850_s8, %s3850_s8 }
  0xf7   :  { %p3857_p12 = por %p3856_p11, %p3855_p10 }
  0xf9   :  { %p3858_p13 = pnand %p3857_p12, %p3851_p9 }
  0xfb   :  { %3861 = shalt.err (!%p3858_p13)
}
  0xfc   :  { %155 = dma.hbm_to_vmem [thread:$0]  %s4400_s11, 4096, %s4236_s14, [#allocation17], %s3960_s1, %s3960_s1, %s3961_s4  }
  0xfd   :  { %s3966_s23 = smov [#allocation21]   ;;  %s3967_s0 = smov [#allocation24]  }
  0xfe   :  { %s174_s26 = sshll.u32 %s3966_s23, 4  ;;  %s196_s6 = sshll.u32 %s3967_s0, 4  ;;  %s175_s26 = int_to_ptr.vmem [resolvable:$true] %s174_s26  ;;  %s197_s6 = int_to_ptr.vmem [resolvable:$true] %s196_s6 }
  0xff   :  { %s3862_s29 = scalar_lea.hbm %s4402_s13, 16 }
 0x100   :  { %p3863_p0 = scmp.ne.s32.totalorder %s4402_s13, %s3862_s29  ;;  %p3866_p1 = scmp.lt.u32.totalorder %s3862_s29, %s4402_s13 }
 0x102   :  { %p3868_p2 = pnand %p3866_p1, %p3863_p0 }
 0x104   :  { %3871 = shalt.err (!%p3868_p2)
}
 0x105   :  { %s3872_s11 = scalar_lea.vmem %s175_s26, 16  ;;  %s3876_s1 = scalar_lea.vmem %s175_s26, 32 }
 0x106   :  { %p3873_p3 = scmp.ne.s32.totalorder %s175_s26, %s3872_s11  ;;  %p3877_p4 = scmp.lt.s32.totalorder %s175_s26, %s175_s26 }
 0x107   :  { %p3878_p5 = scmp.lt.s32.totalorder %s3876_s1, %s3872_s11 }
 0x109   :  { %p3879_p6 = por %p3878_p5, %p3877_p4 }
 0x10b   :  { %p3880_p7 = pnand %p3879_p6, %p3873_p3 }
 0x10d   :  { %3883 = shalt.err (!%p3880_p7)
}
 0x10e   :  { %177 = dma.hbm_to_vmem [thread:$0]  %s4402_s13, 16, %s175_s26, [#allocation20]  }
 0x10f   :  { %s3884_s30 = scalar_lea.hbm %s4404_s15, 16 }
 0x110   :  { %p3885_p8 = scmp.ne.s32.totalorder %s4404_s15, %s3884_s30  ;;  %p3888_p9 = scmp.lt.u32.totalorder %s3884_s30, %s4404_s15 }
 0x112   :  { %p3890_p10 = pnand %p3888_p9, %p3885_p8 }
 0x114   :  { %3893 = shalt.err (!%p3890_p10)
}
 0x115   :  { %s3894_s5 = scalar_lea.vmem %s197_s6, 16  ;;  %s3898_s25 = scalar_lea.vmem %s197_s6, 32 }
 0x116   :  { %p3895_p11 = scmp.ne.s32.totalorder %s197_s6, %s3894_s5  ;;  %p3899_p12 = scmp.lt.s32.totalorder %s197_s6, %s197_s6 }
 0x117   :  { %p3900_p13 = scmp.lt.s32.totalorder %s3898_s25, %s3894_s5 }
 0x119   :  { %p3901_p0 = por %p3900_p13, %p3899_p12 }
 0x11b   :  { %p3902_p1 = pnand %p3901_p0, %p3895_p11 }
 0x11d   :  { %3905 = shalt.err (!%p3902_p1)
}
 0x11e   :  { %199 = dma.hbm_to_vmem [thread:$0]  %s4404_s15, 16, %s197_s6, [#allocation23]  }
 0x11f   :  { %s3968_s9 = smov [#allocation27]   ;;  %s3906_s0 = scalar_lea.hbm %s4406_s17, 16 }
 0x120   :  { %s218_s22 = sshll.u32 %s3968_s9, 4  ;;  %p3907_p2 = scmp.ne.s32.totalorder %s4406_s17, %s3906_s0  ;;  %s219_s22 = int_to_ptr.vmem [resolvable:$true] %s218_s22 }
 0x121   :  { %p3910_p3 = scmp.lt.u32.totalorder %s3906_s0, %s4406_s17 }
 0x123   :  { %p3912_p4 = pnand %p3910_p3, %p3907_p2 }
 0x125   :  { %3915 = shalt.err (!%p3912_p4)
}
 0x126   :  { %s3916_s20 = scalar_lea.vmem %s219_s22, 16  ;;  %s3920_s15 = scalar_lea.vmem %s219_s22, 32 }
 0x127   :  { %p3917_p5 = scmp.ne.s32.totalorder %s219_s22, %s3916_s20  ;;  %p3921_p6 = scmp.lt.s32.totalorder %s219_s22, %s219_s22 }
 0x128   :  { %p3922_p7 = scmp.lt.s32.totalorder %s3920_s15, %s3916_s20 }
 0x12a   :  { %p3923_p8 = por %p3922_p7, %p3921_p6 }
 0x12c   :  { %p3924_p9 = pnand %p3923_p8, %p3917_p5 }
 0x12e   :  { %3927 = shalt.err (!%p3924_p9)
}
 0x12f   :  { %221 = dma.hbm_to_vmem [thread:$0]  %s4406_s17, 16, %s219_s22, [#allocation26]  }
 0x130   :  { %3928 = dma.done.wait [#allocation3], 65536  }
 0x131   :  { %3929 = vsyncadd [#allocation3], 4294901760 }
 0x132   :  { %3930 = dma.done.wait [#allocation5], 16448  }
 0x133   :  { %3931 = vsyncadd [#allocation5], 4294950848 }
 0x134   :  { %3932 = dma.done.wait [#allocation8], 4128  }
 0x135   :  { %3933 = vsyncadd [#allocation8], 4294963168 }
 0x136   :  { %3934 = dma.done.wait [#allocation11], 4112  }
 0x137   :  { %3935 = vsyncadd [#allocation11], 4294963184 }
 0x138   :  { %3936 = dma.done.wait [#allocation14], 4128  }
 0x139   :  { %3937 = vsyncadd [#allocation14], 4294963168 }
 0x13a   :  { %3938 = dma.done.wait [#allocation17], 4112  }
 0x13b   :  { %3939 = vsyncadd [#allocation17], 4294963184 }
 0x13c   :  { %3940 = dma.done.wait [#allocation20], 4112  }
 0x13d   :  { %3941 = vsyncadd [#allocation20], 4294963184 }
 0x13e   :  { %3942 = dma.done.wait [#allocation23], 2064  }
 0x13f   :  { %3943 = vsyncadd [#allocation23], 4294965232 }
 0x140   :  { %3944 = dma.done.wait [#allocation26], 2064  }
 0x141   :  { %3945 = vsyncadd [#allocation26], 4294965232  ;;  %v282_v0 = vld [vmem:[#allocation2 + $0x8] sm:$0xff]  ;;  %v284_v2 = vld [vmem:[#allocation2 + $0x18] sm:$0xff]  ;;  %s4416_s11 = sld [smem:[#allocation37_spill]]  ;;  %vm3971_vm9 = vmmov 0  }
 0x142   :  { %v286_v1 = vld [vmem:[#allocation2 + $0x28] sm:$0xff]  ;;  %v288_v4 = vld [vmem:[#allocation2 + $0x38] sm:$0xff]  ;;  %v281_v5 = vld [vmem:[#allocation2] sm:$0xff] }
 0x143   :  { %v2660_v3 = vpack.c.bf16 %v286_v1, %v282_v0  ;;  %v285_v6 = vld [vmem:[#allocation2 + $0x20] sm:$0xff]  ;;  %v2916_v7 = vpack.c.bf16 %v288_v4, %v284_v2  ;;  %v283_v9 = vld [vmem:[#allocation2 + $0x10] sm:$0xff]  ;;  %v290_v11 = vld [vmem:[#allocation2 + $0x48] sm:$0xff] }
 0x144   :  { %v2662_v8 = vpack.c.bf16 %v285_v6, %v281_v5  ;;  %v287_v10 = vld [vmem:[#allocation2 + $0x30] sm:$0xff]  ;;  %v294_v13 = vld [vmem:[#allocation2 + $0x68] sm:$0xff]  ;;  %v292_v14 = vld [vmem:[#allocation2 + $0x58] sm:$0xff] }
 0x145   :  { %2661 = vmatprep.subr.bf16.mxu0 %v2660_v3  ;;  %v2918_v12 = vpack.c.bf16 %v287_v10, %v283_v9  ;;  %v296_v15 = vld [vmem:[#allocation2 + $0x78] sm:$0xff]  ;;  %2917 = vmatprep.subr.bf16.mxu1 %v2916_v7  ;;  %v2664_v16 = vpack.c.bf16 %v294_v13, %v290_v11  ;;  %v289_v18 = vld [vmem:[#allocation2 + $0x40] sm:$0xff]  ;;  %v291_v20 = vld [vmem:[#allocation2 + $0x50] sm:$0xff] }
 0x146   :  { %2663 = vmatpush1.bf16.msra.mxu0 %v2662_v8  ;;  %v2920_v17 = vpack.c.bf16 %v296_v15, %v292_v14  ;;  %v293_v19 = vld [vmem:[#allocation2 + $0x60] sm:$0xff]  ;;  %v295_v22 = vld [vmem:[#allocation2 + $0x70] sm:$0xff]  ;;  %v298_v23 = vld [vmem:[#allocation2 + $0x88] sm:$0xff] }
 0x147   :  { %2919 = vmatpush1.bf16.msra.mxu1 %v2918_v12  ;;  %v2666_v21 = vpack.c.bf16 %v293_v19, %v289_v18  ;;  %v302_v24 = vld [vmem:[#allocation2 + $0xa8] sm:$0xff]  ;;  %2665 = vmatprep.subr.bf16.mxu0 %v2664_v16  ;;  %v2922_v25 = vpack.c.bf16 %v295_v22, %v291_v20  ;;  %v300_v27 = vld [vmem:[#allocation2 + $0x98] sm:$0xff]  ;;  %v297_v29 = vld [vmem:[#allocation2 + $0x80] sm:$0xff] }
 0x148   :  { %2921 = vmatprep.subr.bf16.mxu1 %v2920_v17  ;;  %v2668_v26 = vpack.c.bf16 %v302_v24, %v298_v23  ;;  %v304_v28 = vld [vmem:[#allocation2 + $0xb8] sm:$0xff]  ;;  %v301_v31 = vld [vmem:[#allocation2 + $0xa0] sm:$0xff]  ;;  %v299_v32 = vld [vmem:[#allocation2 + $0x90] sm:$0xff] }
 0x149   :  { %v2924_v30 = vpack.c.bf16 %v304_v28, %v300_v27  ;;  %v303_v33 = vld [vmem:[#allocation2 + $0xb0] sm:$0xff]  ;;  %v2670_v34 = vpack.c.bf16 %v301_v31, %v297_v29  ;;  %v306_v35 = vld [vmem:[#allocation2 + $0xc8] sm:$0xff]  ;;  %v308_v37 = vld [vmem:[#allocation2 + $0xd8] sm:$0xff] }
 0x14a   :  { %2667 = vmatpush1.bf16.msra.mxu0 %v2666_v21  ;;  %v310_v36 = vld [vmem:[#allocation2 + $0xe8] sm:$0xff]  ;;  %v2926_v38 = vpack.c.bf16 %v303_v33, %v299_v32  ;;  %v312_v40 = vld [vmem:[#allocation2 + $0xf8] sm:$0xff]  ;;  %v305_v41 = vld [vmem:[#allocation2 + $0xc0] sm:$0xff] }
 0x14b   :  { %2923 = vmatpush1.bf16.msra.mxu1 %v2922_v25  ;;  %2669 = vmatprep.subr.bf16.mxu0 %v2668_v26  ;;  %v2672_v39 = vpack.c.bf16 %v310_v36, %v306_v35  ;;  %v309_v42 = vld [vmem:[#allocation2 + $0xe0] sm:$0xff]  ;;  %v2928_v43 = vpack.c.bf16 %v312_v40, %v308_v37  ;;  %v307_v44 = vld [vmem:[#allocation2 + $0xd0] sm:$0xff]  ;;  %v314_v46 = vld [vmem:[#allocation2 + $0x108] sm:$0xff] }
 0x14c   :  { %2925 = vmatprep.subr.bf16.mxu1 %v2924_v30  ;;  %v311_v45 = vld [vmem:[#allocation2 + $0xf0] sm:$0xff]  ;;  %v318_v47 = vld [vmem:[#allocation2 + $0x128] sm:$0xff]  ;;  %v316_v48 = vld [vmem:[#allocation2 + $0x118] sm:$0xff]  ;;  %v2674_v50 = vpack.c.bf16 %v309_v42, %v305_v41 }
 0x14d   :  { %v320_v49 = vld [vmem:[#allocation2 + $0x138] sm:$0xff]  ;;  %v2930_v51 = vpack.c.bf16 %v311_v45, %v307_v44  ;;  %v2676_v52 = vpack.c.bf16 %v318_v47, %v314_v46  ;;  %v313_v53 = vld [vmem:[#allocation2 + $0x100] sm:$0xff]  ;;  %v315_v55 = vld [vmem:[#allocation2 + $0x110] sm:$0xff] }
 0x14e   :  { %2671 = vmatpush1.bf16.msra.mxu0 %v2670_v34  ;;  %v317_v54 = vld [vmem:[#allocation2 + $0x120] sm:$0xff]  ;;  %v2932_v56 = vpack.c.bf16 %v320_v49, %v316_v48  ;;  %v319_v57 = vld [vmem:[#allocation2 + $0x130] sm:$0xff]  ;;  %v322_v58 = vld [vmem:[#allocation2 + $0x148] sm:$0xff] }
 0x14f   :  { %2927 = vmatpush1.bf16.msra.mxu1 %v2926_v38  ;;  %2673 = vmatprep.subr.bf16.mxu0 %v2672_v39  ;;  %v326_v59 = vld [vmem:[#allocation2 + $0x168] sm:$0xff]  ;;  %v324_v60 = vld [vmem:[#allocation2 + $0x158] sm:$0xff]  ;;  %v2678_v62 = vpack.c.bf16 %v317_v54, %v313_v53  ;;  %v2934_v63 = vpack.c.bf16 %v319_v57, %v315_v55  ;;  %v321_v1 = vld [vmem:[#allocation2 + $0x140] sm:$0xff] }
 0x150   :  { %2929 = vmatprep.subr.bf16.mxu1 %v2928_v43  ;;  %v328_v61 = vld [vmem:[#allocation2 + $0x178] sm:$0xff]  ;;  %v2680_v0 = vpack.c.bf16 %v326_v59, %v322_v58  ;;  %v325_v2 = vld [vmem:[#allocation2 + $0x160] sm:$0xff]  ;;  %v323_v3 = vld [vmem:[#allocation2 + $0x150] sm:$0xff] }
 0x151   :  { %v2936_v4 = vpack.c.bf16 %v328_v61, %v324_v60  ;;  %v327_v5 = vld [vmem:[#allocation2 + $0x170] sm:$0xff]  ;;  %v330_v6 = vld [vmem:[#allocation2 + $0x188] sm:$0xff]  ;;  %v332_v8 = vld [vmem:[#allocation2 + $0x198] sm:$0xff]  ;;  %v2682_v10 = vpack.c.bf16 %v325_v2, %v321_v1 }
 0x152   :  { %2675 = vmatpush1.bf16.msra.mxu0 %v2674_v50  ;;  %v334_v7 = vld [vmem:[#allocation2 + $0x1a8] sm:$0xff]  ;;  %v336_v9 = vld [vmem:[#allocation2 + $0x1b8] sm:$0xff]  ;;  %v2938_v11 = vpack.c.bf16 %v327_v5, %v323_v3  ;;  %v329_v13 = vld [vmem:[#allocation2 + $0x180] sm:$0xff] }
 0x153   :  { %2931 = vmatpush1.bf16.msra.mxu1 %v2930_v51  ;;  %2677 = vmatprep.subr.bf16.mxu0 %v2676_v52  ;;  %v2684_v12 = vpack.c.bf16 %v334_v7, %v330_v6  ;;  %v333_v14 = vld [vmem:[#allocation2 + $0x1a0] sm:$0xff]  ;;  %v331_v15 = vld [vmem:[#allocation2 + $0x190] sm:$0xff]  ;;  %v2940_v16 = vpack.c.bf16 %v336_v9, %v332_v8  ;;  %v338_v18 = vld [vmem:[#allocation2 + $0x1c8] sm:$0xff] }
 0x154   :  { %2933 = vmatprep.subr.bf16.mxu1 %v2932_v56  ;;  %v335_v17 = vld [vmem:[#allocation2 + $0x1b0] sm:$0xff]  ;;  %v342_v19 = vld [vmem:[#allocation2 + $0x1e8] sm:$0xff]  ;;  %v340_v20 = vld [vmem:[#allocation2 + $0x1d8] sm:$0xff]  ;;  %v2686_v22 = vpack.c.bf16 %v333_v14, %v329_v13 }
 0x155   :  { %v344_v21 = vld [vmem:[#allocation2 + $0x1f8] sm:$0xff]  ;;  %v2942_v23 = vpack.c.bf16 %v335_v17, %v331_v15  ;;  %v2688_v24 = vpack.c.bf16 %v342_v19, %v338_v18  ;;  %v337_v25 = vld [vmem:[#allocation2 + $0x1c0] sm:$0xff]  ;;  %v339_v27 = vld [vmem:[#allocation2 + $0x1d0] sm:$0xff] }
 0x156   :  { %2679 = vmatpush1.bf16.msra.mxu0 %v2678_v62  ;;  %v341_v26 = vld [vmem:[#allocation2 + $0x1e0] sm:$0xff]  ;;  %v2944_v28 = vpack.c.bf16 %v344_v21, %v340_v20  ;;  %v343_v29 = vld [vmem:[#allocation2 + $0x1f0] sm:$0xff]  ;;  %v346_v30 = vld [vmem:[#allocation2 + $0x208] sm:$0xff] }
 0x157   :  { %2935 = vmatpush1.bf16.msra.mxu1 %v2934_v63  ;;  %2681 = vmatprep.subr.bf16.mxu0 %v2680_v0  ;;  %v350_v31 = vld [vmem:[#allocation2 + $0x228] sm:$0xff]  ;;  %v348_v32 = vld [vmem:[#allocation2 + $0x218] sm:$0xff]  ;;  %v2690_v34 = vpack.c.bf16 %v341_v26, %v337_v25  ;;  %v2946_v35 = vpack.c.bf16 %v343_v29, %v339_v27  ;;  %v345_v37 = vld [vmem:[#allocation2 + $0x200] sm:$0xff] }
 0x158   :  { %2937 = vmatprep.subr.bf16.mxu1 %v2936_v4  ;;  %v352_v33 = vld [vmem:[#allocation2 + $0x238] sm:$0xff]  ;;  %v2692_v36 = vpack.c.bf16 %v350_v31, %v346_v30  ;;  %v349_v38 = vld [vmem:[#allocation2 + $0x220] sm:$0xff]  ;;  %v347_v39 = vld [vmem:[#allocation2 + $0x210] sm:$0xff] }
 0x159   :  { %v2948_v40 = vpack.c.bf16 %v352_v33, %v348_v32  ;;  %v351_v41 = vld [vmem:[#allocation2 + $0x230] sm:$0xff]  ;;  %v354_v42 = vld [vmem:[#allocation2 + $0x248] sm:$0xff]  ;;  %v356_v44 = vld [vmem:[#allocation2 + $0x258] sm:$0xff]  ;;  %v2694_v46 = vpack.c.bf16 %v349_v38, %v345_v37 }
 0x15a   :  { %2683 = vmatpush1.bf16.msra.mxu0 %v2682_v10  ;;  %v358_v43 = vld [vmem:[#allocation2 + $0x268] sm:$0xff]  ;;  %v360_v45 = vld [vmem:[#allocation2 + $0x278] sm:$0xff]  ;;  %v2950_v47 = vpack.c.bf16 %v351_v41, %v347_v39  ;;  %v353_v49 = vld [vmem:[#allocation2 + $0x240] sm:$0xff] }
 0x15b   :  { %2939 = vmatpush1.bf16.msra.mxu1 %v2938_v11  ;;  %2685 = vmatprep.subr.bf16.mxu0 %v2684_v12  ;;  %v2696_v48 = vpack.c.bf16 %v358_v43, %v354_v42  ;;  %v357_v50 = vld [vmem:[#allocation2 + $0x260] sm:$0xff]  ;;  %v355_v51 = vld [vmem:[#allocation2 + $0x250] sm:$0xff]  ;;  %v2952_v52 = vpack.c.bf16 %v360_v45, %v356_v44  ;;  %v362_v54 = vld [vmem:[#allocation2 + $0x288] sm:$0xff] }
 0x15c   :  { %2941 = vmatprep.subr.bf16.mxu1 %v2940_v16  ;;  %v359_v53 = vld [vmem:[#allocation2 + $0x270] sm:$0xff]  ;;  %v366_v55 = vld [vmem:[#allocation2 + $0x2a8] sm:$0xff]  ;;  %v364_v56 = vld [vmem:[#allocation2 + $0x298] sm:$0xff]  ;;  %v2698_v58 = vpack.c.bf16 %v357_v50, %v353_v49 }
 0x15d   :  { %v368_v57 = vld [vmem:[#allocation2 + $0x2b8] sm:$0xff]  ;;  %v2954_v59 = vpack.c.bf16 %v359_v53, %v355_v51  ;;  %v2700_v60 = vpack.c.bf16 %v366_v55, %v362_v54  ;;  %v361_v61 = vld [vmem:[#allocation2 + $0x280] sm:$0xff]  ;;  %v363_v63 = vld [vmem:[#allocation2 + $0x290] sm:$0xff] }
 0x15e   :  { %2687 = vmatpush1.bf16.msra.mxu0 %v2686_v22  ;;  %v365_v62 = vld [vmem:[#allocation2 + $0x2a0] sm:$0xff]  ;;  %v2956_v0 = vpack.c.bf16 %v368_v57, %v364_v56  ;;  %v367_v1 = vld [vmem:[#allocation2 + $0x2b0] sm:$0xff]  ;;  %v370_v2 = vld [vmem:[#allocation2 + $0x2c8] sm:$0xff] }
 0x15f   :  { %2943 = vmatpush1.bf16.msra.mxu1 %v2942_v23  ;;  %2689 = vmatprep.subr.bf16.mxu0 %v2688_v24  ;;  %v374_v3 = vld [vmem:[#allocation2 + $0x2e8] sm:$0xff]  ;;  %v372_v4 = vld [vmem:[#allocation2 + $0x2d8] sm:$0xff]  ;;  %v2702_v6 = vpack.c.bf16 %v365_v62, %v361_v61  ;;  %v369_v7 = vld [vmem:[#allocation2 + $0x2c0] sm:$0xff]  ;;  %v2958_v8 = vpack.c.bf16 %v367_v1, %v363_v63 }
 0x160   :  { %2945 = vmatprep.subr.bf16.mxu1 %v2944_v28  ;;  %v376_v5 = vld [vmem:[#allocation2 + $0x2f8] sm:$0xff]  ;;  %v2704_v9 = vpack.c.bf16 %v374_v3, %v370_v2  ;;  %v373_v10 = vld [vmem:[#allocation2 + $0x2e0] sm:$0xff]  ;;  %v371_v11 = vld [vmem:[#allocation2 + $0x2d0] sm:$0xff] }
 0x161   :  { %v375_v12 = vld [vmem:[#allocation2 + $0x2f0] sm:$0xff]  ;;  %v2960_v13 = vpack.c.bf16 %v376_v5, %v372_v4  ;;  %v378_v14 = vld [vmem:[#allocation2 + $0x308] sm:$0xff]  ;;  %v380_v17 = vld [vmem:[#allocation2 + $0x318] sm:$0xff]  ;;  %v2706_v19 = vpack.c.bf16 %v373_v10, %v369_v7 }
 0x162   :  { %2691 = vmatpush1.bf16.msra.mxu0 %v2690_v34  ;;  %v382_v15 = vld [vmem:[#allocation2 + $0x328] sm:$0xff]  ;;  %v384_v18 = vld [vmem:[#allocation2 + $0x338] sm:$0xff]  ;;  %v2962_v20 = vpack.c.bf16 %v375_v12, %v371_v11  ;;  %v377_v22 = vld [vmem:[#allocation2 + $0x300] sm:$0xff] }
 0x163   :  { %2947 = vmatpush1.bf16.msra.mxu1 %v2946_v35  ;;  %2693 = vmatprep.subr.bf16.mxu0 %v2692_v36  ;;  %v274_v16 = vld [vmem:[%s4416_s11 + $0x8] sm:$0xff]  ;;  %v2708_v21 = vpack.c.bf16 %v382_v15, %v378_v14  ;;  %v381_v23 = vld [vmem:[#allocation2 + $0x320] sm:$0xff]  ;;  %v379_v24 = vld [vmem:[#allocation2 + $0x310] sm:$0xff]  ;;  %v2964_v25 = vpack.c.bf16 %v384_v18, %v380_v17 }
 0x164   :  { %2949 = vmatprep.subr.bf16.mxu1 %v2948_v40  ;;  %879 = vmatprep.mubr.f32.mxu0 %v274_v16  ;;  %v383_v26 = vld [vmem:[#allocation2 + $0x330] sm:$0xff]  ;;  %v386_v27 = vld [vmem:[#allocation2 + $0x348] sm:$0xff]  ;;  %v388_v29 = vld [vmem:[#allocation2 + $0x358] sm:$0xff]  ;;  %v2710_v31 = vpack.c.bf16 %v381_v23, %v377_v22 }
 0x165   :  { %1163 = vmatprep.mubr.f32.mxu1 %v274_v16  ;;  %v390_v28 = vld [vmem:[#allocation2 + $0x368] sm:$0xff]  ;;  %v392_v30 = vld [vmem:[#allocation2 + $0x378] sm:$0xff]  ;;  %v2966_v32 = vpack.c.bf16 %v383_v26, %v379_v24  ;;  %v385_v34 = vld [vmem:[#allocation2 + $0x340] sm:$0xff] }
 0x166   :  { %2695 = vmatpush1.bf16.msra.mxu0 %v2694_v46  ;;  %v2712_v33 = vpack.c.bf16 %v390_v28, %v386_v27  ;;  %v389_v35 = vld [vmem:[#allocation2 + $0x360] sm:$0xff]  ;;  %v387_v36 = vld [vmem:[#allocation2 + $0x350] sm:$0xff]  ;;  %v2968_v37 = vpack.c.bf16 %v392_v30, %v388_v29  ;;  %v394_v39 = vld [vmem:[#allocation2 + $0x388] sm:$0xff] }
 0x167   :  { %2951 = vmatpush1.bf16.msra.mxu1 %v2950_v47  ;;  %2697 = vmatprep.subr.bf16.mxu0 %v2696_v48  ;;  %v391_v38 = vld [vmem:[#allocation2 + $0x370] sm:$0xff]  ;;  %v398_v40 = vld [vmem:[#allocation2 + $0x3a8] sm:$0xff]  ;;  %v396_v41 = vld [vmem:[#allocation2 + $0x398] sm:$0xff]  ;;  %v2714_v43 = vpack.c.bf16 %v389_v35, %v385_v34 }
 0x168   :  { %2953 = vmatprep.subr.bf16.mxu1 %v2952_v52  ;;  %v400_v42 = vld [vmem:[#allocation2 + $0x3b8] sm:$0xff]  ;;  %v2970_v44 = vpack.c.bf16 %v391_v38, %v387_v36  ;;  %v2716_v45 = vpack.c.bf16 %v398_v40, %v394_v39  ;;  %v393_v46 = vld [vmem:[#allocation2 + $0x380] sm:$0xff]  ;;  %v395_v48 = vld [vmem:[#allocation2 + $0x390] sm:$0xff] }
 0x169   :  { %v397_v47 = vld [vmem:[#allocation2 + $0x3a0] sm:$0xff]  ;;  %v2972_v49 = vpack.c.bf16 %v400_v42, %v396_v41  ;;  %v399_v50 = vld [vmem:[#allocation2 + $0x3b0] sm:$0xff]  ;;  %v402_v51 = vld [vmem:[#allocation2 + $0x3c8] sm:$0xff] }
 0x16a   :  { %2699 = vmatpush1.bf16.msra.mxu0 %v2698_v58  ;;  %v406_v52 = vld [vmem:[#allocation2 + $0x3e8] sm:$0xff]  ;;  %v404_v53 = vld [vmem:[#allocation2 + $0x3d8] sm:$0xff]  ;;  %v2718_v55 = vpack.c.bf16 %v397_v47, %v393_v46  ;;  %v2974_v56 = vpack.c.bf16 %v399_v50, %v395_v48  ;;  %v401_v58 = vld [vmem:[#allocation2 + $0x3c0] sm:$0xff] }
 0x16b   :  { %2955 = vmatpush1.bf16.msra.mxu1 %v2954_v59  ;;  %2701 = vmatprep.subr.bf16.mxu0 %v2700_v60  ;;  %v408_v54 = vld [vmem:[#allocation2 + $0x3f8] sm:$0xff]  ;;  %v2720_v57 = vpack.c.bf16 %v406_v52, %v402_v51  ;;  %v405_v59 = vld [vmem:[#allocation2 + $0x3e0] sm:$0xff]  ;;  %v403_v60 = vld [vmem:[#allocation2 + $0x3d0] sm:$0xff] }
 0x16c   :  { %2957 = vmatprep.subr.bf16.mxu1 %v2956_v0  ;;  %v2976_v61 = vpack.c.bf16 %v408_v54, %v404_v53  ;;  %v407_v62 = vld [vmem:[#allocation2 + $0x3f0] sm:$0xff]  ;;  %v410_v63 = vld [vmem:[#allocation2 + $0x408] sm:$0xff]  ;;  %v412_v1 = vld [vmem:[#allocation2 + $0x418] sm:$0xff]  ;;  %v2722_v3 = vpack.c.bf16 %v405_v59, %v401_v58 }
 0x16d   :  { %v414_v0 = vld [vmem:[#allocation2 + $0x428] sm:$0xff]  ;;  %v416_v2 = vld [vmem:[#allocation2 + $0x438] sm:$0xff]  ;;  %v2978_v4 = vpack.c.bf16 %v407_v62, %v403_v60  ;;  %v413_v7 = vld [vmem:[#allocation2 + $0x420] sm:$0xff] }
 0x16e   :  { %2703 = vmatpush1.bf16.msra.mxu0 %v2702_v6  ;;  %v2724_v5 = vpack.c.bf16 %v414_v0, %v410_v63  ;;  %v409_v6 = vld [vmem:[#allocation2 + $0x400] sm:$0xff]  ;;  %v415_v10 = vld [vmem:[#allocation2 + $0x430] sm:$0xff]  ;;  %v418_v11 = vld [vmem:[#allocation2 + $0x448] sm:$0xff] }
 0x16f   :  { %2959 = vmatpush1.bf16.msra.mxu1 %v2958_v8  ;;  %2705 = vmatprep.subr.bf16.mxu0 %v2704_v9  ;;  %v411_v8 = vld [vmem:[#allocation2 + $0x410] sm:$0xff]  ;;  %v2980_v9 = vpack.c.bf16 %v416_v2, %v412_v1  ;;  %v422_v12 = vld [vmem:[#allocation2 + $0x468] sm:$0xff]  ;;  %v424_v14 = vld [vmem:[#allocation2 + $0x478] sm:$0xff]  ;;  %v2726_v16 = vpack.c.bf16 %v413_v7, %v409_v6 }
 0x170   :  { %2961 = vmatprep.subr.bf16.mxu1 %v2960_v13  ;;  %v420_v13 = vld [vmem:[#allocation2 + $0x458] sm:$0xff]  ;;  %v273_v15 = vld [vmem:[%s4416_s11] sm:$0xff]  ;;  %v2982_v17 = vpack.c.bf16 %v415_v10, %v411_v8  ;;  %v2728_v18 = vpack.c.bf16 %v422_v12, %v418_v11  ;;  %v423_v23 = vld [vmem:[#allocation2 + $0x470] sm:$0xff] }
 0x171   :  { %v2984_v22 = vpack.c.bf16 %v424_v14, %v420_v13  ;;  %v426_v24 = vld [vmem:[#allocation2 + $0x488] sm:$0xff]  ;;  %v428_v26 = vld [vmem:[#allocation2 + $0x498] sm:$0xff]  ;;  %v431_v35 = vld [vmem:[#allocation2 + $0x4b0] sm:$0xff] }
 0x172   :  { %2707 = vmatpush1.bf16.msra.mxu0 %v2706_v19  ;;  %v417_v19 = vld [vmem:[#allocation2 + $0x440] sm:$0xff]  ;;  %v432_v27 = vld [vmem:[#allocation2 + $0x4b8] sm:$0xff]  ;;  %v434_v36 = vld [vmem:[#allocation2 + $0x4c8] sm:$0xff] }
 0x173   :  { %2963 = vmatpush1.bf16.msra.mxu1 %v2962_v20  ;;  %2709 = vmatprep.subr.bf16.mxu0 %v2708_v21  ;;  %v421_v20 = vld [vmem:[#allocation2 + $0x460] sm:$0xff]  ;;  %v419_v21 = vld [vmem:[#allocation2 + $0x450] sm:$0xff]  ;;  %v2988_v34 = vpack.c.bf16 %v432_v27, %v428_v26  ;;  %v436_v38 = vld [vmem:[#allocation2 + $0x4d8] sm:$0xff] }
 0x174   :  { %2965 = vmatprep.subr.bf16.mxu1 %v2964_v25  ;;  %v430_v25 = vld [vmem:[#allocation2 + $0x4a8] sm:$0xff]  ;;  %v2730_v28 = vpack.c.bf16 %v421_v20, %v417_v19  ;;  %v2986_v29 = vpack.c.bf16 %v423_v23, %v419_v21  ;;  %v440_v39 = vld [vmem:[#allocation2 + $0x4f8] sm:$0xff]  ;;  %v439_v47 = vld [vmem:[#allocation2 + $0x4f0] sm:$0xff] }
 0x175   :  { %v2732_v30 = vpack.c.bf16 %v430_v25, %v426_v24  ;;  %v2992_v46 = vpack.c.bf16 %v440_v39, %v436_v38  ;;  %v442_v48 = vld [vmem:[#allocation2 + $0x508] sm:$0xff]  ;;  %v444_v50 = vld [vmem:[#allocation2 + $0x518] sm:$0xff]  ;;  %v447_v59 = vld [vmem:[#allocation2 + $0x530] sm:$0xff] }
 0x176   :  { %2711 = vmatpush1.bf16.msra.mxu0 %v2710_v31  ;;  %v425_v31 = vld [vmem:[#allocation2 + $0x480] sm:$0xff]  ;;  %v448_v51 = vld [vmem:[#allocation2 + $0x538] sm:$0xff]  ;;  %v450_v60 = vld [vmem:[#allocation2 + $0x548] sm:$0xff] }
 0x177   :  { %2967 = vmatpush1.bf16.msra.mxu1 %v2966_v32  ;;  %2713 = vmatprep.subr.bf16.mxu0 %v2712_v33  ;;  %v429_v32 = vld [vmem:[#allocation2 + $0x4a0] sm:$0xff]  ;;  %v427_v33 = vld [vmem:[#allocation2 + $0x490] sm:$0xff]  ;;  %v2996_v58 = vpack.c.bf16 %v448_v51, %v444_v50  ;;  %v452_v62 = vld [vmem:[#allocation2 + $0x558] sm:$0xff] }
 0x178   :  { %2969 = vmatprep.subr.bf16.mxu1 %v2968_v37  ;;  %v438_v37 = vld [vmem:[#allocation2 + $0x4e8] sm:$0xff]  ;;  %v2734_v40 = vpack.c.bf16 %v429_v32, %v425_v31  ;;  %v2990_v41 = vpack.c.bf16 %v431_v35, %v427_v33  ;;  %v456_v63 = vld [vmem:[#allocation2 + $0x578] sm:$0xff]  ;;  %v455_v7 = vld [vmem:[#allocation2 + $0x570] sm:$0xff] }
 0x179   :  { %v2736_v42 = vpack.c.bf16 %v438_v37, %v434_v36  ;;  %v3000_v6 = vpack.c.bf16 %v456_v63, %v452_v62  ;;  %v458_v8 = vld [vmem:[#allocation2 + $0x588] sm:$0xff]  ;;  %v460_v10 = vld [vmem:[#allocation2 + $0x598] sm:$0xff]  ;;  %v457_v13 = vld [vmem:[#allocation2 + $0x580] sm:$0xff] }
 0x17a   :  { %2715 = vmatpush1.bf16.msra.mxu0 %v2714_v43  ;;  %v433_v43 = vld [vmem:[#allocation2 + $0x4c0] sm:$0xff]  ;;  %v464_v11 = vld [vmem:[#allocation2 + $0x5b8] sm:$0xff]  ;;  %v466_v20 = vld [vmem:[#allocation2 + $0x5c8] sm:$0xff] }
 0x17b   :  { %2971 = vmatpush1.bf16.msra.mxu1 %v2970_v44  ;;  %2717 = vmatprep.subr.bf16.mxu0 %v2716_v45  ;;  %v437_v44 = vld [vmem:[#allocation2 + $0x4e0] sm:$0xff]  ;;  %v435_v45 = vld [vmem:[#allocation2 + $0x4d0] sm:$0xff]  ;;  %v3004_v19 = vpack.c.bf16 %v464_v11, %v460_v10  ;;  %v470_v21 = vld [vmem:[#allocation2 + $0x5e8] sm:$0xff] }
 0x17c   :  { %2973 = vmatprep.subr.bf16.mxu1 %v2972_v49  ;;  %v446_v49 = vld [vmem:[#allocation2 + $0x528] sm:$0xff]  ;;  %v2738_v52 = vpack.c.bf16 %v437_v44, %v433_v43  ;;  %v2994_v53 = vpack.c.bf16 %v439_v47, %v435_v45  ;;  %v468_v23 = vld [vmem:[#allocation2 + $0x5d8] sm:$0xff]  ;;  %v2752_v27 = vpack.c.bf16 %v470_v21, %v466_v20  ;;  %v471_v32 = vld [vmem:[#allocation2 + $0x5f0] sm:$0xff] }
 0x17d   :  { %v2740_v54 = vpack.c.bf16 %v446_v49, %v442_v48  ;;  %v472_v24 = vld [vmem:[#allocation2 + $0x5f8] sm:$0xff]  ;;  %v474_v33 = vld [vmem:[#allocation2 + $0x608] sm:$0xff]  ;;  %v479_v44 = vld [vmem:[#allocation2 + $0x630] sm:$0xff] }
 0x17e   :  { %2719 = vmatpush1.bf16.msra.mxu0 %v2718_v55  ;;  %v441_v55 = vld [vmem:[#allocation2 + $0x500] sm:$0xff]  ;;  %v3008_v31 = vpack.c.bf16 %v472_v24, %v468_v23  ;;  %v476_v35 = vld [vmem:[#allocation2 + $0x618] sm:$0xff]  ;;  %v482_v45 = vld [vmem:[#allocation2 + $0x648] sm:$0xff] }
 0x17f   :  { %2975 = vmatpush1.bf16.msra.mxu1 %v2974_v56  ;;  %2721 = vmatprep.subr.bf16.mxu0 %v2720_v57  ;;  %v445_v56 = vld [vmem:[#allocation2 + $0x520] sm:$0xff]  ;;  %v443_v57 = vld [vmem:[#allocation2 + $0x510] sm:$0xff]  ;;  %v480_v36 = vld [vmem:[#allocation2 + $0x638] sm:$0xff] }
 0x180   :  { %2977 = vmatprep.subr.bf16.mxu1 %v2976_v61  ;;  %v454_v61 = vld [vmem:[#allocation2 + $0x568] sm:$0xff]  ;;  %v2742_v0 = vpack.c.bf16 %v445_v56, %v441_v55  ;;  %v2998_v1 = vpack.c.bf16 %v447_v59, %v443_v57  ;;  %v3012_v43 = vpack.c.bf16 %v480_v36, %v476_v35  ;;  %v484_v47 = vld [vmem:[#allocation2 + $0x658] sm:$0xff]  ;;  %v487_v56 = vld [vmem:[#allocation2 + $0x670] sm:$0xff] }
 0x181   :  { %v2744_v2 = vpack.c.bf16 %v454_v61, %v450_v60  ;;  %v488_v48 = vld [vmem:[#allocation2 + $0x678] sm:$0xff]  ;;  %v490_v57 = vld [vmem:[#allocation2 + $0x688] sm:$0xff]  ;;  %v505_v24 = vld [vmem:[#allocation2 + $0x700] sm:$0xff] }
 0x182   :  { %2723 = vmatpush1.bf16.msra.mxu0 %v2722_v3  ;;  %v449_v3 = vld [vmem:[#allocation2 + $0x540] sm:$0xff]  ;;  %v3016_v55 = vpack.c.bf16 %v488_v48, %v484_v47  ;;  %v492_v59 = vld [vmem:[#allocation2 + $0x698] sm:$0xff] }
 0x183   :  { %2979 = vmatpush1.bf16.msra.mxu1 %v2978_v4  ;;  %2725 = vmatprep.subr.bf16.mxu0 %v2724_v5  ;;  %v453_v4 = vld [vmem:[#allocation2 + $0x560] sm:$0xff]  ;;  %v451_v5 = vld [vmem:[#allocation2 + $0x550] sm:$0xff]  ;;  %v496_v60 = vld [vmem:[#allocation2 + $0x6b8] sm:$0xff] }
 0x184   :  { %2981 = vmatprep.subr.bf16.mxu1 %v2980_v9  ;;  %v462_v9 = vld [vmem:[#allocation2 + $0x5a8] sm:$0xff]  ;;  %v2746_v12 = vpack.c.bf16 %v453_v4, %v449_v3  ;;  %v3002_v14 = vpack.c.bf16 %v455_v7, %v451_v5  ;;  %v3020_v3 = vpack.c.bf16 %v496_v60, %v492_v59  ;;  %v495_v4 = vld [vmem:[#allocation2 + $0x6b0] sm:$0xff]  ;;  %v500_v7 = vld [vmem:[#allocation2 + $0x6d8] sm:$0xff] }
 0x185   :  { %880 = vmatmul.mubr.f32.vlgmr.msra.gmra.mrb[0].mxu0 %v273_v15  ;;  %v498_v5 = vld [vmem:[#allocation2 + $0x6c8] sm:$0xff]  ;;  %v512_v20 = vld [vmem:[#allocation2 + $0x738] sm:$0xff]  ;;  %v513_v36 = vld [vmem:[#allocation2 + $0x740] sm:$0xff] }
 0x186   :  { %2727 = vmatpush1.bf16.msra.mxu0 %v2726_v16  ;;  %1164 = vmatmul.mubr.f32.vlgmr.msra.gmra.mrb[0].mxu1 %v273_v15  ;;  %v2748_v15 = vpack.c.bf16 %v462_v9, %v458_v8  ;;  %v461_v16 = vld [vmem:[#allocation2 + $0x5a0] sm:$0xff]  ;;  %v504_v8 = vld [vmem:[#allocation2 + $0x6f8] sm:$0xff] }
 0x187   :  { %2983 = vmatpush1.bf16.msra.mxu1 %v2982_v17  ;;  %2729 = vmatprep.subr.bf16.mxu0 %v2728_v18  ;;  %v459_v17 = vld [vmem:[#allocation2 + $0x590] sm:$0xff]  ;;  %v2750_v25 = vpack.c.bf16 %v461_v16, %v457_v13  ;;  %v501_v13 = vld [vmem:[#allocation2 + $0x6e0] sm:$0xff] }
 0x188   :  { %2985 = vmatprep.subr.bf16.mxu1 %v2984_v22  ;;  %v463_v18 = vld [vmem:[#allocation2 + $0x5b0] sm:$0xff]  ;;  %v276_v22 = vld [vmem:[%s4416_s11 + $0x18] sm:$0xff]  ;;  %v521_v48 = vld [vmem:[#allocation2 + $0x780] sm:$0xff] }
 0x189   :  { %950 = vmatprep.mubr.f32.mxu0 %v276_v22  ;;  %1234 = vmatprep.mubr.f32.mxu1 %v276_v22  ;;  %v3006_v26 = vpack.c.bf16 %v463_v18, %v459_v17  ;;  %v503_v16 = vld [vmem:[#allocation2 + $0x6f0] sm:$0xff]  ;;  %v506_v17 = vld [vmem:[#allocation2 + $0x708] sm:$0xff]  ;;  %v529_v60 = vld [vmem:[#allocation2 + $0x7c0] sm:$0xff] }
 0x18a   :  { %2731 = vmatpush1.bf16.msra.mxu0 %v2730_v28  ;;  %v465_v28 = vld [vmem:[#allocation2 + $0x5c0] sm:$0xff]  ;;  %v510_v18 = vld [vmem:[#allocation2 + $0x728] sm:$0xff] }
 0x18b   :  { %2987 = vmatpush1.bf16.msra.mxu1 %v2986_v29  ;;  %2733 = vmatprep.subr.bf16.mxu0 %v2732_v30  ;;  %v469_v29 = vld [vmem:[#allocation2 + $0x5e0] sm:$0xff]  ;;  %v467_v30 = vld [vmem:[#allocation2 + $0x5d0] sm:$0xff]  ;;  %v2772_v23 = vpack.c.bf16 %v510_v18, %v506_v17 }
 0x18c   :  { %2989 = vmatprep.subr.bf16.mxu1 %v2988_v34  ;;  %v478_v34 = vld [vmem:[#allocation2 + $0x628] sm:$0xff]  ;;  %v2754_v37 = vpack.c.bf16 %v469_v29, %v465_v28  ;;  %v3010_v38 = vpack.c.bf16 %v471_v32, %v467_v30  ;;  %v511_v28 = vld [vmem:[#allocation2 + $0x730] sm:$0xff]  ;;  %v520_v32 = vld [vmem:[#allocation2 + $0x778] sm:$0xff] }
 0x18d   :  { %v2756_v39 = vpack.c.bf16 %v478_v34, %v474_v33  ;;  %v514_v29 = vld [vmem:[#allocation2 + $0x748] sm:$0xff]  ;;  %v275_v17 = vld [vmem:[%s4416_s11 + $0x10] sm:$0xff] }
 0x18e   :  { %2735 = vmatpush1.bf16.msra.mxu0 %v2734_v40  ;;  %v473_v40 = vld [vmem:[#allocation2 + $0x600] sm:$0xff]  ;;  %v518_v30 = vld [vmem:[#allocation2 + $0x768] sm:$0xff] }
 0x18f   :  { %2991 = vmatpush1.bf16.msra.mxu1 %v2990_v41  ;;  %2737 = vmatprep.subr.bf16.mxu0 %v2736_v42  ;;  %v477_v41 = vld [vmem:[#allocation2 + $0x620] sm:$0xff]  ;;  %v475_v42 = vld [vmem:[#allocation2 + $0x610] sm:$0xff]  ;;  %v2776_v35 = vpack.c.bf16 %v518_v30, %v514_v29  ;;  %v560_v29 = vld [vmem:[#allocation2 + $0x8b8] sm:$0xff] }
 0x190   :  { %2993 = vmatprep.subr.bf16.mxu1 %v2992_v46  ;;  %v486_v46 = vld [vmem:[#allocation2 + $0x668] sm:$0xff]  ;;  %v2758_v49 = vpack.c.bf16 %v477_v41, %v473_v40  ;;  %v3014_v50 = vpack.c.bf16 %v479_v44, %v475_v42  ;;  %v519_v40 = vld [vmem:[#allocation2 + $0x770] sm:$0xff]  ;;  %v528_v44 = vld [vmem:[#allocation2 + $0x7b8] sm:$0xff] }
 0x191   :  { %v2760_v51 = vpack.c.bf16 %v486_v46, %v482_v45  ;;  %v522_v41 = vld [vmem:[#allocation2 + $0x788] sm:$0xff] }
 0x192   :  { %2739 = vmatpush1.bf16.msra.mxu0 %v2738_v52  ;;  %v481_v52 = vld [vmem:[#allocation2 + $0x640] sm:$0xff]  ;;  %v526_v42 = vld [vmem:[#allocation2 + $0x7a8] sm:$0xff] }
 0x193   :  { %2995 = vmatpush1.bf16.msra.mxu1 %v2994_v53  ;;  %2741 = vmatprep.subr.bf16.mxu0 %v2740_v54  ;;  %v485_v53 = vld [vmem:[#allocation2 + $0x660] sm:$0xff]  ;;  %v483_v54 = vld [vmem:[#allocation2 + $0x650] sm:$0xff]  ;;  %v2780_v47 = vpack.c.bf16 %v526_v42, %v522_v41  ;;  %v278_v30 = vld [vmem:[%s4416_s11 + $0x28] sm:$0xff] }
 0x194   :  { %2997 = vmatprep.subr.bf16.mxu1 %v2996_v58  ;;  %v494_v58 = vld [vmem:[#allocation2 + $0x6a8] sm:$0xff]  ;;  %v2762_v61 = vpack.c.bf16 %v485_v53, %v481_v52  ;;  %v3018_v62 = vpack.c.bf16 %v487_v56, %v483_v54  ;;  %v527_v52 = vld [vmem:[#allocation2 + $0x7b0] sm:$0xff]  ;;  %v536_v56 = vld [vmem:[#allocation2 + $0x7f8] sm:$0xff] }
 0x195   :  { %v2764_v63 = vpack.c.bf16 %v494_v58, %v490_v57  ;;  %v530_v53 = vld [vmem:[#allocation2 + $0x7c8] sm:$0xff]  ;;  %v564_v41 = vld [vmem:[#allocation2 + $0x8d8] sm:$0xff] }
 0x196   :  { %2743 = vmatpush1.bf16.msra.mxu0 %v2742_v0  ;;  %v489_v0 = vld [vmem:[#allocation2 + $0x680] sm:$0xff]  ;;  %v534_v54 = vld [vmem:[#allocation2 + $0x7e8] sm:$0xff]  ;;  %v568_v42 = vld [vmem:[#allocation2 + $0x8f8] sm:$0xff] }
 0x197   :  { %2999 = vmatpush1.bf16.msra.mxu1 %v2998_v1  ;;  %2745 = vmatprep.subr.bf16.mxu0 %v2744_v2  ;;  %v493_v1 = vld [vmem:[#allocation2 + $0x6a0] sm:$0xff]  ;;  %v491_v2 = vld [vmem:[#allocation2 + $0x690] sm:$0xff]  ;;  %v2784_v59 = vpack.c.bf16 %v534_v54, %v530_v53  ;;  %v572_v53 = vld [vmem:[#allocation2 + $0x918] sm:$0xff] }
 0x198   :  { %3001 = vmatprep.subr.bf16.mxu1 %v3000_v6  ;;  %v502_v6 = vld [vmem:[#allocation2 + $0x6e8] sm:$0xff]  ;;  %v2766_v9 = vpack.c.bf16 %v493_v1, %v489_v0  ;;  %v3022_v10 = vpack.c.bf16 %v495_v4, %v491_v2  ;;  %v535_v0 = vld [vmem:[#allocation2 + $0x7f0] sm:$0xff]  ;;  %v544_v4 = vld [vmem:[#allocation2 + $0x838] sm:$0xff] }
 0x199   :  { %v2768_v11 = vpack.c.bf16 %v502_v6, %v498_v5  ;;  %v538_v1 = vld [vmem:[#allocation2 + $0x808] sm:$0xff]  ;;  %v576_v54 = vld [vmem:[#allocation2 + $0x938] sm:$0xff] }
 0x19a   :  { %2747 = vmatpush1.bf16.msra.mxu0 %v2746_v12  ;;  %v497_v12 = vld [vmem:[#allocation2 + $0x6c0] sm:$0xff]  ;;  %v542_v2 = vld [vmem:[#allocation2 + $0x828] sm:$0xff] }
 0x19b   :  { %3003 = vmatpush1.bf16.msra.mxu1 %v3002_v14  ;;  %2749 = vmatprep.subr.bf16.mxu0 %v2748_v15  ;;  %v499_v14 = vld [vmem:[#allocation2 + $0x6d0] sm:$0xff]  ;;  %v3024_v15 = vpack.c.bf16 %v504_v8, %v500_v7  ;;  %v2770_v21 = vpack.c.bf16 %v501_v13, %v497_v12  ;;  %v2788_v7 = vpack.c.bf16 %v542_v2, %v538_v1  ;;  %v537_v8 = vld [vmem:[#allocation2 + $0x800] sm:$0xff]  ;;  %v546_v13 = vld [vmem:[#allocation2 + $0x848] sm:$0xff] }
 0x19c   :  { %3005 = vmatprep.subr.bf16.mxu1 %v3004_v19  ;;  %v508_v19 = vld [vmem:[#allocation2 + $0x718] sm:$0xff]  ;;  %v3026_v22 = vpack.c.bf16 %v503_v16, %v499_v14  ;;  %v543_v12 = vld [vmem:[#allocation2 + $0x830] sm:$0xff]  ;;  %v550_v14 = vld [vmem:[#allocation2 + $0x868] sm:$0xff] }
 0x19d   :  { %v552_v16 = vld [vmem:[#allocation2 + $0x878] sm:$0xff] }
 0x19e   :  { %2751 = vmatpush1.bf16.msra.mxu0 %v2750_v25  ;;  %v509_v25 = vld [vmem:[#allocation2 + $0x720] sm:$0xff]  ;;  %v580_v1 = vld [vmem:[#allocation2 + $0x958] sm:$0xff] }
 0x19f   :  { %3007 = vmatpush1.bf16.msra.mxu1 %v3006_v26  ;;  %2753 = vmatprep.subr.bf16.mxu0 %v2752_v27  ;;  %v507_v26 = vld [vmem:[#allocation2 + $0x710] sm:$0xff]  ;;  %v3028_v27 = vpack.c.bf16 %v512_v20, %v508_v19  ;;  %v2774_v33 = vpack.c.bf16 %v509_v25, %v505_v24  ;;  %v2792_v20 = vpack.c.bf16 %v550_v14, %v546_v13  ;;  %v584_v2 = vld [vmem:[#allocation2 + $0x978] sm:$0xff] }
 0x1a0   :  { %3009 = vmatprep.subr.bf16.mxu1 %v3008_v31  ;;  %v516_v31 = vld [vmem:[#allocation2 + $0x758] sm:$0xff]  ;;  %v3030_v34 = vpack.c.bf16 %v511_v28, %v507_v26  ;;  %v551_v25 = vld [vmem:[#allocation2 + $0x870] sm:$0xff]  ;;  %v554_v26 = vld [vmem:[#allocation2 + $0x888] sm:$0xff] }
 0x1a1   :  { %v556_v28 = vld [vmem:[#allocation2 + $0x898] sm:$0xff] }
 0x1a2   :  { %2755 = vmatpush1.bf16.msra.mxu0 %v2754_v37  ;;  %v517_v37 = vld [vmem:[#allocation2 + $0x760] sm:$0xff]  ;;  %v588_v13 = vld [vmem:[#allocation2 + $0x998] sm:$0xff] }
 0x1a3   :  { %3011 = vmatpush1.bf16.msra.mxu1 %v3010_v38  ;;  %2757 = vmatprep.subr.bf16.mxu0 %v2756_v39  ;;  %v515_v38 = vld [vmem:[#allocation2 + $0x750] sm:$0xff]  ;;  %v3032_v39 = vpack.c.bf16 %v520_v32, %v516_v31  ;;  %v2778_v45 = vpack.c.bf16 %v517_v37, %v513_v36  ;;  %v3052_v37 = vpack.c.bf16 %v560_v29, %v556_v28  ;;  %v592_v14 = vld [vmem:[#allocation2 + $0x9b8] sm:$0xff] }
 0x1a4   :  { %3013 = vmatprep.subr.bf16.mxu1 %v3012_v43  ;;  %v524_v43 = vld [vmem:[#allocation2 + $0x798] sm:$0xff]  ;;  %v3034_v46 = vpack.c.bf16 %v519_v40, %v515_v38  ;;  %v555_v36 = vld [vmem:[#allocation2 + $0x890] sm:$0xff]  ;;  %v566_v40 = vld [vmem:[#allocation2 + $0x8e8] sm:$0xff] }
 0x1a5   :  { %v559_v38 = vld [vmem:[#allocation2 + $0x8b0] sm:$0xff] }
 0x1a6   :  { %2759 = vmatpush1.bf16.msra.mxu0 %v2758_v49  ;;  %v525_v49 = vld [vmem:[#allocation2 + $0x7a0] sm:$0xff] }
 0x1a7   :  { %3015 = vmatpush1.bf16.msra.mxu1 %v3014_v50  ;;  %2761 = vmatprep.subr.bf16.mxu0 %v2760_v51  ;;  %v523_v50 = vld [vmem:[#allocation2 + $0x790] sm:$0xff]  ;;  %v3036_v51 = vpack.c.bf16 %v528_v44, %v524_v43  ;;  %v2782_v57 = vpack.c.bf16 %v525_v49, %v521_v48  ;;  %v3054_v44 = vpack.c.bf16 %v559_v38, %v555_v36  ;;  %v606_v36 = vld [vmem:[#allocation2 + $0xa28] sm:$0xff]  ;;  %v608_v38 = vld [vmem:[#allocation2 + $0xa38] sm:$0xff] }
 0x1a8   :  { %3017 = vmatprep.subr.bf16.mxu1 %v3016_v55  ;;  %v532_v55 = vld [vmem:[#allocation2 + $0x7d8] sm:$0xff]  ;;  %v3038_v58 = vpack.c.bf16 %v527_v52, %v523_v50  ;;  %v563_v48 = vld [vmem:[#allocation2 + $0x8d0] sm:$0xff]  ;;  %v3056_v49 = vpack.c.bf16 %v568_v42, %v564_v41  ;;  %v574_v52 = vld [vmem:[#allocation2 + $0x928] sm:$0xff] }
 0x1a9   :  { %v567_v50 = vld [vmem:[#allocation2 + $0x8f0] sm:$0xff]  ;;  %v601_v42 = vld [vmem:[#allocation2 + $0xa00] sm:$0xff] }
 0x1aa   :  { %2763 = vmatpush1.bf16.msra.mxu0 %v2762_v61  ;;  %v533_v61 = vld [vmem:[#allocation2 + $0x7e0] sm:$0xff] }
 0x1ab   :  { %3019 = vmatpush1.bf16.msra.mxu1 %v3018_v62  ;;  %2765 = vmatprep.subr.bf16.mxu0 %v2764_v63  ;;  %v531_v62 = vld [vmem:[#allocation2 + $0x7d0] sm:$0xff]  ;;  %v3040_v63 = vpack.c.bf16 %v536_v56, %v532_v55  ;;  %v2786_v5 = vpack.c.bf16 %v533_v61, %v529_v60  ;;  %v3058_v56 = vpack.c.bf16 %v567_v50, %v563_v48  ;;  %v614_v48 = vld [vmem:[#allocation2 + $0xa68] sm:$0xff]  ;;  %v616_v50 = vld [vmem:[#allocation2 + $0xa78] sm:$0xff] }
 0x1ac   :  { %3021 = vmatprep.subr.bf16.mxu1 %v3020_v3  ;;  %v540_v3 = vld [vmem:[#allocation2 + $0x818] sm:$0xff]  ;;  %v3042_v6 = vpack.c.bf16 %v535_v0, %v531_v62  ;;  %v571_v60 = vld [vmem:[#allocation2 + $0x910] sm:$0xff]  ;;  %v3060_v61 = vpack.c.bf16 %v576_v54, %v572_v53  ;;  %v582_v0 = vld [vmem:[#allocation2 + $0x968] sm:$0xff] }
 0x1ad   :  { %v575_v62 = vld [vmem:[#allocation2 + $0x930] sm:$0xff]  ;;  %v609_v54 = vld [vmem:[#allocation2 + $0xa40] sm:$0xff] }
 0x1ae   :  { %2767 = vmatpush1.bf16.msra.mxu0 %v2766_v9  ;;  %v541_v9 = vld [vmem:[#allocation2 + $0x820] sm:$0xff] }
 0x1af   :  { %3023 = vmatpush1.bf16.msra.mxu1 %v3022_v10  ;;  %2769 = vmatprep.subr.bf16.mxu0 %v2768_v11  ;;  %v539_v10 = vld [vmem:[#allocation2 + $0x810] sm:$0xff]  ;;  %v3044_v11 = vpack.c.bf16 %v544_v4, %v540_v3  ;;  %v2790_v18 = vpack.c.bf16 %v541_v9, %v537_v8  ;;  %v3062_v4 = vpack.c.bf16 %v575_v62, %v571_v60  ;;  %v622_v60 = vld [vmem:[#allocation2 + $0xaa8] sm:$0xff]  ;;  %v624_v62 = vld [vmem:[#allocation2 + $0xab8] sm:$0xff] }
 0x1b0   :  { %3025 = vmatprep.subr.bf16.mxu1 %v3024_v15  ;;  %v548_v15 = vld [vmem:[#allocation2 + $0x858] sm:$0xff]  ;;  %v3046_v19 = vpack.c.bf16 %v543_v12, %v539_v10  ;;  %v579_v8 = vld [vmem:[#allocation2 + $0x950] sm:$0xff]  ;;  %v3064_v9 = vpack.c.bf16 %v584_v2, %v580_v1  ;;  %v590_v12 = vld [vmem:[#allocation2 + $0x9a8] sm:$0xff] }
 0x1b1   :  { %v3048_v24 = vpack.c.bf16 %v552_v16, %v548_v15  ;;  %v583_v10 = vld [vmem:[#allocation2 + $0x970] sm:$0xff]  ;;  %v617_v2 = vld [vmem:[#allocation2 + $0xa80] sm:$0xff] }
 0x1b2   :  { %2771 = vmatpush1.bf16.msra.mxu0 %v2770_v21  ;;  %v545_v21 = vld [vmem:[#allocation2 + $0x840] sm:$0xff]  ;;  %v3066_v16 = vpack.c.bf16 %v583_v10, %v579_v8  ;;  %v630_v8 = vld [vmem:[#allocation2 + $0xae8] sm:$0xff]  ;;  %v632_v10 = vld [vmem:[#allocation2 + $0xaf8] sm:$0xff] }
 0x1b3   :  { %3027 = vmatpush1.bf16.msra.mxu1 %v3026_v22  ;;  %2773 = vmatprep.subr.bf16.mxu0 %v2772_v23  ;;  %v549_v22 = vld [vmem:[#allocation2 + $0x860] sm:$0xff]  ;;  %v547_v23 = vld [vmem:[#allocation2 + $0x850] sm:$0xff] }
 0x1b4   :  { %3029 = vmatprep.subr.bf16.mxu1 %v3028_v27  ;;  %v558_v27 = vld [vmem:[#allocation2 + $0x8a8] sm:$0xff]  ;;  %v2794_v31 = vpack.c.bf16 %v549_v22, %v545_v21  ;;  %v3050_v32 = vpack.c.bf16 %v551_v25, %v547_v23  ;;  %v3068_v21 = vpack.c.bf16 %v592_v14, %v588_v13  ;;  %v591_v22 = vld [vmem:[#allocation2 + $0x9b0] sm:$0xff]  ;;  %v596_v25 = vld [vmem:[#allocation2 + $0x9d8] sm:$0xff] }
 0x1b5   :  { %v594_v23 = vld [vmem:[#allocation2 + $0x9c8] sm:$0xff]  ;;  %v625_v14 = vld [vmem:[#allocation2 + $0xac0] sm:$0xff] }
 0x1b6   :  { %2775 = vmatpush1.bf16.msra.mxu0 %v2774_v33  ;;  %v2796_v33 = vpack.c.bf16 %v558_v27, %v554_v26  ;;  %v600_v26 = vld [vmem:[#allocation2 + $0x9f8] sm:$0xff] }
 0x1b7   :  { %3031 = vmatpush1.bf16.msra.mxu1 %v3030_v34  ;;  %2777 = vmatprep.subr.bf16.mxu0 %v2776_v35  ;;  %v553_v34 = vld [vmem:[#allocation2 + $0x880] sm:$0xff] }
 0x1b8   :  { %3033 = vmatprep.subr.bf16.mxu1 %v3032_v39  ;;  %v557_v35 = vld [vmem:[#allocation2 + $0x8a0] sm:$0xff]  ;;  %v562_v39 = vld [vmem:[#allocation2 + $0x8c8] sm:$0xff] }
 0x1b9   :  { %v2798_v43 = vpack.c.bf16 %v557_v35, %v553_v34  ;;  %v599_v34 = vld [vmem:[#allocation2 + $0x9f0] sm:$0xff]  ;;  %v602_v35 = vld [vmem:[#allocation2 + $0xa08] sm:$0xff] }
 0x1ba   :  { %2779 = vmatpush1.bf16.msra.mxu0 %v2778_v45  ;;  %v2800_v45 = vpack.c.bf16 %v566_v40, %v562_v39  ;;  %v2820_v41 = vpack.c.bf16 %v606_v36, %v602_v35 }
 0x1bb   :  { %3035 = vmatpush1.bf16.msra.mxu1 %v3034_v46  ;;  %2781 = vmatprep.subr.bf16.mxu0 %v2780_v47  ;;  %v561_v46 = vld [vmem:[#allocation2 + $0x8c0] sm:$0xff] }
 0x1bc   :  { %3037 = vmatprep.subr.bf16.mxu1 %v3036_v51  ;;  %v565_v47 = vld [vmem:[#allocation2 + $0x8e0] sm:$0xff]  ;;  %v570_v51 = vld [vmem:[#allocation2 + $0x908] sm:$0xff] }
 0x1bd   :  { %v2802_v55 = vpack.c.bf16 %v565_v47, %v561_v46  ;;  %v607_v46 = vld [vmem:[#allocation2 + $0xa30] sm:$0xff]  ;;  %v610_v47 = vld [vmem:[#allocation2 + $0xa48] sm:$0xff] }
 0x1be   :  { %2783 = vmatpush1.bf16.msra.mxu0 %v2782_v57  ;;  %v2804_v57 = vpack.c.bf16 %v574_v52, %v570_v51  ;;  %v2824_v53 = vpack.c.bf16 %v614_v48, %v610_v47 }
 0x1bf   :  { %3039 = vmatpush1.bf16.msra.mxu1 %v3038_v58  ;;  %2785 = vmatprep.subr.bf16.mxu0 %v2784_v59  ;;  %v569_v58 = vld [vmem:[#allocation2 + $0x900] sm:$0xff] }
 0x1c0   :  { %3041 = vmatprep.subr.bf16.mxu1 %v3040_v63  ;;  %v573_v59 = vld [vmem:[#allocation2 + $0x920] sm:$0xff]  ;;  %v578_v63 = vld [vmem:[#allocation2 + $0x948] sm:$0xff] }
 0x1c1   :  { %v2806_v3 = vpack.c.bf16 %v573_v59, %v569_v58  ;;  %v615_v58 = vld [vmem:[#allocation2 + $0xa70] sm:$0xff]  ;;  %v618_v59 = vld [vmem:[#allocation2 + $0xa88] sm:$0xff] }
 0x1c2   :  { %2787 = vmatpush1.bf16.msra.mxu0 %v2786_v5  ;;  %v2808_v5 = vpack.c.bf16 %v582_v0, %v578_v63  ;;  %v2828_v1 = vpack.c.bf16 %v622_v60, %v618_v59 }
 0x1c3   :  { %3043 = vmatpush1.bf16.msra.mxu1 %v3042_v6  ;;  %2789 = vmatprep.subr.bf16.mxu0 %v2788_v7  ;;  %v577_v6 = vld [vmem:[#allocation2 + $0x940] sm:$0xff] }
 0x1c4   :  { %3045 = vmatprep.subr.bf16.mxu1 %v3044_v11  ;;  %v581_v7 = vld [vmem:[#allocation2 + $0x960] sm:$0xff]  ;;  %v586_v11 = vld [vmem:[#allocation2 + $0x988] sm:$0xff] }
 0x1c5   :  { %951 = vmatmul.mubr.f32.vlgmr.msra.gmra.mrb[0].mxu0 %v275_v17  ;;  %v2810_v15 = vpack.c.bf16 %v581_v7, %v577_v6  ;;  %v623_v6 = vld [vmem:[#allocation2 + $0xab0] sm:$0xff]  ;;  %v626_v7 = vld [vmem:[#allocation2 + $0xac8] sm:$0xff] }
 0x1c6   :  { %2791 = vmatpush1.bf16.msra.mxu0 %v2790_v18  ;;  %1235 = vmatmul.mubr.f32.vlgmr.msra.gmra.mrb[0].mxu1 %v275_v17  ;;  %v2812_v17 = vpack.c.bf16 %v590_v12, %v586_v11  ;;  %v585_v18 = vld [vmem:[#allocation2 + $0x980] sm:$0xff]  ;;  %v2832_v13 = vpack.c.bf16 %v630_v8, %v626_v7 }
 0x1c7   :  { %3047 = vmatpush1.bf16.msra.mxu1 %v3046_v19  ;;  %2793 = vmatprep.subr.bf16.mxu0 %v2792_v20  ;;  %v589_v19 = vld [vmem:[#allocation2 + $0x9a0] sm:$0xff]  ;;  %v587_v20 = vld [vmem:[#allocation2 + $0x990] sm:$0xff] }
 0x1c8   :  { %3049 = vmatprep.subr.bf16.mxu1 %v3048_v24  ;;  %1021 = vmatprep.mubr.f32.mxu0 %v278_v30  ;;  %v598_v24 = vld [vmem:[#allocation2 + $0x9e8] sm:$0xff]  ;;  %v2814_v27 = vpack.c.bf16 %v589_v19, %v585_v18  ;;  %v3070_v28 = vpack.c.bf16 %v591_v22, %v587_v20  ;;  %v631_v18 = vld [vmem:[#allocation2 + $0xaf0] sm:$0xff]  ;;  %v640_v22 = vld [vmem:[#allocation2 + $0xb38] sm:$0xff] }
 0x1c9   :  { %1305 = vmatprep.mubr.f32.mxu1 %v278_v30  ;;  %v2816_v29 = vpack.c.bf16 %v598_v24, %v594_v23  ;;  %v593_v30 = vld [vmem:[#allocation2 + $0x9c0] sm:$0xff]  ;;  %v634_v19 = vld [vmem:[#allocation2 + $0xb08] sm:$0xff] }
 0x1ca   :  { %2795 = vmatpush1.bf16.msra.mxu0 %v2794_v31  ;;  %v597_v31 = vld [vmem:[#allocation2 + $0x9e0] sm:$0xff]  ;;  %v638_v20 = vld [vmem:[#allocation2 + $0xb28] sm:$0xff] }
 0x1cb   :  { %3051 = vmatpush1.bf16.msra.mxu1 %v3050_v32  ;;  %2797 = vmatprep.subr.bf16.mxu0 %v2796_v33  ;;  %v595_v32 = vld [vmem:[#allocation2 + $0x9d0] sm:$0xff]  ;;  %v3072_v33 = vpack.c.bf16 %v600_v26, %v596_v25  ;;  %v2818_v39 = vpack.c.bf16 %v597_v31, %v593_v30  ;;  %v2836_v25 = vpack.c.bf16 %v638_v20, %v634_v19  ;;  %v633_v26 = vld [vmem:[#allocation2 + $0xb00] sm:$0xff]  ;;  %v642_v31 = vld [vmem:[#allocation2 + $0xb48] sm:$0xff] }
 0x1cc   :  { %3053 = vmatprep.subr.bf16.mxu1 %v3052_v37  ;;  %v604_v37 = vld [vmem:[#allocation2 + $0xa18] sm:$0xff]  ;;  %v3074_v40 = vpack.c.bf16 %v599_v34, %v595_v32  ;;  %v639_v30 = vld [vmem:[#allocation2 + $0xb30] sm:$0xff]  ;;  %v646_v32 = vld [vmem:[#allocation2 + $0xb68] sm:$0xff] }
 0x1cd   :  { %v648_v34 = vld [vmem:[#allocation2 + $0xb78] sm:$0xff]  ;;  %v277_v19 = vld [vmem:[%s4416_s11 + $0x20] sm:$0xff] }
 0x1ce   :  { %2799 = vmatpush1.bf16.msra.mxu0 %v2798_v43  ;;  %v605_v43 = vld [vmem:[#allocation2 + $0xa20] sm:$0xff] }
 0x1cf   :  { %3055 = vmatpush1.bf16.msra.mxu1 %v3054_v44  ;;  %2801 = vmatprep.subr.bf16.mxu0 %v2800_v45  ;;  %v603_v44 = vld [vmem:[#allocation2 + $0xa10] sm:$0xff]  ;;  %v3076_v45 = vpack.c.bf16 %v608_v38, %v604_v37  ;;  %v2822_v51 = vpack.c.bf16 %v605_v43, %v601_v42  ;;  %v2840_v37 = vpack.c.bf16 %v646_v32, %v642_v31  ;;  %v641_v38 = vld [vmem:[#allocation2 + $0xb40] sm:$0xff]  ;;  %v650_v43 = vld [vmem:[#allocation2 + $0xb88] sm:$0xff] }
 0x1d0   :  { %3057 = vmatprep.subr.bf16.mxu1 %v3056_v49  ;;  %v612_v49 = vld [vmem:[#allocation2 + $0xa58] sm:$0xff]  ;;  %v3078_v52 = vpack.c.bf16 %v607_v46, %v603_v44  ;;  %v647_v42 = vld [vmem:[#allocation2 + $0xb70] sm:$0xff]  ;;  %v654_v44 = vld [vmem:[#allocation2 + $0xba8] sm:$0xff] }
 0x1d1   :  { %v656_v46 = vld [vmem:[#allocation2 + $0xbb8] sm:$0xff] }
 0x1d2   :  { %2803 = vmatpush1.bf16.msra.mxu0 %v2802_v55  ;;  %v613_v55 = vld [vmem:[#allocation2 + $0xa60] sm:$0xff]  ;;  %v688_v31 = vld [vmem:[#allocation2 + $0xcb8] sm:$0xff] }
 0x1d3   :  { %3059 = vmatpush1.bf16.msra.mxu1 %v3058_v56  ;;  %2805 = vmatprep.subr.bf16.mxu0 %v2804_v57  ;;  %v611_v56 = vld [vmem:[#allocation2 + $0xa50] sm:$0xff]  ;;  %v3080_v57 = vpack.c.bf16 %v616_v50, %v612_v49  ;;  %v2826_v63 = vpack.c.bf16 %v613_v55, %v609_v54  ;;  %v2844_v49 = vpack.c.bf16 %v654_v44, %v650_v43  ;;  %v649_v50 = vld [vmem:[#allocation2 + $0xb80] sm:$0xff]  ;;  %v658_v55 = vld [vmem:[#allocation2 + $0xbc8] sm:$0xff] }
 0x1d4   :  { %3061 = vmatprep.subr.bf16.mxu1 %v3060_v61  ;;  %v620_v61 = vld [vmem:[#allocation2 + $0xa98] sm:$0xff]  ;;  %v3082_v0 = vpack.c.bf16 %v615_v58, %v611_v56  ;;  %v655_v54 = vld [vmem:[#allocation2 + $0xbb0] sm:$0xff]  ;;  %v662_v56 = vld [vmem:[#allocation2 + $0xbe8] sm:$0xff] }
 0x1d5   :  { %v664_v58 = vld [vmem:[#allocation2 + $0xbf8] sm:$0xff] }
 0x1d6   :  { %2807 = vmatpush1.bf16.msra.mxu0 %v2806_v3  ;;  %v621_v3 = vld [vmem:[#allocation2 + $0xaa0] sm:$0xff]  ;;  %v280_v32 = vld [vmem:[%s4416_s11 + $0x38] sm:$0xff] }
 0x1d7   :  { %3063 = vmatpush1.bf16.msra.mxu1 %v3062_v4  ;;  %2809 = vmatprep.subr.bf16.mxu0 %v2808_v5  ;;  %v619_v4 = vld [vmem:[#allocation2 + $0xa90] sm:$0xff]  ;;  %v3084_v5 = vpack.c.bf16 %v624_v62, %v620_v61  ;;  %v2830_v11 = vpack.c.bf16 %v621_v3, %v617_v2  ;;  %v2848_v61 = vpack.c.bf16 %v662_v56, %v658_v55  ;;  %v657_v62 = vld [vmem:[#allocation2 + $0xbc0] sm:$0xff]  ;;  %v666_v3 = vld [vmem:[#allocation2 + $0xc08] sm:$0xff] }
 0x1d8   :  { %3065 = vmatprep.subr.bf16.mxu1 %v3064_v9  ;;  %v628_v9 = vld [vmem:[#allocation2 + $0xad8] sm:$0xff]  ;;  %v3086_v12 = vpack.c.bf16 %v623_v6, %v619_v4  ;;  %v663_v2 = vld [vmem:[#allocation2 + $0xbf0] sm:$0xff]  ;;  %v670_v4 = vld [vmem:[#allocation2 + $0xc28] sm:$0xff] }
 0x1d9   :  { %v672_v6 = vld [vmem:[#allocation2 + $0xc38] sm:$0xff] }
 0x1da   :  { %2811 = vmatpush1.bf16.msra.mxu0 %v2810_v15  ;;  %v629_v15 = vld [vmem:[#allocation2 + $0xae0] sm:$0xff]  ;;  %v692_v43 = vld [vmem:[#allocation2 + $0xcd8] sm:$0xff] }
 0x1db   :  { %3067 = vmatpush1.bf16.msra.mxu1 %v3066_v16  ;;  %2813 = vmatprep.subr.bf16.mxu0 %v2812_v17  ;;  %v627_v16 = vld [vmem:[#allocation2 + $0xad0] sm:$0xff]  ;;  %v3088_v17 = vpack.c.bf16 %v632_v10, %v628_v9  ;;  %v2834_v23 = vpack.c.bf16 %v629_v15, %v625_v14  ;;  %v2852_v9 = vpack.c.bf16 %v670_v4, %v666_v3  ;;  %v665_v10 = vld [vmem:[#allocation2 + $0xc00] sm:$0xff]  ;;  %v674_v15 = vld [vmem:[#allocation2 + $0xc48] sm:$0xff] }
 0x1dc   :  { %3069 = vmatprep.subr.bf16.mxu1 %v3068_v21  ;;  %v636_v21 = vld [vmem:[#allocation2 + $0xb18] sm:$0xff]  ;;  %v3090_v24 = vpack.c.bf16 %v631_v18, %v627_v16  ;;  %v671_v14 = vld [vmem:[#allocation2 + $0xc30] sm:$0xff]  ;;  %v678_v16 = vld [vmem:[#allocation2 + $0xc68] sm:$0xff] }
 0x1dd   :  { %v680_v18 = vld [vmem:[#allocation2 + $0xc78] sm:$0xff] }
 0x1de   :  { %2815 = vmatpush1.bf16.msra.mxu0 %v2814_v27  ;;  %v637_v27 = vld [vmem:[#allocation2 + $0xb20] sm:$0xff]  ;;  %v696_v44 = vld [vmem:[#allocation2 + $0xcf8] sm:$0xff] }
 0x1df   :  { %3071 = vmatpush1.bf16.msra.mxu1 %v3070_v28  ;;  %2817 = vmatprep.subr.bf16.mxu0 %v2816_v29  ;;  %v635_v28 = vld [vmem:[#allocation2 + $0xb10] sm:$0xff]  ;;  %v3092_v29 = vpack.c.bf16 %v640_v22, %v636_v21  ;;  %v2838_v35 = vpack.c.bf16 %v637_v27, %v633_v26  ;;  %v2856_v22 = vpack.c.bf16 %v678_v16, %v674_v15  ;;  %v700_v55 = vld [vmem:[#allocation2 + $0xd18] sm:$0xff] }
 0x1e0   :  { %3073 = vmatprep.subr.bf16.mxu1 %v3072_v33  ;;  %v644_v33 = vld [vmem:[#allocation2 + $0xb58] sm:$0xff]  ;;  %v3094_v36 = vpack.c.bf16 %v639_v30, %v635_v28  ;;  %v679_v27 = vld [vmem:[#allocation2 + $0xc70] sm:$0xff]  ;;  %v682_v28 = vld [vmem:[#allocation2 + $0xc88] sm:$0xff] }
 0x1e1   :  { %v684_v30 = vld [vmem:[#allocation2 + $0xc98] sm:$0xff] }
 0x1e2   :  { %2819 = vmatpush1.bf16.msra.mxu0 %v2818_v39  ;;  %v645_v39 = vld [vmem:[#allocation2 + $0xb60] sm:$0xff]  ;;  %v704_v56 = vld [vmem:[#allocation2 + $0xd38] sm:$0xff] }
 0x1e3   :  { %3075 = vmatpush1.bf16.msra.mxu1 %v3074_v40  ;;  %2821 = vmatprep.subr.bf16.mxu0 %v2820_v41  ;;  %v643_v40 = vld [vmem:[#allocation2 + $0xb50] sm:$0xff]  ;;  %v3096_v41 = vpack.c.bf16 %v648_v34, %v644_v33  ;;  %v2842_v47 = vpack.c.bf16 %v645_v39, %v641_v38  ;;  %v3116_v39 = vpack.c.bf16 %v688_v31, %v684_v30  ;;  %v708_v3 = vld [vmem:[#allocation2 + $0xd58] sm:$0xff] }
 0x1e4   :  { %3077 = vmatprep.subr.bf16.mxu1 %v3076_v45  ;;  %v652_v45 = vld [vmem:[#allocation2 + $0xb98] sm:$0xff]  ;;  %v3098_v48 = vpack.c.bf16 %v647_v42, %v643_v40  ;;  %v683_v38 = vld [vmem:[#allocation2 + $0xc90] sm:$0xff]  ;;  %v694_v42 = vld [vmem:[#allocation2 + $0xce8] sm:$0xff] }
 0x1e5   :  { %v687_v40 = vld [vmem:[#allocation2 + $0xcb0] sm:$0xff]  ;;  %v712_v4 = vld [vmem:[#allocation2 + $0xd78] sm:$0xff] }
 0x1e6   :  { %2823 = vmatpush1.bf16.msra.mxu0 %v2822_v51  ;;  %v653_v51 = vld [vmem:[#allocation2 + $0xba0] sm:$0xff]  ;;  %v716_v15 = vld [vmem:[#allocation2 + $0xd98] sm:$0xff] }
 0x1e7   :  { %3079 = vmatpush1.bf16.msra.mxu1 %v3078_v52  ;;  %2825 = vmatprep.subr.bf16.mxu0 %v2824_v53  ;;  %v651_v52 = vld [vmem:[#allocation2 + $0xb90] sm:$0xff]  ;;  %v3100_v53 = vpack.c.bf16 %v656_v46, %v652_v45  ;;  %v2846_v59 = vpack.c.bf16 %v653_v51, %v649_v50  ;;  %v3118_v46 = vpack.c.bf16 %v687_v40, %v683_v38  ;;  %v720_v16 = vld [vmem:[#allocation2 + $0xdb8] sm:$0xff]  ;;  %v734_v38 = vld [vmem:[#allocation2 + $0xe28] sm:$0xff] }
 0x1e8   :  { %3081 = vmatprep.subr.bf16.mxu1 %v3080_v57  ;;  %v660_v57 = vld [vmem:[#allocation2 + $0xbd8] sm:$0xff]  ;;  %v3102_v60 = vpack.c.bf16 %v655_v54, %v651_v52  ;;  %v691_v50 = vld [vmem:[#allocation2 + $0xcd0] sm:$0xff]  ;;  %v3120_v51 = vpack.c.bf16 %v696_v44, %v692_v43  ;;  %v702_v54 = vld [vmem:[#allocation2 + $0xd28] sm:$0xff] }
 0x1e9   :  { %v695_v52 = vld [vmem:[#allocation2 + $0xcf0] sm:$0xff]  ;;  %v736_v40 = vld [vmem:[#allocation2 + $0xe38] sm:$0xff]  ;;  %v729_v44 = vld [vmem:[#allocation2 + $0xe00] sm:$0xff] }
 0x1ea   :  { %2827 = vmatpush1.bf16.msra.mxu0 %v2826_v63  ;;  %v661_v63 = vld [vmem:[#allocation2 + $0xbe0] sm:$0xff] }
 0x1eb   :  { %3083 = vmatpush1.bf16.msra.mxu1 %v3082_v0  ;;  %2829 = vmatprep.subr.bf16.mxu0 %v2828_v1  ;;  %v659_v0 = vld [vmem:[#allocation2 + $0xbd0] sm:$0xff]  ;;  %v3104_v1 = vpack.c.bf16 %v664_v58, %v660_v57  ;;  %v2850_v7 = vpack.c.bf16 %v661_v63, %v657_v62  ;;  %v3122_v58 = vpack.c.bf16 %v695_v52, %v691_v50  ;;  %v742_v50 = vld [vmem:[#allocation2 + $0xe68] sm:$0xff]  ;;  %v744_v52 = vld [vmem:[#allocation2 + $0xe78] sm:$0xff] }
 0x1ec   :  { %3085 = vmatprep.subr.bf16.mxu1 %v3084_v5  ;;  %v668_v5 = vld [vmem:[#allocation2 + $0xc18] sm:$0xff]  ;;  %v3106_v8 = vpack.c.bf16 %v663_v2, %v659_v0  ;;  %v699_v62 = vld [vmem:[#allocation2 + $0xd10] sm:$0xff]  ;;  %v3124_v63 = vpack.c.bf16 %v704_v56, %v700_v55  ;;  %v710_v2 = vld [vmem:[#allocation2 + $0xd68] sm:$0xff] }
 0x1ed   :  { %v703_v0 = vld [vmem:[#allocation2 + $0xd30] sm:$0xff]  ;;  %v737_v56 = vld [vmem:[#allocation2 + $0xe40] sm:$0xff] }
 0x1ee   :  { %2831 = vmatpush1.bf16.msra.mxu0 %v2830_v11  ;;  %v669_v11 = vld [vmem:[#allocation2 + $0xc20] sm:$0xff] }
 0x1ef   :  { %3087 = vmatpush1.bf16.msra.mxu1 %v3086_v12  ;;  %2833 = vmatprep.subr.bf16.mxu0 %v2832_v13  ;;  %v667_v12 = vld [vmem:[#allocation2 + $0xc10] sm:$0xff]  ;;  %v3108_v13 = vpack.c.bf16 %v672_v6, %v668_v5  ;;  %v2854_v20 = vpack.c.bf16 %v669_v11, %v665_v10  ;;  %v3126_v6 = vpack.c.bf16 %v703_v0, %v699_v62  ;;  %v750_v62 = vld [vmem:[#allocation2 + $0xea8] sm:$0xff]  ;;  %v752_v0 = vld [vmem:[#allocation2 + $0xeb8] sm:$0xff] }
 0x1f0   :  { %3089 = vmatprep.subr.bf16.mxu1 %v3088_v17  ;;  %v676_v17 = vld [vmem:[#allocation2 + $0xc58] sm:$0xff]  ;;  %v3110_v21 = vpack.c.bf16 %v671_v14, %v667_v12  ;;  %v707_v10 = vld [vmem:[#allocation2 + $0xd50] sm:$0xff]  ;;  %v3128_v11 = vpack.c.bf16 %v712_v4, %v708_v3  ;;  %v718_v14 = vld [vmem:[#allocation2 + $0xda8] sm:$0xff] }
 0x1f1   :  { %v3112_v26 = vpack.c.bf16 %v680_v18, %v676_v17  ;;  %v711_v12 = vld [vmem:[#allocation2 + $0xd70] sm:$0xff]  ;;  %v745_v4 = vld [vmem:[#allocation2 + $0xe80] sm:$0xff] }
 0x1f2   :  { %2835 = vmatpush1.bf16.msra.mxu0 %v2834_v23  ;;  %v673_v23 = vld [vmem:[#allocation2 + $0xc40] sm:$0xff]  ;;  %v3130_v18 = vpack.c.bf16 %v711_v12, %v707_v10  ;;  %v758_v10 = vld [vmem:[#allocation2 + $0xee8] sm:$0xff]  ;;  %v760_v12 = vld [vmem:[#allocation2 + $0xef8] sm:$0xff] }
 0x1f3   :  { %3091 = vmatpush1.bf16.msra.mxu1 %v3090_v24  ;;  %2837 = vmatprep.subr.bf16.mxu0 %v2836_v25  ;;  %v677_v24 = vld [vmem:[#allocation2 + $0xc60] sm:$0xff]  ;;  %v675_v25 = vld [vmem:[#allocation2 + $0xc50] sm:$0xff] }
 0x1f4   :  { %3093 = vmatprep.subr.bf16.mxu1 %v3092_v29  ;;  %v686_v29 = vld [vmem:[#allocation2 + $0xca8] sm:$0xff]  ;;  %v2858_v33 = vpack.c.bf16 %v677_v24, %v673_v23  ;;  %v3114_v34 = vpack.c.bf16 %v679_v27, %v675_v25  ;;  %v3132_v23 = vpack.c.bf16 %v720_v16, %v716_v15  ;;  %v719_v24 = vld [vmem:[#allocation2 + $0xdb0] sm:$0xff]  ;;  %v724_v27 = vld [vmem:[#allocation2 + $0xdd8] sm:$0xff] }
 0x1f5   :  { %v722_v25 = vld [vmem:[#allocation2 + $0xdc8] sm:$0xff]  ;;  %v753_v16 = vld [vmem:[#allocation2 + $0xec0] sm:$0xff] }
 0x1f6   :  { %2839 = vmatpush1.bf16.msra.mxu0 %v2838_v35  ;;  %v2860_v35 = vpack.c.bf16 %v686_v29, %v682_v28  ;;  %v728_v28 = vld [vmem:[#allocation2 + $0xdf8] sm:$0xff] }
 0x1f7   :  { %3095 = vmatpush1.bf16.msra.mxu1 %v3094_v36  ;;  %2841 = vmatprep.subr.bf16.mxu0 %v2840_v37  ;;  %v681_v36 = vld [vmem:[#allocation2 + $0xc80] sm:$0xff] }
 0x1f8   :  { %3097 = vmatprep.subr.bf16.mxu1 %v3096_v41  ;;  %v685_v37 = vld [vmem:[#allocation2 + $0xca0] sm:$0xff]  ;;  %v690_v41 = vld [vmem:[#allocation2 + $0xcc8] sm:$0xff] }
 0x1f9   :  { %v2862_v45 = vpack.c.bf16 %v685_v37, %v681_v36  ;;  %v727_v36 = vld [vmem:[#allocation2 + $0xdf0] sm:$0xff]  ;;  %v730_v37 = vld [vmem:[#allocation2 + $0xe08] sm:$0xff] }
 0x1fa   :  { %2843 = vmatpush1.bf16.msra.mxu0 %v2842_v47  ;;  %v2864_v47 = vpack.c.bf16 %v694_v42, %v690_v41  ;;  %v2884_v43 = vpack.c.bf16 %v734_v38, %v730_v37 }
 0x1fb   :  { %3099 = vmatpush1.bf16.msra.mxu1 %v3098_v48  ;;  %2845 = vmatprep.subr.bf16.mxu0 %v2844_v49  ;;  %v689_v48 = vld [vmem:[#allocation2 + $0xcc0] sm:$0xff] }
 0x1fc   :  { %3101 = vmatprep.subr.bf16.mxu1 %v3100_v53  ;;  %v693_v49 = vld [vmem:[#allocation2 + $0xce0] sm:$0xff]  ;;  %v698_v53 = vld [vmem:[#allocation2 + $0xd08] sm:$0xff] }
 0x1fd   :  { %v2866_v57 = vpack.c.bf16 %v693_v49, %v689_v48  ;;  %v735_v48 = vld [vmem:[#allocation2 + $0xe30] sm:$0xff]  ;;  %v738_v49 = vld [vmem:[#allocation2 + $0xe48] sm:$0xff] }
 0x1fe   :  { %2847 = vmatpush1.bf16.msra.mxu0 %v2846_v59  ;;  %v2868_v59 = vpack.c.bf16 %v702_v54, %v698_v53  ;;  %v2888_v55 = vpack.c.bf16 %v742_v50, %v738_v49 }
 0x1ff   :  { %3103 = vmatpush1.bf16.msra.mxu1 %v3102_v60  ;;  %2849 = vmatprep.subr.bf16.mxu0 %v2848_v61  ;;  %v697_v60 = vld [vmem:[#allocation2 + $0xd00] sm:$0xff] }
 0x200   :  { %3105 = vmatprep.subr.bf16.mxu1 %v3104_v1  ;;  %v701_v61 = vld [vmem:[#allocation2 + $0xd20] sm:$0xff]  ;;  %v706_v1 = vld [vmem:[#allocation2 + $0xd48] sm:$0xff] }
 0x201   :  { %v2870_v5 = vpack.c.bf16 %v701_v61, %v697_v60  ;;  %v743_v60 = vld [vmem:[#allocation2 + $0xe70] sm:$0xff]  ;;  %v746_v61 = vld [vmem:[#allocation2 + $0xe88] sm:$0xff] }
 0x202   :  { %2851 = vmatpush1.bf16.msra.mxu0 %v2850_v7  ;;  %v2872_v7 = vpack.c.bf16 %v710_v2, %v706_v1  ;;  %v2892_v3 = vpack.c.bf16 %v750_v62, %v746_v61 }
 0x203   :  { %3107 = vmatpush1.bf16.msra.mxu1 %v3106_v8  ;;  %2853 = vmatprep.subr.bf16.mxu0 %v2852_v9  ;;  %v705_v8 = vld [vmem:[#allocation2 + $0xd40] sm:$0xff] }
 0x204   :  { %3109 = vmatprep.subr.bf16.mxu1 %v3108_v13  ;;  %v709_v9 = vld [vmem:[#allocation2 + $0xd60] sm:$0xff]  ;;  %v714_v13 = vld [vmem:[#allocation2 + $0xd88] sm:$0xff] }
 0x205   :  { %1022 = vmatmul.mubr.f32.vlgmr.msra.gmra.mrb[0].mxu0 %v277_v19  ;;  %v2874_v17 = vpack.c.bf16 %v709_v9, %v705_v8  ;;  %v751_v8 = vld [vmem:[#allocation2 + $0xeb0] sm:$0xff]  ;;  %v754_v9 = vld [vmem:[#allocation2 + $0xec8] sm:$0xff] }
 0x206   :  { %2855 = vmatpush1.bf16.msra.mxu0 %v2854_v20  ;;  %1306 = vmatmul.mubr.f32.vlgmr.msra.gmra.mrb[0].mxu1 %v277_v19  ;;  %v2876_v19 = vpack.c.bf16 %v718_v14, %v714_v13  ;;  %v713_v20 = vld [vmem:[#allocation2 + $0xd80] sm:$0xff]  ;;  %v2896_v15 = vpack.c.bf16 %v758_v10, %v754_v9 }
 0x207   :  { %3111 = vmatpush1.bf16.msra.mxu1 %v3110_v21  ;;  %2857 = vmatprep.subr.bf16.mxu0 %v2856_v22  ;;  %v717_v21 = vld [vmem:[#allocation2 + $0xda0] sm:$0xff]  ;;  %v715_v22 = vld [vmem:[#allocation2 + $0xd90] sm:$0xff] }
 0x208   :  { %3113 = vmatprep.subr.bf16.mxu1 %v3112_v26  ;;  %1092 = vmatprep.mubr.f32.mxu0 %v280_v32  ;;  %v726_v26 = vld [vmem:[#allocation2 + $0xde8] sm:$0xff]  ;;  %v2878_v29 = vpack.c.bf16 %v717_v21, %v713_v20  ;;  %v3134_v30 = vpack.c.bf16 %v719_v24, %v715_v22  ;;  %v759_v20 = vld [vmem:[#allocation2 + $0xef0] sm:$0xff]  ;;  %v768_v24 = vld [vmem:[#allocation2 + $0xf38] sm:$0xff] }
 0x209   :  { %1376 = vmatprep.mubr.f32.mxu1 %v280_v32  ;;  %v2880_v31 = vpack.c.bf16 %v726_v26, %v722_v25  ;;  %v721_v32 = vld [vmem:[#allocation2 + $0xdc0] sm:$0xff]  ;;  %v762_v21 = vld [vmem:[#allocation2 + $0xf08] sm:$0xff] }
 0x20a   :  { %2859 = vmatpush1.bf16.msra.mxu0 %v2858_v33  ;;  %v725_v33 = vld [vmem:[#allocation2 + $0xde0] sm:$0xff]  ;;  %v766_v22 = vld [vmem:[#allocation2 + $0xf28] sm:$0xff] }
 0x20b   :  { %3115 = vmatpush1.bf16.msra.mxu1 %v3114_v34  ;;  %2861 = vmatprep.subr.bf16.mxu0 %v2860_v35  ;;  %v723_v34 = vld [vmem:[#allocation2 + $0xdd0] sm:$0xff]  ;;  %v3136_v35 = vpack.c.bf16 %v728_v28, %v724_v27  ;;  %v2882_v41 = vpack.c.bf16 %v725_v33, %v721_v32  ;;  %v2900_v27 = vpack.c.bf16 %v766_v22, %v762_v21  ;;  %v761_v28 = vld [vmem:[#allocation2 + $0xf00] sm:$0xff]  ;;  %v770_v33 = vld [vmem:[#allocation2 + $0xf48] sm:$0xff] }
 0x20c   :  { %3117 = vmatprep.subr.bf16.mxu1 %v3116_v39  ;;  %v732_v39 = vld [vmem:[#allocation2 + $0xe18] sm:$0xff]  ;;  %v3138_v42 = vpack.c.bf16 %v727_v36, %v723_v34  ;;  %v767_v32 = vld [vmem:[#allocation2 + $0xf30] sm:$0xff]  ;;  %v774_v34 = vld [vmem:[#allocation2 + $0xf68] sm:$0xff] }
 0x20d   :  { %v776_v36 = vld [vmem:[#allocation2 + $0xf78] sm:$0xff]  ;;  %v1395_v10 = vld [vmem:[#allocation6] sm:$0xff] }
 0x20e   :  { %2863 = vmatpush1.bf16.msra.mxu0 %v2862_v45  ;;  %v733_v45 = vld [vmem:[#allocation2 + $0xe20] sm:$0xff] }
 0x20f   :  { %3119 = vmatpush1.bf16.msra.mxu1 %v3118_v46  ;;  %2865 = vmatprep.subr.bf16.mxu0 %v2864_v47  ;;  %v731_v46 = vld [vmem:[#allocation2 + $0xe10] sm:$0xff]  ;;  %v3140_v47 = vpack.c.bf16 %v736_v40, %v732_v39  ;;  %v2886_v53 = vpack.c.bf16 %v733_v45, %v729_v44  ;;  %v2904_v39 = vpack.c.bf16 %v774_v34, %v770_v33  ;;  %v769_v40 = vld [vmem:[#allocation2 + $0xf40] sm:$0xff]  ;;  %v778_v45 = vld [vmem:[#allocation2 + $0xf88] sm:$0xff] }
 0x210   :  { %3121 = vmatprep.subr.bf16.mxu1 %v3120_v51  ;;  %v740_v51 = vld [vmem:[#allocation2 + $0xe58] sm:$0xff]  ;;  %v3142_v54 = vpack.c.bf16 %v735_v48, %v731_v46  ;;  %v775_v44 = vld [vmem:[#allocation2 + $0xf70] sm:$0xff]  ;;  %v782_v46 = vld [vmem:[#allocation2 + $0xfa8] sm:$0xff] }
 0x211   :  { %v784_v48 = vld [vmem:[#allocation2 + $0xfb8] sm:$0xff] }
 0x212   :  { %2867 = vmatpush1.bf16.msra.mxu0 %v2866_v57  ;;  %v741_v57 = vld [vmem:[#allocation2 + $0xe60] sm:$0xff] }
 0x213   :  { %3123 = vmatpush1.bf16.msra.mxu1 %v3122_v58  ;;  %2869 = vmatprep.subr.bf16.mxu0 %v2868_v59  ;;  %v739_v58 = vld [vmem:[#allocation2 + $0xe50] sm:$0xff]  ;;  %v3144_v59 = vpack.c.bf16 %v744_v52, %v740_v51  ;;  %v2890_v1 = vpack.c.bf16 %v741_v57, %v737_v56  ;;  %v2908_v51 = vpack.c.bf16 %v782_v46, %v778_v45  ;;  %v777_v52 = vld [vmem:[#allocation2 + $0xf80] sm:$0xff]  ;;  %v786_v57 = vld [vmem:[#allocation2 + $0xfc8] sm:$0xff] }
 0x214   :  { %3125 = vmatprep.subr.bf16.mxu1 %v3124_v63  ;;  %v748_v63 = vld [vmem:[#allocation2 + $0xe98] sm:$0xff]  ;;  %v3146_v2 = vpack.c.bf16 %v743_v60, %v739_v58  ;;  %v783_v56 = vld [vmem:[#allocation2 + $0xfb0] sm:$0xff]  ;;  %v790_v58 = vld [vmem:[#allocation2 + $0xfe8] sm:$0xff] }
 0x215   :  { %v792_v60 = vld [vmem:[#allocation2 + $0xff8] sm:$0xff] }
 0x216   :  { %2871 = vmatpush1.bf16.msra.mxu0 %v2870_v5  ;;  %v749_v5 = vld [vmem:[#allocation2 + $0xea0] sm:$0xff] }
 0x217   :  { %3127 = vmatpush1.bf16.msra.mxu1 %v3126_v6  ;;  %2873 = vmatprep.subr.bf16.mxu0 %v2872_v7  ;;  %v747_v6 = vld [vmem:[#allocation2 + $0xe90] sm:$0xff]  ;;  %v3148_v7 = vpack.c.bf16 %v752_v0, %v748_v63  ;;  %v2894_v13 = vpack.c.bf16 %v749_v5, %v745_v4  ;;  %v2912_v63 = vpack.c.bf16 %v790_v58, %v786_v57  ;;  %v785_v0 = vld [vmem:[#allocation2 + $0xfc0] sm:$0xff] }
 0x218   :  { %3129 = vmatprep.subr.bf16.mxu1 %v3128_v11  ;;  %v756_v11 = vld [vmem:[#allocation2 + $0xed8] sm:$0xff]  ;;  %v3150_v14 = vpack.c.bf16 %v751_v8, %v747_v6  ;;  %v791_v4 = vld [vmem:[#allocation2 + $0xff0] sm:$0xff] }
 0x219   :  { %v1396_v5 = vld [vmem:[#allocation6 + $0x8] sm:$0xff]  ;;  %v1398_v6 = vld [vmem:[#allocation6 + $0x18] sm:$0xff] }
 0x21a   :  { %2875 = vmatpush1.bf16.msra.mxu0 %v2874_v17  ;;  %v757_v17 = vld [vmem:[#allocation2 + $0xee0] sm:$0xff]  ;;  %v3172_v9 = vpack.c.bf16 %v1398_v6, %v1396_v5 }
 0x21b   :  { %3131 = vmatpush1.bf16.msra.mxu1 %v3130_v18  ;;  %2877 = vmatprep.subr.bf16.mxu0 %v2876_v19  ;;  %v755_v18 = vld [vmem:[#allocation2 + $0xed0] sm:$0xff]  ;;  %v3152_v19 = vpack.c.bf16 %v760_v12, %v756_v11  ;;  %v2898_v25 = vpack.c.bf16 %v757_v17, %v753_v16  ;;  %v1399_v17 = vld [vmem:[#allocation6 + $0x20] sm:$0xff] }
 0x21c   :  { %3133 = vmatprep.subr.bf16.mxu1 %v3132_v23  ;;  %v764_v23 = vld [vmem:[#allocation2 + $0xf18] sm:$0xff]  ;;  %v3154_v26 = vpack.c.bf16 %v759_v20, %v755_v18  ;;  %v1400_v12 = vld [vmem:[#allocation6 + $0x28] sm:$0xff] }
 0x21d   :  { %v1397_v11 = vld [vmem:[#allocation6 + $0x10] sm:$0xff]  ;;  %v1406_v20 = vld [vmem:[#allocation6 + $0x58] sm:$0xff] }
 0x21e   :  { %2879 = vmatpush1.bf16.msra.mxu0 %v2878_v29  ;;  %v765_v29 = vld [vmem:[#allocation2 + $0xf20] sm:$0xff]  ;;  %v1401_v18 = vld [vmem:[#allocation6 + $0x30] sm:$0xff] }
 0x21f   :  { %3135 = vmatpush1.bf16.msra.mxu1 %v3134_v30  ;;  %2881 = vmatprep.subr.bf16.mxu0 %v2880_v31  ;;  %v763_v30 = vld [vmem:[#allocation2 + $0xf10] sm:$0xff]  ;;  %v3156_v31 = vpack.c.bf16 %v768_v24, %v764_v23  ;;  %v2902_v37 = vpack.c.bf16 %v765_v29, %v761_v28  ;;  %v3178_v21 = vpack.c.bf16 %v1401_v18, %v1399_v17  ;;  %v1403_v23 = vld [vmem:[#allocation6 + $0x40] sm:$0xff] }
 0x220   :  { %3137 = vmatprep.subr.bf16.mxu1 %v3136_v35  ;;  %v772_v35 = vld [vmem:[#allocation2 + $0xf58] sm:$0xff]  ;;  %v3158_v38 = vpack.c.bf16 %v767_v32, %v763_v30  ;;  %v1407_v29 = vld [vmem:[#allocation6 + $0x60] sm:$0xff] }
 0x221   :  { %v1405_v24 = vld [vmem:[#allocation6 + $0x50] sm:$0xff]  ;;  %v1414_v32 = vld [vmem:[#allocation6 + $0x98] sm:$0xff] }
 0x222   :  { %2883 = vmatpush1.bf16.msra.mxu0 %v2882_v41  ;;  %v773_v41 = vld [vmem:[#allocation2 + $0xf60] sm:$0xff]  ;;  %v1409_v30 = vld [vmem:[#allocation6 + $0x70] sm:$0xff] }
 0x223   :  { %3139 = vmatpush1.bf16.msra.mxu1 %v3138_v42  ;;  %2885 = vmatprep.subr.bf16.mxu0 %v2884_v43  ;;  %v771_v42 = vld [vmem:[#allocation2 + $0xf50] sm:$0xff]  ;;  %v3160_v43 = vpack.c.bf16 %v776_v36, %v772_v35  ;;  %v2906_v49 = vpack.c.bf16 %v773_v41, %v769_v40  ;;  %v3186_v33 = vpack.c.bf16 %v1409_v30, %v1407_v29  ;;  %v1411_v35 = vld [vmem:[#allocation6 + $0x80] sm:$0xff] }
 0x224   :  { %3141 = vmatprep.subr.bf16.mxu1 %v3140_v47  ;;  %v780_v47 = vld [vmem:[#allocation2 + $0xf98] sm:$0xff]  ;;  %v3162_v50 = vpack.c.bf16 %v775_v44, %v771_v42  ;;  %v1415_v41 = vld [vmem:[#allocation6 + $0xa0] sm:$0xff] }
 0x225   :  { %v1413_v36 = vld [vmem:[#allocation6 + $0x90] sm:$0xff]  ;;  %v1422_v44 = vld [vmem:[#allocation6 + $0xd8] sm:$0xff] }
 0x226   :  { %2887 = vmatpush1.bf16.msra.mxu0 %v2886_v53  ;;  %v781_v53 = vld [vmem:[#allocation2 + $0xfa0] sm:$0xff]  ;;  %v1417_v42 = vld [vmem:[#allocation6 + $0xb0] sm:$0xff] }
 0x227   :  { %3143 = vmatpush1.bf16.msra.mxu1 %v3142_v54  ;;  %2889 = vmatprep.subr.bf16.mxu0 %v2888_v55  ;;  %v779_v54 = vld [vmem:[#allocation2 + $0xf90] sm:$0xff]  ;;  %v3164_v55 = vpack.c.bf16 %v784_v48, %v780_v47  ;;  %v2910_v61 = vpack.c.bf16 %v781_v53, %v777_v52  ;;  %v3194_v45 = vpack.c.bf16 %v1417_v42, %v1415_v41  ;;  %v1419_v47 = vld [vmem:[#allocation6 + $0xc0] sm:$0xff]  ;;  %v1462_v41 = vld [vmem:[#allocation6 + $0x218] sm:$0xff] }
 0x228   :  { %3145 = vmatprep.subr.bf16.mxu1 %v3144_v59  ;;  %v788_v59 = vld [vmem:[#allocation2 + $0xfd8] sm:$0xff]  ;;  %v3166_v62 = vpack.c.bf16 %v783_v56, %v779_v54  ;;  %v1423_v53 = vld [vmem:[#allocation6 + $0xe0] sm:$0xff] }
 0x229   :  { %v1421_v48 = vld [vmem:[#allocation6 + $0xd0] sm:$0xff]  ;;  %v1430_v56 = vld [vmem:[#allocation6 + $0x118] sm:$0xff] }
 0x22a   :  { %2891 = vmatpush1.bf16.msra.mxu0 %v2890_v1  ;;  %v789_v1 = vld [vmem:[#allocation2 + $0xfe0] sm:$0xff]  ;;  %v1425_v54 = vld [vmem:[#allocation6 + $0xf0] sm:$0xff] }
 0x22b   :  { %3147 = vmatpush1.bf16.msra.mxu1 %v3146_v2  ;;  %2893 = vmatprep.subr.bf16.mxu0 %v2892_v3  ;;  %v787_v2 = vld [vmem:[#allocation2 + $0xfd0] sm:$0xff]  ;;  %v3168_v3 = vpack.c.bf16 %v792_v60, %v788_v59  ;;  %v3202_v57 = vpack.c.bf16 %v1425_v54, %v1423_v53  ;;  %v1427_v59 = vld [vmem:[#allocation6 + $0x100] sm:$0xff] }
 0x22c   :  { %3149 = vmatprep.subr.bf16.mxu1 %v3148_v7  ;;  %v2914_v7 = vpack.c.bf16 %v789_v1, %v785_v0  ;;  %v3170_v8 = vpack.c.bf16 %v791_v4, %v787_v2  ;;  %v1429_v60 = vld [vmem:[#allocation6 + $0x110] sm:$0xff]  ;;  %v1431_v1 = vld [vmem:[#allocation6 + $0x120] sm:$0xff]  ;;  %v1438_v4 = vld [vmem:[#allocation6 + $0x158] sm:$0xff] }
 0x22d   :  { %v1433_v2 = vld [vmem:[#allocation6 + $0x130] sm:$0xff]  ;;  %v1686_v53 = vld [vmem:[#allocation9 + $0x18] sm:$0xff]  ;;  %v1703_v54 = vld [vmem:[#allocation9 + $0xa0] sm:$0xff] }
 0x22e   :  { %2895 = vmatpush1.bf16.msra.mxu0 %v2894_v13  ;;  %v1402_v13 = vld [vmem:[#allocation6 + $0x38] sm:$0xff]  ;;  %v3210_v5 = vpack.c.bf16 %v1433_v2, %v1431_v1  ;;  %v1707_v2 = vld [vmem:[#allocation9 + $0xc0] sm:$0xff] }
 0x22f   :  { %3151 = vmatpush1.bf16.msra.mxu1 %v3150_v14  ;;  %2897 = vmatprep.subr.bf16.mxu0 %v2896_v15  ;;  %v279_v14 = vld [vmem:[%s4416_s11 + $0x30] sm:$0xff]  ;;  %v3174_v15 = vpack.c.bf16 %v1397_v11, %v1395_v10  ;;  %v3176_v16 = vpack.c.bf16 %v1402_v13, %v1400_v12  ;;  %v1442_v10 = vld [vmem:[#allocation6 + $0x178] sm:$0xff]  ;;  %v1439_v13 = vld [vmem:[#allocation6 + $0x160] sm:$0xff] }
 0x230   :  { %3153 = vmatprep.subr.bf16.mxu1 %v3152_v19  ;;  %v1404_v19 = vld [vmem:[#allocation6 + $0x48] sm:$0xff]  ;;  %v1690_v1 = vld [vmem:[#allocation9 + $0x38] sm:$0xff] }
 0x231   :  { %v3180_v22 = vpack.c.bf16 %v1406_v20, %v1404_v19  ;;  %v1443_v19 = vld [vmem:[#allocation6 + $0x180] sm:$0xff]  ;;  %v1445_v20 = vld [vmem:[#allocation6 + $0x190] sm:$0xff] }
 0x232   :  { %2899 = vmatpush1.bf16.msra.mxu0 %v2898_v25  ;;  %v1408_v25 = vld [vmem:[#allocation6 + $0x68] sm:$0xff] }
 0x233   :  { %3155 = vmatpush1.bf16.msra.mxu1 %v3154_v26  ;;  %2901 = vmatprep.subr.bf16.mxu0 %v2900_v27  ;;  %v1410_v26 = vld [vmem:[#allocation6 + $0x78] sm:$0xff]  ;;  %v3182_v27 = vpack.c.bf16 %v1405_v24, %v1403_v23  ;;  %v3222_v23 = vpack.c.bf16 %v1445_v20, %v1443_v19 }
 0x234   :  { %3157 = vmatprep.subr.bf16.mxu1 %v3156_v31  ;;  %v3184_v28 = vpack.c.bf16 %v1410_v26, %v1408_v25  ;;  %v1412_v31 = vld [vmem:[#allocation6 + $0x88] sm:$0xff]  ;;  %v1447_v25 = vld [vmem:[#allocation6 + $0x1a0] sm:$0xff]  ;;  %v1449_v26 = vld [vmem:[#allocation6 + $0x1b0] sm:$0xff] }
 0x235   :  { %v3188_v34 = vpack.c.bf16 %v1414_v32, %v1412_v31  ;;  %v3226_v29 = vpack.c.bf16 %v1449_v26, %v1447_v25  ;;  %v1451_v31 = vld [vmem:[#allocation6 + $0x1c0] sm:$0xff]  ;;  %v1453_v32 = vld [vmem:[#allocation6 + $0x1d0] sm:$0xff] }
 0x236   :  { %2903 = vmatpush1.bf16.msra.mxu0 %v2902_v37  ;;  %v1416_v37 = vld [vmem:[#allocation6 + $0xa8] sm:$0xff] }
 0x237   :  { %3159 = vmatpush1.bf16.msra.mxu1 %v3158_v38  ;;  %2905 = vmatprep.subr.bf16.mxu0 %v2904_v39  ;;  %v1418_v38 = vld [vmem:[#allocation6 + $0xb8] sm:$0xff]  ;;  %v3190_v39 = vpack.c.bf16 %v1413_v36, %v1411_v35 }
 0x238   :  { %3161 = vmatprep.subr.bf16.mxu1 %v3160_v43  ;;  %v3192_v40 = vpack.c.bf16 %v1418_v38, %v1416_v37  ;;  %v1420_v43 = vld [vmem:[#allocation6 + $0xc8] sm:$0xff]  ;;  %v1458_v35 = vld [vmem:[#allocation6 + $0x1f8] sm:$0xff]  ;;  %v1455_v37 = vld [vmem:[#allocation6 + $0x1e0] sm:$0xff] }
 0x239   :  { %v3196_v46 = vpack.c.bf16 %v1422_v44, %v1420_v43  ;;  %v1457_v38 = vld [vmem:[#allocation6 + $0x1f0] sm:$0xff]  ;;  %v1699_v43 = vld [vmem:[#allocation9 + $0x80] sm:$0xff] }
 0x23a   :  { %2907 = vmatpush1.bf16.msra.mxu0 %v2906_v49  ;;  %v1424_v49 = vld [vmem:[#allocation6 + $0xe8] sm:$0xff] }
 0x23b   :  { %3163 = vmatpush1.bf16.msra.mxu1 %v3162_v50  ;;  %2909 = vmatprep.subr.bf16.mxu0 %v2908_v51  ;;  %v1426_v50 = vld [vmem:[#allocation6 + $0xf8] sm:$0xff]  ;;  %v3198_v51 = vpack.c.bf16 %v1421_v48, %v1419_v47  ;;  %v1700_v44 = vld [vmem:[#allocation9 + $0x88] sm:$0xff] }
 0x23c   :  { %3165 = vmatprep.subr.bf16.mxu1 %v3164_v55  ;;  %v3200_v52 = vpack.c.bf16 %v1426_v50, %v1424_v49  ;;  %v1428_v55 = vld [vmem:[#allocation6 + $0x108] sm:$0xff]  ;;  %v1701_v48 = vld [vmem:[#allocation9 + $0x90] sm:$0xff]  ;;  %v1702_v49 = vld [vmem:[#allocation9 + $0x98] sm:$0xff] }
 0x23d   :  { %v3204_v58 = vpack.c.bf16 %v1430_v56, %v1428_v55  ;;  %v1684_v47 = vld [vmem:[#allocation9 + $0x8] sm:$0xff] }
 0x23e   :  { %2911 = vmatpush1.bf16.msra.mxu0 %v2910_v61  ;;  %v1432_v61 = vld [vmem:[#allocation6 + $0x128] sm:$0xff] }
 0x23f   :  { %3167 = vmatpush1.bf16.msra.mxu1 %v3166_v62  ;;  %2913 = vmatprep.subr.bf16.mxu0 %v2912_v63  ;;  %v1434_v62 = vld [vmem:[#allocation6 + $0x138] sm:$0xff]  ;;  %v3206_v63 = vpack.c.bf16 %v1429_v60, %v1427_v59  ;;  %v1704_v55 = vld [vmem:[#allocation9 + $0xa8] sm:$0xff] }
 0x240   :  { %3169 = vmatprep.subr.bf16.mxu1 %v3168_v3  ;;  %v3208_v0 = vpack.c.bf16 %v1434_v62, %v1432_v61  ;;  %v1436_v3 = vld [vmem:[#allocation6 + $0x148] sm:$0xff]  ;;  %v1705_v60 = vld [vmem:[#allocation9 + $0xb0] sm:$0xff]  ;;  %v1706_v61 = vld [vmem:[#allocation9 + $0xb8] sm:$0xff] }
 0x241   :  { %v3212_v6 = vpack.c.bf16 %v1438_v4, %v1436_v3  ;;  %v1688_v59 = vld [vmem:[#allocation9 + $0x28] sm:$0xff] }
 0x242   :  { %2915 = vmatpush1.bf16.msra.mxu0 %v2914_v7  ;;  %v1435_v7 = vld [vmem:[#allocation6 + $0x140] sm:$0xff]  ;;  %v1708_v3 = vld [vmem:[#allocation9 + $0xc8] sm:$0xff] }
 0x243   :  { %3171 = vmatpush1.bf16.msra.mxu1 %v3170_v8  ;;  %3173 = vmatprep.subr.bf16.mxu0 %v3172_v9  ;;  %v1437_v8 = vld [vmem:[#allocation6 + $0x150] sm:$0xff]  ;;  %v1440_v9 = vld [vmem:[#allocation6 + $0x168] sm:$0xff] }
 0x244   :  { %v3214_v11 = vpack.c.bf16 %v1437_v8, %v1435_v7  ;;  %v3216_v12 = vpack.c.bf16 %v1442_v10, %v1440_v9  ;;  %v1692_v7 = vld [vmem:[#allocation9 + $0x48] sm:$0xff]  ;;  %v1709_v8 = vld [vmem:[#allocation9 + $0xd0] sm:$0xff]  ;;  %v1710_v9 = vld [vmem:[#allocation9 + $0xd8] sm:$0xff] }
 0x245   :  { %1093 = vmatmul.mubr.f32.vlgmr.msra.gmra.mrb[0].mxu0 %v279_v14 }
 0x246   :  { %1377 = vmatmul.mubr.f32.vlgmr.msra.gmra.mrb[0].mxu1 %v279_v14  ;;  %3175 = vmatpush1.bf16.msra.mxu0 %v3174_v15  ;;  %v1441_v14 = vld [vmem:[#allocation6 + $0x170] sm:$0xff]  ;;  %v1444_v15 = vld [vmem:[#allocation6 + $0x188] sm:$0xff] }
 0x247   :  { %3177 = vmatprep.subr.bf16.mxu0 %v3176_v16  ;;  %v1446_v16 = vld [vmem:[#allocation6 + $0x198] sm:$0xff]  ;;  %v3218_v17 = vpack.c.bf16 %v1441_v14, %v1439_v13 }
 0x248   :  { %v3220_v18 = vpack.c.bf16 %v1446_v16, %v1444_v15  ;;  %v1694_v13 = vld [vmem:[#allocation9 + $0x58] sm:$0xff]  ;;  %v795_v15 = vlaneseq }
 0x24a   :  { %3179 = vmatpush1.bf16.msra.mxu0 %v3178_v21  ;;  %v1448_v21 = vld [vmem:[#allocation6 + $0x1a8] sm:$0xff]  ;;  %v4333_v16 = vshrl.u32 %v795_v15, 7  ;;  %v1487_v15 = vld [vmem:[#allocation6 + $0x2e0] sm:$0xff] }
 0x24b   :  { %3181 = vmatprep.subr.bf16.mxu0 %v3180_v22  ;;  %v1450_v22 = vld [vmem:[#allocation6 + $0x1b8] sm:$0xff] }
 0x24c   :  { %v3224_v24 = vpack.c.bf16 %v1450_v22, %v1448_v21  ;;  %v4341_v19 = vsub.s32 1, %v4333_v16  ;;  %v809_v20 = vsub.s32 3, %v4333_v16 }
 0x24e   :  { %3183 = vmatpush1.bf16.msra.mxu0 %v3182_v27  ;;  %v1452_v27 = vld [vmem:[#allocation6 + $0x1c8] sm:$0xff] }
 0x24f   :  { %3185 = vmatprep.subr.bf16.mxu0 %v3184_v28  ;;  %v1454_v28 = vld [vmem:[#allocation6 + $0x1d8] sm:$0xff] }
 0x250   :  { %v3228_v30 = vpack.c.bf16 %v1454_v28, %v1452_v27 }
 0x252   :  { %3187 = vmatpush1.bf16.msra.mxu0 %v3186_v33  ;;  %v3230_v33 = vpack.c.bf16 %v1453_v32, %v1451_v31  ;;  %v1461_v31 = vld [vmem:[#allocation6 + $0x210] sm:$0xff] }
 0x253   :  { %3189 = vmatprep.subr.bf16.mxu0 %v3188_v34  ;;  %v1456_v34 = vld [vmem:[#allocation6 + $0x1e8] sm:$0xff] }
 0x254   :  { %v3232_v36 = vpack.c.bf16 %v1458_v35, %v1456_v34  ;;  %v1464_v34 = vld [vmem:[#allocation6 + $0x228] sm:$0xff]  ;;  %v1466_v35 = vld [vmem:[#allocation6 + $0x238] sm:$0xff] }
 0x256   :  { %3191 = vmatpush1.bf16.msra.mxu0 %v3190_v39  ;;  %v3234_v39 = vpack.c.bf16 %v1457_v38, %v1455_v37 }
 0x257   :  { %3193 = vmatprep.subr.bf16.mxu0 %v3192_v40  ;;  %v1460_v40 = vld [vmem:[#allocation6 + $0x208] sm:$0xff] }
 0x258   :  { %v3236_v42 = vpack.c.bf16 %v1462_v41, %v1460_v40  ;;  %v3240_v40 = vpack.c.bf16 %v1466_v35, %v1464_v34  ;;  %v1463_v41 = vld [vmem:[#allocation6 + $0x220] sm:$0xff]  ;;  %v1500_v34 = vld [vmem:[#allocation6 + $0x348] sm:$0xff]  ;;  %v1502_v35 = vld [vmem:[#allocation6 + $0x358] sm:$0xff] }
 0x25a   :  { %3195 = vmatpush1.bf16.msra.mxu0 %v3194_v45  ;;  %v1683_v45 = vld [vmem:[#allocation9] sm:$0xff] }
 0x25b   :  { %3197 = vmatprep.subr.bf16.mxu0 %v3196_v46  ;;  %v3300_v46 = vpack.c.bf16 %v1700_v44, %v1699_v43  ;;  %v3302_v50 = vpack.c.bf16 %v1684_v47, %v1683_v45  ;;  %v1468_v44 = vld [vmem:[#allocation6 + $0x248] sm:$0xff]  ;;  %v1470_v45 = vld [vmem:[#allocation6 + $0x258] sm:$0xff] }
 0x25d   :  { %3301 = vmatprep.subr.bf16.mxu1 %v3300_v46 }
 0x25e   :  { %3199 = vmatpush1.bf16.msra.mxu0 %v3198_v51  ;;  %v3304_v51 = vpack.c.bf16 %v1702_v49, %v1701_v48  ;;  %3303 = vmatpush3.bf16.msra.mxu1 %v3302_v50  ;;  %v3244_v48 = vpack.c.bf16 %v1470_v45, %v1468_v44  ;;  %v1467_v49 = vld [vmem:[#allocation6 + $0x240] sm:$0xff]  ;;  %v1469_v50 = vld [vmem:[#allocation6 + $0x250] sm:$0xff] }
 0x25f   :  { %3201 = vmatprep.subr.bf16.mxu0 %v3200_v52  ;;  %v1685_v52 = vld [vmem:[#allocation9 + $0x10] sm:$0xff]  ;;  %v1503_v44 = vld [vmem:[#allocation6 + $0x360] sm:$0xff] }
 0x260   :  { %v3306_v56 = vpack.c.bf16 %v1686_v53, %v1685_v52  ;;  %3305 = vmatprep.subr.bf16.mxu1 %v3304_v51  ;;  %v1472_v51 = vld [vmem:[#allocation6 + $0x268] sm:$0xff]  ;;  %v1474_v52 = vld [vmem:[#allocation6 + $0x278] sm:$0xff]  ;;  %v3246_v53 = vpack.c.bf16 %v1469_v50, %v1467_v49  ;;  %v1505_v45 = vld [vmem:[#allocation6 + $0x370] sm:$0xff] }
 0x261   :  { %v1507_v50 = vld [vmem:[#allocation6 + $0x380] sm:$0xff] }
 0x262   :  { %3203 = vmatpush1.bf16.msra.mxu0 %v3202_v57  ;;  %v3308_v57 = vpack.c.bf16 %v1704_v55, %v1703_v54  ;;  %3307 = vmatpush3.bf16.msra.mxu1 %v3306_v56  ;;  %v3248_v54 = vpack.c.bf16 %v1474_v52, %v1472_v51  ;;  %v1471_v55 = vld [vmem:[#allocation6 + $0x260] sm:$0xff]  ;;  %v1473_v56 = vld [vmem:[#allocation6 + $0x270] sm:$0xff]  ;;  %v1512_v52 = vld [vmem:[#allocation6 + $0x3a8] sm:$0xff] }
 0x263   :  { %3205 = vmatprep.subr.bf16.mxu0 %v3204_v58  ;;  %v1687_v58 = vld [vmem:[#allocation9 + $0x20] sm:$0xff]  ;;  %v1509_v51 = vld [vmem:[#allocation6 + $0x390] sm:$0xff] }
 0x264   :  { %v3310_v62 = vpack.c.bf16 %v1688_v59, %v1687_v58  ;;  %3309 = vmatprep.subr.bf16.mxu1 %v3308_v57  ;;  %v1476_v57 = vld [vmem:[#allocation6 + $0x288] sm:$0xff]  ;;  %v1478_v58 = vld [vmem:[#allocation6 + $0x298] sm:$0xff]  ;;  %v3250_v59 = vpack.c.bf16 %v1473_v56, %v1471_v55  ;;  %v1511_v56 = vld [vmem:[#allocation6 + $0x3a0] sm:$0xff] }
 0x266   :  { %3207 = vmatpush1.bf16.msra.mxu0 %v3206_v63  ;;  %v3312_v63 = vpack.c.bf16 %v1706_v61, %v1705_v60  ;;  %3311 = vmatpush3.bf16.msra.mxu1 %v3310_v62  ;;  %v3252_v60 = vpack.c.bf16 %v1478_v58, %v1476_v57  ;;  %v1475_v61 = vld [vmem:[#allocation6 + $0x280] sm:$0xff]  ;;  %v1477_v62 = vld [vmem:[#allocation6 + $0x290] sm:$0xff]  ;;  %v805_v58 = vsub.s32 2, %v4333_v16 }
 0x267   :  { %3209 = vmatprep.subr.bf16.mxu0 %v3208_v0  ;;  %v1689_v0 = vld [vmem:[#allocation9 + $0x30] sm:$0xff] }
 0x268   :  { %v3314_v4 = vpack.c.bf16 %v1690_v1, %v1689_v0  ;;  %3313 = vmatprep.subr.bf16.mxu1 %v3312_v63  ;;  %v1480_v63 = vld [vmem:[#allocation6 + $0x2a8] sm:$0xff]  ;;  %v1482_v0 = vld [vmem:[#allocation6 + $0x2b8] sm:$0xff]  ;;  %v3254_v1 = vpack.c.bf16 %v1477_v62, %v1475_v61  ;;  %v1513_v57 = vld [vmem:[#allocation6 + $0x3b0] sm:$0xff] }
 0x269   :  { %v3290_v61 = vpack.c.bf16 %v1513_v57, %v1511_v56 }
 0x26a   :  { %3211 = vmatpush1.bf16.msra.mxu0 %v3210_v5  ;;  %v3316_v5 = vpack.c.bf16 %v1708_v3, %v1707_v2  ;;  %3315 = vmatpush3.bf16.msra.mxu1 %v3314_v4  ;;  %v3256_v2 = vpack.c.bf16 %v1482_v0, %v1480_v63  ;;  %v1479_v3 = vld [vmem:[#allocation6 + $0x2a0] sm:$0xff]  ;;  %v1481_v4 = vld [vmem:[#allocation6 + $0x2b0] sm:$0xff] }
 0x26b   :  { %3213 = vmatprep.subr.bf16.mxu0 %v3212_v6  ;;  %v1691_v6 = vld [vmem:[#allocation9 + $0x40] sm:$0xff]  ;;  %v1517_v0 = vld [vmem:[#allocation6 + $0x3d0] sm:$0xff] }
 0x26c   :  { %v3318_v10 = vpack.c.bf16 %v1692_v7, %v1691_v6  ;;  %3317 = vmatprep.subr.bf16.mxu1 %v3316_v5  ;;  %v1484_v5 = vld [vmem:[#allocation6 + $0x2c8] sm:$0xff]  ;;  %v1486_v6 = vld [vmem:[#allocation6 + $0x2d8] sm:$0xff]  ;;  %v3258_v7 = vpack.c.bf16 %v1481_v4, %v1479_v3  ;;  %v1515_v63 = vld [vmem:[#allocation6 + $0x3c0] sm:$0xff] }
 0x26d   :  { %v1522_v3 = vld [vmem:[#allocation6 + $0x3f8] sm:$0xff]  ;;  %v3294_v4 = vpack.c.bf16 %v1517_v0, %v1515_v63  ;;  %v1811_v0 = vld [vmem:[#allocation12 + $0x80] sm:$0xff] }
 0x26e   :  { %3215 = vmatpush1.bf16.msra.mxu0 %v3214_v11  ;;  %v3320_v11 = vpack.c.bf16 %v1710_v9, %v1709_v8  ;;  %3319 = vmatpush3.bf16.msra.mxu1 %v3318_v10  ;;  %v3260_v8 = vpack.c.bf16 %v1486_v6, %v1484_v5  ;;  %v1483_v9 = vld [vmem:[#allocation6 + $0x2c0] sm:$0xff]  ;;  %v1485_v10 = vld [vmem:[#allocation6 + $0x2d0] sm:$0xff] }
 0x26f   :  { %3217 = vmatprep.subr.bf16.mxu0 %v3216_v12  ;;  %v1693_v12 = vld [vmem:[#allocation9 + $0x50] sm:$0xff]  ;;  %v1519_v6 = vld [vmem:[#allocation6 + $0x3e0] sm:$0xff] }
 0x270   :  { %v3322_v14 = vpack.c.bf16 %v1694_v13, %v1693_v12  ;;  %3321 = vmatprep.subr.bf16.mxu1 %v3320_v11  ;;  %v1488_v11 = vld [vmem:[#allocation6 + $0x2e8] sm:$0xff]  ;;  %v1490_v12 = vld [vmem:[#allocation6 + $0x2f8] sm:$0xff]  ;;  %v3262_v13 = vpack.c.bf16 %v1485_v10, %v1483_v9 }
 0x272   :  { %3219 = vmatpush1.bf16.msra.mxu0 %v3218_v17  ;;  %3323 = vmatpush3.bf16.msra.mxu1 %v3322_v14  ;;  %v4336_v17 = vsub.s32 0, %v4333_v16  ;;  %v3264_v14 = vpack.c.bf16 %v1490_v12, %v1488_v11  ;;  %v1711_v11 = vld [vmem:[#allocation9 + $0xe0] sm:$0xff] }
 0x273   :  { %3221 = vmatprep.subr.bf16.mxu0 %v3220_v18  ;;  %v4338_v18 = vld [vmem:[#allocation4] sm:$0xf] }
 0x274   :  { %v798_v21 = vrot.slane %v4338_v18, %v4336_v17  ;;  %v802_v22 = vrot.slane %v4338_v18, %v4341_v19 }
 0x276   :  { %3223 = vmatpush1.bf16.msra.mxu0 %v3222_v23  ;;  %v810_v23 = vrot.slane %v4338_v18, %v809_v20  ;;  %v1489_v20 = vld [vmem:[#allocation6 + $0x2f0] sm:$0xff] }
 0x277   :  { %3225 = vmatprep.subr.bf16.mxu0 %v3224_v24 }
 0x27a   :  { %3227 = vmatpush1.bf16.msra.mxu0 %v3226_v29 }
 0x27b   :  { %3229 = vmatprep.subr.bf16.mxu0 %v3228_v30  ;;  %v1459_v30 = vld [vmem:[#allocation6 + $0x200] sm:$0xff] }
 0x27c   :  { %v3238_v38 = vpack.c.bf16 %v1461_v31, %v1459_v30 }
 0x27e   :  { %3231 = vmatpush1.bf16.msra.mxu0 %v3230_v33 }
 0x27f   :  { %3233 = vmatprep.subr.bf16.mxu0 %v3232_v36 }
 0x282   :  { %3235 = vmatpush1.bf16.msra.mxu0 %v3234_v39 }
 0x283   :  { %3237 = vmatprep.subr.bf16.mxu0 %v3236_v42  ;;  %v1465_v42 = vld [vmem:[#allocation6 + $0x230] sm:$0xff] }
 0x284   :  { %v3242_v47 = vpack.c.bf16 %v1465_v42, %v1463_v41  ;;  %v1506_v41 = vld [vmem:[#allocation6 + $0x378] sm:$0xff] }
 0x318   :  { %v1094_v24 = vpop.f32.mrb[0].mxu0 }
 0x319   :  { %v3508_v25 = vadd.f32 %v1094_v24, %v798_v21  ;;  %v4349_v26 = vpop.f32.mrb[0].mxu1  ;;  %v1096_v27 = vpop.f32.mrb[1].mxu0  ;;  %v1492_v21 = vld [vmem:[#allocation6 + $0x308] sm:$0xff] }
 0x31a   :  { %v3509_v28 = vadd.f32 %v1096_v27, %v802_v22  ;;  %v1380_v29 = vpop.f32.mrb[1].mxu1  ;;  %v1494_v22 = vld [vmem:[#allocation6 + $0x318] sm:$0xff]  ;;  %v1493_v27 = vld [vmem:[#allocation6 + $0x310] sm:$0xff] }
 0x31b   :  { %v1387_v32 = vmul.f32 0.1, %v3508_v25  ;;  %v3511_v33 = vadd.f32 %v1380_v29, %v810_v23  ;;  %vm1383_vm0 = vcmp.gt.f32.partialorder %v3508_v25, 0.0  ;;  %v3266_v23 = vpack.c.bf16 %v1489_v20, %v1487_v15  ;;  %v1498_v29 = vld [vmem:[#allocation6 + $0x338] sm:$0xff] }
 0x31c   :  { %v1388_v36 = vmul.f32 0.1, %v3509_v28  ;;  %vm1384_vm1 = vcmp.gt.f32.partialorder %v3509_v28, 0.0  ;;  %v3268_v24 = vpack.c.bf16 %v1494_v22, %v1492_v21  ;;  %v1713_v20 = vld [vmem:[#allocation9 + $0xf0] sm:$0xff]  ;;  %v1714_v21 = vld [vmem:[#allocation9 + $0xf8] sm:$0xff] }
 0x31d   :  { %v1390_v37 = vmul.f32 0.1, %v3511_v33  ;;  %vm1386_vm2 = vcmp.gt.f32.partialorder %v3511_v33, 0.0  ;;  %v1391_v43 = vsel %vm1383_vm0, %v3508_v25, %v1387_v32  ;;  %v1491_v25 = vld [vmem:[#allocation6 + $0x300] sm:$0xff]  ;;  %v3328_v22 = vpack.c.bf16 %v1714_v21, %v1713_v20  ;;  %v1825_v21 = vld [vmem:[#allocation12 + $0xf0] sm:$0xff] }
 0x31e   :  { %v1392_v39 = vsel %vm1384_vm1, %v3509_v28, %v1388_v36  ;;  %v1496_v28 = vld [vmem:[#allocation6 + $0x328] sm:$0xff]  ;;  %v3270_v30 = vpack.c.bf16 %v1493_v27, %v1491_v25  ;;  %v1495_v32 = vld [vmem:[#allocation6 + $0x320] sm:$0xff] }
 0x31f   :  { %1599 = vmatprep.mubr.f32.mxu0 %v1392_v39  ;;  %v1394_v46 = vsel %vm1386_vm2, %v3511_v33, %v1390_v37  ;;  %v3272_v31 = vpack.c.bf16 %v1498_v29, %v1496_v28  ;;  %v1497_v33 = vld [vmem:[#allocation6 + $0x330] sm:$0xff]  ;;  %v3276_v37 = vpack.c.bf16 %v1502_v35, %v1500_v34  ;;  %v1798_v27 = vld [vmem:[#allocation12 + $0x18] sm:$0xff]  ;;  %v1823_v20 = vld [vmem:[#allocation12 + $0xe0] sm:$0xff] }
 0x320   :  { %1600 = vmatmul.mubr.f32.vlgmr.msra.gmra.mrb[2].mxu0 %v1391_v43  ;;  %v3274_v36 = vpack.c.bf16 %v1497_v33, %v1495_v32  ;;  %v1501_v39 = vld [vmem:[#allocation6 + $0x350] sm:$0xff]  ;;  %v1523_v29 = vld [vmem:[#allocation7] sm:$0x3] }
 0x321   :  { %3239 = vmatpush1.bf16.msra.mxu0 %v3238_v38  ;;  %1670 = vmatprep.mubr.f32.mxu0 %v1394_v46  ;;  %v1499_v38 = vld [vmem:[#allocation6 + $0x340] sm:$0xff]  ;;  %v1508_v46 = vld [vmem:[#allocation6 + $0x388] sm:$0xff] }
 0x322   :  { %3241 = vmatprep.subr.bf16.mxu0 %v3240_v40  ;;  %v1504_v40 = vld [vmem:[#allocation6 + $0x368] sm:$0xff]  ;;  %v3278_v42 = vpack.c.bf16 %v1501_v39, %v1499_v38 }
 0x323   :  { %v3280_v43 = vpack.c.bf16 %v1506_v41, %v1504_v40  ;;  %v1796_v25 = vld [vmem:[#allocation12 + $0x8] sm:$0xff]  ;;  %v1802_v40 = vld [vmem:[#allocation12 + $0x38] sm:$0xff] }
 0x324   :  { %v3332_v28 = vpack.c.bf16 %v1798_v27, %v1796_v25  ;;  %v1800_v39 = vld [vmem:[#allocation12 + $0x28] sm:$0xff] }
 0x325   :  { %3243 = vmatpush1.bf16.msra.mxu0 %v3242_v47  ;;  %v1510_v47 = vld [vmem:[#allocation6 + $0x398] sm:$0xff] }
 0x326   :  { %3245 = vmatprep.subr.bf16.mxu0 %v3244_v48  ;;  %v3282_v48 = vpack.c.bf16 %v1505_v45, %v1503_v44  ;;  %v3284_v49 = vpack.c.bf16 %v1510_v47, %v1508_v46  ;;  %v3336_v44 = vpack.c.bf16 %v1802_v40, %v1800_v39  ;;  %v1799_v45 = vld [vmem:[#allocation12 + $0x20] sm:$0xff]  ;;  %v1801_v46 = vld [vmem:[#allocation12 + $0x30] sm:$0xff] }
 0x327   :  { %v1918_v39 = vld [vmem:[#allocation15 + $0x10] sm:$0xff]  ;;  %v1919_v40 = vld [vmem:[#allocation15 + $0x18] sm:$0xff] }
 0x329   :  { %3247 = vmatpush1.bf16.msra.mxu0 %v3246_v53  ;;  %v1514_v53 = vld [vmem:[#allocation6 + $0x3b8] sm:$0xff] }
 0x32a   :  { %3249 = vmatprep.subr.bf16.mxu0 %v3248_v54  ;;  %v3286_v54 = vpack.c.bf16 %v1509_v51, %v1507_v50  ;;  %v3288_v55 = vpack.c.bf16 %v1514_v53, %v1512_v52  ;;  %v3338_v50 = vpack.c.bf16 %v1801_v46, %v1799_v45  ;;  %v1803_v52 = vld [vmem:[#allocation12 + $0x40] sm:$0xff]  ;;  %v1805_v53 = vld [vmem:[#allocation12 + $0x50] sm:$0xff] }
 0x32b   :  { %v3342_v56 = vpack.c.bf16 %v1805_v53, %v1803_v52  ;;  %v1920_v46 = vld [vmem:[#allocation15 + $0x20] sm:$0xff]  ;;  %v1922_v52 = vld [vmem:[#allocation15 + $0x30] sm:$0xff]  ;;  %v1923_v53 = vld [vmem:[#allocation15 + $0x38] sm:$0xff] }
 0x32d   :  { %3251 = vmatpush1.bf16.msra.mxu0 %v3250_v59  ;;  %v1516_v59 = vld [vmem:[#allocation6 + $0x3c8] sm:$0xff] }
 0x32e   :  { %3253 = vmatprep.subr.bf16.mxu0 %v3252_v60  ;;  %v1518_v60 = vld [vmem:[#allocation6 + $0x3d8] sm:$0xff] }
 0x32f   :  { %v3292_v62 = vpack.c.bf16 %v1518_v60, %v1516_v59  ;;  %v1809_v59 = vld [vmem:[#allocation12 + $0x70] sm:$0xff]  ;;  %v1812_v60 = vld [vmem:[#allocation12 + $0x88] sm:$0xff] }
 0x331   :  { %3255 = vmatpush1.bf16.msra.mxu0 %v3254_v1  ;;  %v806_v1 = vrot.slane %v4338_v18, %v805_v58  ;;  %v1712_v18 = vld [vmem:[#allocation9 + $0xe8] sm:$0xff] }
 0x332   :  { %3257 = vmatprep.subr.bf16.mxu0 %v3256_v2  ;;  %v1520_v2 = vld [vmem:[#allocation6 + $0x3e8] sm:$0xff]  ;;  %v3324_v12 = vpack.c.bf16 %v1712_v18, %v1711_v11  ;;  %v1821_v18 = vld [vmem:[#allocation12 + $0xd0] sm:$0xff] }
 0x333   :  { %v3296_v5 = vpack.c.bf16 %v1522_v3, %v1520_v2  ;;  %v3510_v16 = vadd.f32 %v4349_v26, %v806_v1  ;;  %v1697_v26 = vld [vmem:[#allocation9 + $0x70] sm:$0xff]  ;;  %v1807_v58 = vld [vmem:[#allocation12 + $0x60] sm:$0xff]  ;;  %v1818_v3 = vld [vmem:[#allocation12 + $0xb8] sm:$0xff] }
 0x334   :  { %3325 = vmatprep.subr.bf16.mxu1 %v3324_v12  ;;  %v1813_v1 = vld [vmem:[#allocation12 + $0x90] sm:$0xff]  ;;  %v1816_v2 = vld [vmem:[#allocation12 + $0xa8] sm:$0xff]  ;;  %v1819_v11 = vld [vmem:[#allocation12 + $0xc0] sm:$0xff] }
 0x335   :  { %3259 = vmatpush1.bf16.msra.mxu0 %v3258_v7  ;;  %v1521_v7 = vld [vmem:[#allocation6 + $0x3f0] sm:$0xff]  ;;  %v1389_v9 = vmul.f32 0.1, %v3510_v16  ;;  %vm1385_vm3 = vcmp.gt.f32.partialorder %v3510_v16, 0.0  ;;  %v3358_v12 = vpack.c.bf16 %v1821_v18, %v1819_v11  ;;  %v1931_v18 = vld [vmem:[#allocation15 + $0x78] sm:$0xff] }
 0x336   :  { %3261 = vmatprep.subr.bf16.mxu0 %v3260_v8  ;;  %v3298_v8 = vpack.c.bf16 %v1521_v7, %v1519_v6  ;;  %v1815_v6 = vld [vmem:[#allocation12 + $0xa0] sm:$0xff]  ;;  %v1817_v7 = vld [vmem:[#allocation12 + $0xb0] sm:$0xff] }
 0x337   :  { %v1393_v10 = vsel %vm1385_vm3, %v3510_v16, %v1389_v9  ;;  %v3354_v16 = vpack.c.bf16 %v1817_v7, %v1815_v6  ;;  %v1822_v9 = vld [vmem:[#allocation12 + $0xd8] sm:$0xff]  ;;  %v1928_v6 = vld [vmem:[#allocation15 + $0x60] sm:$0xff]  ;;  %v1929_v7 = vld [vmem:[#allocation15 + $0x68] sm:$0xff] }
 0x338   :  { %v1930_v11 = vld [vmem:[#allocation15 + $0x70] sm:$0xff] }
 0x339   :  { %3263 = vmatpush1.bf16.msra.mxu0 %v3262_v13  ;;  %v1695_v13 = vld [vmem:[#allocation9 + $0x60] sm:$0xff] }
 0x33a   :  { %3265 = vmatprep.subr.bf16.mxu0 %v3264_v14  ;;  %v1696_v14 = vld [vmem:[#allocation9 + $0x68] sm:$0xff] }
 0x33b   :  { %v3326_v15 = vpack.c.bf16 %v1696_v14, %v1695_v13  ;;  %v1824_v13 = vld [vmem:[#allocation12 + $0xe8] sm:$0xff]  ;;  %v1826_v14 = vld [vmem:[#allocation12 + $0xf8] sm:$0xff] }
 0x33d   :  { %3267 = vmatpush1.bf16.msra.mxu0 %v3266_v23  ;;  %3327 = vmatpush3.bf16.msra.mxu1 %v3326_v15  ;;  %v1698_v23 = vld [vmem:[#allocation9 + $0x78] sm:$0xff]  ;;  %v3360_v15 = vpack.c.bf16 %v1826_v14, %v1824_v13  ;;  %v2027_v13 = vld [vmem:[#allocation18 + $0x8] sm:$0xff] }
 0x33e   :  { %3269 = vmatprep.subr.bf16.mxu0 %v3268_v24  ;;  %v3330_v24 = vpack.c.bf16 %v1698_v23, %v1697_v26  ;;  %3329 = vmatprep.subr.bf16.mxu1 %v3328_v22  ;;  %v3362_v22 = vpack.c.bf16 %v1825_v21, %v1823_v20  ;;  %v3969_v26 = vmov 0.0   ;;  %v1932_v23 = vld [vmem:[#allocation15 + $0x80] sm:$0xff]  ;;  %v1827_v20 = vld [vmem:[#allocation13] sm:$0x3] }
 0x33f   :  { %v2029_v14 = vld [vmem:[#allocation18 + $0x18] sm:$0xff]  ;;  %v1832_v21 = vrot.slane %v1827_v20, %v4336_v17 }
 0x341   :  { %3271 = vmatpush1.bf16.msra.mxu0 %v3270_v30  ;;  %3331 = vmatpush3.bf16.msra.mxu1 %v3330_v24  ;;  %v1528_v30 = vrot.slane %v1523_v29, %v4336_v17  ;;  %v1933_v24 = vld [vmem:[#allocation15 + $0x88] sm:$0xff]  ;;  %v2032_v17 = vld [vmem:[#allocation18 + $0x30] sm:$0xff] }
 0x342   :  { %3273 = vmatprep.subr.bf16.mxu0 %v3272_v31  ;;  %3333 = vmatprep.subr.bf16.mxu1 %v3332_v28  ;;  %v1532_v31 = vrot.slane %v1523_v29, %v4341_v19  ;;  %v3364_v25 = vpack.c.bf16 %v1933_v24, %v1932_v23  ;;  %v2446_v28 = vld [vmem:[#allocation10] ss:$0 sm:$0xff] }
 0x345   :  { %3275 = vmatpush1.bf16.msra.mxu0 %v3274_v36  ;;  %v1795_v36 = vld [vmem:[#allocation12] sm:$0xff] }
 0x346   :  { %3277 = vmatprep.subr.bf16.mxu0 %v3276_v37  ;;  %v1797_v37 = vld [vmem:[#allocation12 + $0x10] sm:$0xff] }
 0x349   :  { %3279 = vmatpush1.bf16.msra.mxu0 %v3278_v42  ;;  %v3334_v42 = vpack.c.bf16 %v1797_v37, %v1795_v36 }
 0x34a   :  { %3281 = vmatprep.subr.bf16.mxu0 %v3280_v43 }
 0x34d   :  { %3283 = vmatpush1.bf16.msra.mxu0 %v3282_v48  ;;  %v1804_v48 = vld [vmem:[#allocation12 + $0x48] sm:$0xff] }
 0x34e   :  { %3285 = vmatprep.subr.bf16.mxu0 %v3284_v49  ;;  %v1806_v49 = vld [vmem:[#allocation12 + $0x58] sm:$0xff] }
 0x34f   :  { %v3340_v51 = vpack.c.bf16 %v1806_v49, %v1804_v48  ;;  %v1938_v48 = vld [vmem:[#allocation15 + $0xb0] sm:$0xff]  ;;  %v1939_v49 = vld [vmem:[#allocation15 + $0xb8] sm:$0xff] }
 0x351   :  { %3287 = vmatpush1.bf16.msra.mxu0 %v3286_v54  ;;  %v1808_v54 = vld [vmem:[#allocation12 + $0x68] sm:$0xff] }
 0x352   :  { %3289 = vmatprep.subr.bf16.mxu0 %v3288_v55  ;;  %v1810_v55 = vld [vmem:[#allocation12 + $0x78] sm:$0xff] }
 0x353   :  { %v3344_v57 = vpack.c.bf16 %v1810_v55, %v1808_v54  ;;  %v1940_v54 = vld [vmem:[#allocation15 + $0xc0] sm:$0xff]  ;;  %v1941_v55 = vld [vmem:[#allocation15 + $0xc8] sm:$0xff] }
 0x355   :  { %3291 = vmatpush1.bf16.msra.mxu0 %v3290_v61  ;;  %v1814_v61 = vld [vmem:[#allocation12 + $0x98] sm:$0xff] }
 0x356   :  { %3293 = vmatprep.subr.bf16.mxu0 %v3292_v62  ;;  %v3346_v62 = vpack.c.bf16 %v1809_v59, %v1807_v58  ;;  %v3348_v63 = vpack.c.bf16 %v1814_v61, %v1812_v60  ;;  %v1924_v58 = vld [vmem:[#allocation15 + $0x40] sm:$0xff]  ;;  %v1925_v59 = vld [vmem:[#allocation15 + $0x48] sm:$0xff]  ;;  %v1942_v60 = vld [vmem:[#allocation15 + $0xd0] sm:$0xff] }
 0x357   :  { %v1943_v61 = vld [vmem:[#allocation15 + $0xd8] sm:$0xff] }
 0x359   :  { %3295 = vmatpush1.bf16.msra.mxu0 %v3294_v4  ;;  %v3350_v4 = vpack.c.bf16 %v1813_v1, %v1811_v0  ;;  %v1926_v0 = vld [vmem:[#allocation15 + $0x50] sm:$0xff]  ;;  %v1927_v1 = vld [vmem:[#allocation15 + $0x58] sm:$0xff] }
 0x35a   :  { %3297 = vmatprep.subr.bf16.mxu0 %v3296_v5  ;;  %v3352_v5 = vpack.c.bf16 %v1818_v3, %v1816_v2  ;;  %v3386_v2 = vpack.c.bf16 %v1927_v1, %v1926_v0  ;;  %v1944_v3 = vld [vmem:[#allocation15 + $0xe0] sm:$0xff] }
 0x35b   :  { %v2053_v0 = vld [vmem:[#allocation18 + $0xd8] sm:$0xff] }
 0x35d   :  { %3299 = vmatpush1.bf16.msra.mxu0 %v3298_v8  ;;  %v1820_v8 = vld [vmem:[#allocation12 + $0xc8] sm:$0xff] }
 0x360   :  { %1671 = vmatmul.mubr.f32.vlgmr.msra.gmra.mrb[2].mxu0 %v1393_v10  ;;  %v3356_v10 = vpack.c.bf16 %v1822_v9, %v1820_v8  ;;  %v1946_v8 = vld [vmem:[#allocation15 + $0xf0] sm:$0xff]  ;;  %v1947_v9 = vld [vmem:[#allocation15 + $0xf8] sm:$0xff] }
 0x433   :  { %v1672_v32 = vpop.f32.mrb[2].mxu0 }
 0x434   :  { %v3512_v33 = vadd.f32 %v1672_v32, %v1528_v30  ;;  %v1674_v34 = vpop.f32.mrb[3].mxu0  ;;  %v1917_v32 = vld [vmem:[#allocation15 + $0x8] sm:$0xff] }
 0x435   :  { %v3513_v35 = vadd.f32 %v1674_v34, %v1532_v31  ;;  %v1916_v31 = vld [vmem:[#allocation15] sm:$0xff]  ;;  %v1934_v34 = vld [vmem:[#allocation15 + $0x90] sm:$0xff] }
 0x436   :  { %v1679_v38 = vmul.f32 0.1, %v3512_v33  ;;  %vm1677_vm4 = vcmp.gt.f32.partialorder %v3512_v33, 0.0  ;;  %v3366_v37 = vpack.c.bf16 %v1917_v32, %v1916_v31  ;;  %v2031_v31 = vld [vmem:[#allocation18 + $0x28] sm:$0xff]  ;;  %v2033_v32 = vld [vmem:[#allocation18 + $0x38] sm:$0xff] }
 0x437   :  { %v1680_v41 = vmul.f32 0.1, %v3513_v35  ;;  %vm1678_vm5 = vcmp.gt.f32.partialorder %v3513_v35, 0.0 }
 0x438   :  { %v1681_v47 = vsel %vm1677_vm4, %v3512_v33, %v1679_v38 }
 0x439   :  { %v1682_v43 = vsel %vm1678_vm5, %v3513_v35, %v1680_v41  ;;  %v1935_v35 = vld [vmem:[#allocation15 + $0x98] sm:$0xff] }
 0x43a   :  { %1786 = vmatprep.mubr.f32.mxu1 %v1682_v43  ;;  %v3368_v38 = vpack.c.bf16 %v1935_v35, %v1934_v34  ;;  %v1937_v43 = vld [vmem:[#allocation15 + $0xa8] sm:$0xff] }
 0x43b   :  { %1787 = vmatmul.mubr.f32.vlgmr.msra.gmra.mrb[2].mxu1 %v1681_v47  ;;  %v1921_v47 = vld [vmem:[#allocation15 + $0x28] sm:$0xff] }
 0x43c   :  { %3335 = vmatpush1.bf16.msra.mxu1 %v3334_v42  ;;  %1903 = vmatprep.mubr.f32.mxu1 %v3969_v26  ;;  %v1936_v42 = vld [vmem:[#allocation15 + $0xa0] sm:$0xff] }
 0x43d   :  { %3337 = vmatprep.subr.bf16.mxu1 %v3336_v44  ;;  %v3370_v44 = vpack.c.bf16 %v1919_v40, %v1918_v39  ;;  %v3372_v45 = vpack.c.bf16 %v1937_v43, %v1936_v42  ;;  %v2037_v39 = vld [vmem:[#allocation18 + $0x58] sm:$0xff]  ;;  %v2034_v42 = vld [vmem:[#allocation18 + $0x40] sm:$0xff]  ;;  %v2036_v43 = vld [vmem:[#allocation18 + $0x50] sm:$0xff] }
 0x440   :  { %3339 = vmatpush1.bf16.msra.mxu1 %v3338_v50  ;;  %v3374_v50 = vpack.c.bf16 %v1921_v47, %v1920_v46  ;;  %v3406_v46 = vpack.c.bf16 %v2036_v43, %v2034_v42  ;;  %v2140_v42 = vld [vmem:[#allocation19 + $0x48] sm:$0xff]  ;;  %v2157_v43 = vld [vmem:[#allocation19 + $0xd0] sm:$0xff] }
 0x441   :  { %3341 = vmatprep.subr.bf16.mxu1 %v3340_v51  ;;  %v3376_v51 = vpack.c.bf16 %v1939_v49, %v1938_v48  ;;  %v2038_v48 = vld [vmem:[#allocation18 + $0x60] sm:$0xff]  ;;  %v2040_v49 = vld [vmem:[#allocation18 + $0x70] sm:$0xff] }
 0x444   :  { %3343 = vmatpush1.bf16.msra.mxu1 %v3342_v56  ;;  %v3378_v56 = vpack.c.bf16 %v1923_v53, %v1922_v52  ;;  %v3410_v52 = vpack.c.bf16 %v2040_v49, %v2038_v48  ;;  %v2142_v48 = vld [vmem:[#allocation19 + $0x58] sm:$0xff]  ;;  %v2159_v49 = vld [vmem:[#allocation19 + $0xe0] sm:$0xff] }
 0x445   :  { %3345 = vmatprep.subr.bf16.mxu1 %v3344_v57  ;;  %v3380_v57 = vpack.c.bf16 %v1941_v55, %v1940_v54  ;;  %v2042_v54 = vld [vmem:[#allocation18 + $0x80] sm:$0xff]  ;;  %v2044_v55 = vld [vmem:[#allocation18 + $0x90] sm:$0xff] }
 0x448   :  { %3347 = vmatpush1.bf16.msra.mxu1 %v3346_v62  ;;  %v3382_v62 = vpack.c.bf16 %v1925_v59, %v1924_v58  ;;  %v3414_v58 = vpack.c.bf16 %v2044_v55, %v2042_v54  ;;  %v2144_v54 = vld [vmem:[#allocation19 + $0x68] sm:$0xff] }
 0x449   :  { %3349 = vmatprep.subr.bf16.mxu1 %v3348_v63  ;;  %v3384_v63 = vpack.c.bf16 %v1943_v61, %v1942_v60  ;;  %v2046_v60 = vld [vmem:[#allocation18 + $0xa0] sm:$0xff]  ;;  %v2048_v61 = vld [vmem:[#allocation18 + $0xb0] sm:$0xff] }
 0x44c   :  { %3351 = vmatpush1.bf16.msra.mxu1 %v3350_v4  ;;  %v1945_v4 = vld [vmem:[#allocation15 + $0xe8] sm:$0xff] }
 0x44d   :  { %3353 = vmatprep.subr.bf16.mxu1 %v3352_v5  ;;  %v3388_v5 = vpack.c.bf16 %v1945_v4, %v1944_v3  ;;  %v2052_v3 = vld [vmem:[#allocation18 + $0xd0] sm:$0xff] }
 0x450   :  { %3355 = vmatpush1.bf16.msra.mxu1 %v3354_v16  ;;  %v3390_v16 = vpack.c.bf16 %v1929_v7, %v1928_v6  ;;  %v2057_v6 = vld [vmem:[#allocation18 + $0xf8] sm:$0xff] }
 0x451   :  { %3357 = vmatprep.subr.bf16.mxu1 %v3356_v10  ;;  %v3392_v10 = vpack.c.bf16 %v1947_v9, %v1946_v8  ;;  %v2056_v8 = vld [vmem:[#allocation18 + $0xf0] sm:$0xff] }
 0x454   :  { %3359 = vmatpush1.bf16.msra.mxu1 %v3358_v12  ;;  %v3394_v12 = vpack.c.bf16 %v1931_v18, %v1930_v11  ;;  %v2148_v11 = vld [vmem:[#allocation19 + $0x88] sm:$0xff]  ;;  %v2131_v18 = vld [vmem:[#allocation19] sm:$0xff] }
 0x455   :  { %3361 = vmatprep.subr.bf16.mxu1 %v3360_v15  ;;  %v3396_v15 = vpack.c.bf16 %v2029_v14, %v2027_v13  ;;  %v2132_v13 = vld [vmem:[#allocation19 + $0x8] sm:$0xff]  ;;  %v2149_v14 = vld [vmem:[#allocation19 + $0x90] sm:$0xff] }
 0x458   :  { %3363 = vmatpush1.bf16.msra.mxu1 %v3362_v22  ;;  %v1836_v22 = vrot.slane %v1827_v20, %v4341_v19  ;;  %v3430_v20 = vpack.c.bf16 %v2132_v13, %v2131_v18  ;;  %v2250_v13 = vld [vmem:[#allocation22 + $0x38] sm:$0xff] }
 0x459   :  { %3365 = vmatprep.subr.bf16.mxu1 %v3364_v25 }
 0x50e   :  { %v2483_v27 = vpop.f32.mrb[2].mxu1 }
 0x50f   :  { %v2484_v29 = vpop.f32.mrb[3].mxu1 }
 0x510   :  { %v2485_v30 = vadd.f32 %v2484_v29, %v2483_v27  ;;  %v2028_v29 = vld [vmem:[#allocation18 + $0x10] sm:$0xff] }
 0x512   :  { %v1789_v33 = vadd.f32 %v2485_v30, %v2446_v28  ;;  %v2026_v28 = vld [vmem:[#allocation18] sm:$0xff] }
 0x513   :  { %v3398_v34 = vpack.c.bf16 %v2028_v29, %v2026_v28  ;;  %v2135_v29 = vld [vmem:[#allocation19 + $0x20] sm:$0xff] }
 0x514   :  { %v1793_v36 = vmul.f32 0.1, %v1789_v33  ;;  %vm1792_vm6 = vcmp.gt.f32.partialorder %v1789_v33, 0.0 }
 0x516   :  { %v1794_v41 = vsel %vm1792_vm6, %v1789_v33, %v1793_v36  ;;  %v3400_v36 = vpack.c.bf16 %v2033_v32, %v2031_v31  ;;  %v2153_v31 = vld [vmem:[#allocation19 + $0xb0] sm:$0xff]  ;;  %v2154_v32 = vld [vmem:[#allocation19 + $0xb8] sm:$0xff] }
 0x517   :  { %1904 = vmatmul.mubr.f32.vlgmr.msra.gmra.mrb[4].mxu1 %v1794_v41 }
 0x518   :  { %3367 = vmatpush3.bf16.msra.mxu1 %v3366_v37  ;;  %v2030_v37 = vld [vmem:[#allocation18 + $0x20] sm:$0xff] }
 0x519   :  { %3369 = vmatprep.subr.bf16.mxu1 %v3368_v38  ;;  %v2035_v38 = vld [vmem:[#allocation18 + $0x48] sm:$0xff]  ;;  %v3402_v40 = vpack.c.bf16 %v2032_v17, %v2030_v37  ;;  %v2138_v37 = vld [vmem:[#allocation19 + $0x38] sm:$0xff]  ;;  %v2155_v17 = vld [vmem:[#allocation19 + $0xc0] sm:$0xff] }
 0x51a   :  { %v3404_v41 = vpack.c.bf16 %v2037_v39, %v2035_v38  ;;  %v2156_v38 = vld [vmem:[#allocation19 + $0xc8] sm:$0xff] }
 0x51c   :  { %3371 = vmatpush3.bf16.msra.mxu1 %v3370_v44  ;;  %v2039_v44 = vld [vmem:[#allocation18 + $0x68] sm:$0xff] }
 0x51d   :  { %3373 = vmatprep.subr.bf16.mxu1 %v3372_v45  ;;  %v2041_v45 = vld [vmem:[#allocation18 + $0x78] sm:$0xff] }
 0x51e   :  { %v3408_v47 = vpack.c.bf16 %v2041_v45, %v2039_v44  ;;  %v2158_v44 = vld [vmem:[#allocation19 + $0xd8] sm:$0xff] }
 0x520   :  { %3375 = vmatpush3.bf16.msra.mxu1 %v3374_v50  ;;  %v2043_v50 = vld [vmem:[#allocation18 + $0x88] sm:$0xff] }
 0x521   :  { %3377 = vmatprep.subr.bf16.mxu1 %v3376_v51  ;;  %v2045_v51 = vld [vmem:[#allocation18 + $0x98] sm:$0xff] }
 0x522   :  { %v3412_v53 = vpack.c.bf16 %v2045_v51, %v2043_v50  ;;  %v2160_v50 = vld [vmem:[#allocation19 + $0xe8] sm:$0xff] }
 0x524   :  { %3379 = vmatpush3.bf16.msra.mxu1 %v3378_v56  ;;  %v2047_v56 = vld [vmem:[#allocation18 + $0xa8] sm:$0xff] }
 0x525   :  { %3381 = vmatprep.subr.bf16.mxu1 %v3380_v57  ;;  %v2049_v57 = vld [vmem:[#allocation18 + $0xb8] sm:$0xff] }
 0x526   :  { %v3416_v59 = vpack.c.bf16 %v2049_v57, %v2047_v56  ;;  %v2447_v57 = vld [vmem:[#allocation16] ss:$0 sm:$0xff] }
 0x528   :  { %3383 = vmatpush3.bf16.msra.mxu1 %v3382_v62  ;;  %v3418_v62 = vpack.c.bf16 %v2048_v61, %v2046_v60 }
 0x529   :  { %3385 = vmatprep.subr.bf16.mxu1 %v3384_v63  ;;  %v2051_v63 = vld [vmem:[#allocation18 + $0xc8] sm:$0xff] }
 0x52a   :  { %v3420_v1 = vpack.c.bf16 %v2053_v0, %v2051_v63  ;;  %v2162_v63 = vld [vmem:[#allocation19 + $0xf8] sm:$0xff] }
 0x52c   :  { %3387 = vmatpush3.bf16.msra.mxu1 %v3386_v2  ;;  %v2050_v2 = vld [vmem:[#allocation18 + $0xc0] sm:$0xff] }
 0x52d   :  { %3389 = vmatprep.subr.bf16.mxu1 %v3388_v5  ;;  %v3422_v4 = vpack.c.bf16 %v2052_v3, %v2050_v2  ;;  %v2055_v5 = vld [vmem:[#allocation18 + $0xe8] sm:$0xff]  ;;  %v2146_v2 = vld [vmem:[#allocation19 + $0x78] sm:$0xff] }
 0x52e   :  { %v3424_v7 = vpack.c.bf16 %v2057_v6, %v2055_v5  ;;  %v2244_v5 = vld [vmem:[#allocation22 + $0x8] sm:$0xff]  ;;  %v2245_v6 = vld [vmem:[#allocation22 + $0x10] sm:$0xff] }
 0x530   :  { %3391 = vmatpush3.bf16.msra.mxu1 %v3390_v16  ;;  %v2054_v16 = vld [vmem:[#allocation18 + $0xe0] sm:$0xff] }
 0x531   :  { %3393 = vmatprep.subr.bf16.mxu1 %v3392_v10  ;;  %v3426_v9 = vpack.c.bf16 %v2056_v8, %v2054_v16  ;;  %v2147_v10 = vld [vmem:[#allocation19 + $0x80] sm:$0xff] }
 0x532   :  { %v2246_v8 = vld [vmem:[#allocation22 + $0x18] sm:$0xff] }
 0x534   :  { %3395 = vmatpush3.bf16.msra.mxu1 %v3394_v12  ;;  %v3428_v12 = vpack.c.bf16 %v2148_v11, %v2147_v10  ;;  %v2247_v10 = vld [vmem:[#allocation22 + $0x20] sm:$0xff]  ;;  %v2248_v11 = vld [vmem:[#allocation22 + $0x28] sm:$0xff] }
 0x535   :  { %3397 = vmatprep.subr.bf16.mxu1 %v3396_v15  ;;  %v2150_v15 = vld [vmem:[#allocation19 + $0x98] sm:$0xff]  ;;  %v3467_v18 = vpack.c.bf16 %v2248_v11, %v2247_v10 }
 0x536   :  { %3429 = vmatprep.subr.bf16.mxu0 %v3428_v12  ;;  %v2249_v12 = vld [vmem:[#allocation22 + $0x30] sm:$0xff] }
 0x537   :  { %3431 = vmatpush3.bf16.msra.mxu0 %v3430_v20  ;;  %v2252_v20 = vld [vmem:[#allocation22 + $0x48] sm:$0xff] }
 0x5ea   :  { %v1905_v23 = vpop.f32.mrb[4].mxu1 }
 0x5eb   :  { %v1906_v24 = vadd.f32 %v1905_v23, %v1832_v21  ;;  %v1907_v25 = vpop.f32.mrb[5].mxu1  ;;  %v3432_v21 = vpack.c.bf16 %v2150_v15, %v2149_v14  ;;  %v2134_v23 = vld [vmem:[#allocation19 + $0x18] sm:$0xff]  ;;  %v3470_v14 = vpack.c.bf16 %v2250_v13, %v2249_v12  ;;  %v2251_v15 = vld [vmem:[#allocation22 + $0x40] sm:$0xff] }
 0x5ec   :  { %v1908_v27 = vadd.f32 %v1907_v25, %v1836_v22  ;;  %v2133_v22 = vld [vmem:[#allocation19 + $0x10] sm:$0xff]  ;;  %v2152_v25 = vld [vmem:[#allocation19 + $0xa8] sm:$0xff] }
 0x5ed   :  { %v1912_v30 = vmul.f32 0.1, %v1906_v24  ;;  %vm1910_vm7 = vcmp.gt.f32.partialorder %v1906_v24, 0.0  ;;  %3433 = vmatprep.subr.bf16.mxu0 %v3432_v21  ;;  %v3473_v21 = vpack.c.bf16 %v2252_v20, %v2251_v15 }
 0x5ee   :  { %v1913_v33 = vmul.f32 0.1, %v1908_v27  ;;  %vm1911_vm8 = vcmp.gt.f32.partialorder %v1908_v27, 0.0 }
 0x5ef   :  { %v4362_v19 = vsel %vm1910_vm7, %v1906_v24, %v1912_v30  ;;  %v2151_v24 = vld [vmem:[#allocation19 + $0xa0] sm:$0xff]  ;;  %v2136_v30 = vld [vmem:[#allocation19 + $0x28] sm:$0xff] }
 0x5f0   :  { %v4359_v35 = vsel %vm1911_vm8, %v1908_v27, %v1913_v33  ;;  %v3434_v27 = vpack.c.bf16 %v2134_v23, %v2133_v22  ;;  %v3436_v28 = vpack.c.bf16 %v2152_v25, %v2151_v24  ;;  %v3438_v33 = vpack.c.bf16 %v2136_v30, %v2135_v29  ;;  %v2253_v22 = vld [vmem:[#allocation22 + $0x50] sm:$0xff]  ;;  %v2254_v23 = vld [vmem:[#allocation22 + $0x58] sm:$0xff]  ;;  %v2255_v30 = vld [vmem:[#allocation22 + $0x60] sm:$0xff] }
 0x5f1   :  { %2019 = vmatprep.mubr.f32.mxu1 %v4359_v35  ;;  %v3476_v24 = vpack.c.bf16 %v2254_v23, %v2253_v22 }
 0x5f2   :  { %2020 = vmatmul.mubr.f32.vlgmr.msra.gmra.mrb[6].mxu1 %v4362_v19  ;;  %3435 = vmatpush3.bf16.msra.mxu0 %v3434_v27 }
 0x5f3   :  { %3399 = vmatpush1.bf16.msra.mxu1 %v3398_v34  ;;  %2122 = vmatprep.mubr.f32.mxu1 %v3969_v26  ;;  %v3440_v34 = vpack.c.bf16 %v2154_v32, %v2153_v31  ;;  %v2256_v31 = vld [vmem:[#allocation22 + $0x68] sm:$0xff] }
 0x5f4   :  { %3401 = vmatprep.subr.bf16.mxu1 %v3400_v36  ;;  %3437 = vmatprep.subr.bf16.mxu0 %v3436_v28  ;;  %v2137_v36 = vld [vmem:[#allocation19 + $0x30] sm:$0xff]  ;;  %v3479_v32 = vpack.c.bf16 %v2256_v31, %v2255_v30 }
 0x5f5   :  { %v3442_v39 = vpack.c.bf16 %v2138_v37, %v2137_v36  ;;  %v2340_v37 = vld [vmem:[#allocation25 + $0x8] sm:$0xff] }
 0x5f6   :  { %3439 = vmatpush3.bf16.msra.mxu0 %v3438_v33  ;;  %v2257_v33 = vld [vmem:[#allocation22 + $0x70] sm:$0xff] }
 0x5f7   :  { %3403 = vmatpush1.bf16.msra.mxu1 %v3402_v40  ;;  %3441 = vmatprep.subr.bf16.mxu0 %v3440_v34  ;;  %v3444_v40 = vpack.c.bf16 %v2156_v38, %v2155_v17  ;;  %v2258_v34 = vld [vmem:[#allocation22 + $0x78] sm:$0xff] }
 0x5f8   :  { %3405 = vmatprep.subr.bf16.mxu1 %v3404_v41  ;;  %v2139_v41 = vld [vmem:[#allocation19 + $0x40] sm:$0xff]  ;;  %v3482_v36 = vpack.c.bf16 %v2258_v34, %v2257_v33 }
 0x5f9   :  { %v3446_v45 = vpack.c.bf16 %v2140_v42, %v2139_v41  ;;  %v2342_v38 = vld [vmem:[#allocation25 + $0x18] sm:$0xff]  ;;  %v2344_v41 = vld [vmem:[#allocation25 + $0x28] sm:$0xff] }
 0x5fa   :  { %3443 = vmatpush3.bf16.msra.mxu0 %v3442_v39 }
 0x5fb   :  { %3407 = vmatpush1.bf16.msra.mxu1 %v3406_v46  ;;  %3445 = vmatprep.subr.bf16.mxu0 %v3444_v40  ;;  %v3448_v46 = vpack.c.bf16 %v2158_v44, %v2157_v43  ;;  %v2343_v40 = vld [vmem:[#allocation25 + $0x20] sm:$0xff]  ;;  %v2345_v43 = vld [vmem:[#allocation25 + $0x30] sm:$0xff]  ;;  %v2346_v44 = vld [vmem:[#allocation25 + $0x38] sm:$0xff] }
 0x5fc   :  { %3409 = vmatprep.subr.bf16.mxu1 %v3408_v47  ;;  %v2141_v47 = vld [vmem:[#allocation19 + $0x50] sm:$0xff]  ;;  %v3491_v42 = vpack.c.bf16 %v2344_v41, %v2343_v40 }
 0x5fd   :  { %v3450_v51 = vpack.c.bf16 %v2142_v48, %v2141_v47  ;;  %v2349_v48 = vld [vmem:[#allocation25 + $0x50] sm:$0xff] }
 0x5fe   :  { %3447 = vmatpush3.bf16.msra.mxu0 %v3446_v45  ;;  %v3494_v45 = vpack.c.bf16 %v2346_v44, %v2345_v43 }
 0x5ff   :  { %3411 = vmatpush1.bf16.msra.mxu1 %v3410_v52  ;;  %3449 = vmatprep.subr.bf16.mxu0 %v3448_v46  ;;  %v3452_v52 = vpack.c.bf16 %v2160_v50, %v2159_v49  ;;  %v2348_v46 = vld [vmem:[#allocation25 + $0x48] sm:$0xff]  ;;  %v2350_v49 = vld [vmem:[#allocation25 + $0x58] sm:$0xff] }
 0x600   :  { %3413 = vmatprep.subr.bf16.mxu1 %v3412_v53  ;;  %v2143_v53 = vld [vmem:[#allocation19 + $0x60] sm:$0xff]  ;;  %v3500_v50 = vpack.c.bf16 %v2350_v49, %v2349_v48 }
 0x601   :  { %v3454_v55 = vpack.c.bf16 %v2144_v54, %v2143_v53 }
 0x602   :  { %3451 = vmatpush3.bf16.msra.mxu0 %v3450_v51  ;;  %v2351_v51 = vld [vmem:[#allocation25 + $0x60] sm:$0xff] }
 0x603   :  { %3415 = vmatpush1.bf16.msra.mxu1 %v3414_v58  ;;  %3453 = vmatprep.subr.bf16.mxu0 %v3452_v52  ;;  %v2352_v52 = vld [vmem:[#allocation25 + $0x68] sm:$0xff] }
 0x604   :  { %3417 = vmatprep.subr.bf16.mxu1 %v3416_v59  ;;  %v3503_v53 = vpack.c.bf16 %v2352_v52, %v2351_v51 }
 0x606   :  { %3455 = vmatpush3.bf16.msra.mxu0 %v3454_v55  ;;  %v2448_v55 = vld [vmem:[#allocation21] ss:$0 sm:$0xff] }
 0x607   :  { %3419 = vmatpush1.bf16.msra.mxu1 %v3418_v62  ;;  %v2161_v62 = vld [vmem:[#allocation19 + $0xf0] sm:$0xff] }
 0x608   :  { %3421 = vmatprep.subr.bf16.mxu1 %v3420_v1  ;;  %v3456_v0 = vpack.c.bf16 %v2162_v63, %v2161_v62  ;;  %v2145_v1 = vld [vmem:[#allocation19 + $0x70] sm:$0xff]  ;;  %v2354_v62 = vld [vmem:[#allocation25 + $0x78] sm:$0xff] }
 0x609   :  { %v3458_v3 = vpack.c.bf16 %v2146_v2, %v2145_v1 }
 0x60a   :  { %3457 = vmatprep.subr.bf16.mxu0 %v3456_v0  ;;  %v2449_v0 = vld [vmem:[#allocation24] ss:$0 sm:$0xff] }
 0x60b   :  { %3423 = vmatpush1.bf16.msra.mxu1 %v3422_v4  ;;  %3459 = vmatpush3.bf16.msra.mxu0 %v3458_v3  ;;  %v2243_v4 = vld [vmem:[#allocation22] sm:$0xff] }
 0x60c   :  { %3425 = vmatprep.subr.bf16.mxu1 %v3424_v7  ;;  %v3970_v7 = vmov 0.0|0.0   ;;  %v3461_v16 = vpack.c.bf16 %v2244_v5, %v2243_v4 }
 0x60d   :  { %3484 = vmatprep.subr.bf16.mxu0 %v3970_v7 }
 0x60f   :  { %3427 = vmatpush1.bf16.msra.mxu1 %v3426_v9  ;;  %v3464_v9 = vpack.c.bf16 %v2246_v8, %v2245_v6  ;;  %v2450_v6 = vld [vmem:[#allocation27] ss:$0 sm:$0xff] }
 0x610   :  { %3460 = vmatprep.subr.bf16.mxu1 %v3970_v7 }
 0x6c5   :  { %v2518_v56 = vpop.f32.mrb[6].mxu1 }
 0x6c6   :  { %v2519_v58 = vpop.f32.mrb[7].mxu1 }
 0x6c7   :  { %v2520_v59 = vadd.f32 %v2519_v58, %v2518_v56 }
 0x6c9   :  { %v2022_v60 = vadd.f32 %v2520_v59, %v2447_v57 }
 0x6cb   :  { %v2025_v61 = vmax.f32 %v2022_v60, 0.0 }
 0x6cd   :  { %2123 = vmatmul.mubr.f32.vlgmr.msra.gmra.mrb[8].mxu1 %v2025_v61  ;;  %v2353_v61 = vld [vmem:[#allocation25 + $0x70] sm:$0xff] }
 0x6ce   :  { %3462 = vmatpush3.bf16.msra.mxu1 %v3461_v16  ;;  %2622 = vmatprep.mubr.msk.f32.mxu1 %vm3971_vm9, %v3969_v26  ;;  %v3506_v63 = vpack.c.bf16 %v2354_v62, %v2353_v61 }
 0x6cf   :  { %3463 = vmatprep.subr.bf16.mxu1 %v3970_v7 }
 0x6d2   :  { %3465 = vmatpush3.bf16.msra.mxu1 %v3464_v9 }
 0x6d3   :  { %3466 = vmatprep.subr.bf16.mxu1 %v3970_v7 }
 0x6d6   :  { %3468 = vmatpush3.bf16.msra.mxu1 %v3467_v18 }
 0x6d7   :  { %3469 = vmatprep.subr.bf16.mxu1 %v3970_v7 }
 0x6da   :  { %3471 = vmatpush3.bf16.msra.mxu1 %v3470_v14 }
 0x6db   :  { %3472 = vmatprep.subr.bf16.mxu1 %v3970_v7 }
 0x6de   :  { %3474 = vmatpush3.bf16.msra.mxu1 %v3473_v21 }
 0x6df   :  { %3475 = vmatprep.subr.bf16.mxu1 %v3970_v7 }
 0x6e2   :  { %3477 = vmatpush3.bf16.msra.mxu1 %v3476_v24 }
 0x6e3   :  { %3478 = vmatprep.subr.bf16.mxu1 %v3970_v7 }
 0x6e6   :  { %3480 = vmatpush3.bf16.msra.mxu1 %v3479_v32 }
 0x6e7   :  { %3481 = vmatprep.subr.bf16.mxu1 %v3970_v7 }
 0x6ea   :  { %3483 = vmatpush3.bf16.msra.mxu1 %v3482_v36 }
 0x7a0   :  { %v2124_v25 = vpop.f32.mrb[8].mxu1 }
 0x7a1   :  { %v2126_v27 = vpop.f32.mrb[9].mxu1  ;;  %v2129_v29 = vmul.f32 %v2124_v25, %v4362_v19  ;;  %v2341_v19 = vld [vmem:[#allocation25 + $0x10] sm:$0xff] }
 0x7a2   :  { %v2130_v28 = vmul.f32 %v2126_v27, %v4359_v35  ;;  %v2339_v35 = vld [vmem:[#allocation25] sm:$0xff]  ;;  %v3488_v39 = vpack.c.bf16 %v2342_v38, %v2341_v19 }
 0x7a3   :  { %v3485_v17 = vpack.c.bf16 %v2340_v37, %v2339_v35 }
 0x7a4   :  { %2234 = vmatprep.mubr.f32.mxu0 %v2130_v28 }
 0x7a5   :  { %2235 = vmatmul.mubr.f32.vlgmr.msra.gmra.mrb[4].mxu0 %v2129_v29 }
 0x7a6   :  { %2657 = vmatprep.mubr.msk.f32.mxu0 %vm3971_vm9, %v3969_v26  ;;  %3486 = vmatpush3.bf16.msra.mxu0 %v3485_v17  ;;  %v2347_v26 = vld [vmem:[#allocation25 + $0x40] sm:$0xff] }
 0x7a7   :  { %3487 = vmatprep.subr.bf16.mxu0 %v3970_v7  ;;  %v3497_v47 = vpack.c.bf16 %v2348_v46, %v2347_v26 }
 0x7aa   :  { %3489 = vmatpush3.bf16.msra.mxu0 %v3488_v39 }
 0x7ab   :  { %3490 = vmatprep.subr.bf16.mxu0 %v3970_v7 }
 0x7ae   :  { %3492 = vmatpush3.bf16.msra.mxu0 %v3491_v42 }
 0x7af   :  { %3493 = vmatprep.subr.bf16.mxu0 %v3970_v7 }
 0x7b2   :  { %3495 = vmatpush3.bf16.msra.mxu0 %v3494_v45 }
 0x7b3   :  { %3496 = vmatprep.subr.bf16.mxu0 %v3970_v7 }
 0x7b6   :  { %3498 = vmatpush3.bf16.msra.mxu0 %v3497_v47 }
 0x7b7   :  { %3499 = vmatprep.subr.bf16.mxu0 %v3970_v7 }
 0x7ba   :  { %3501 = vmatpush3.bf16.msra.mxu0 %v3500_v50 }
 0x7bb   :  { %3502 = vmatprep.subr.bf16.mxu0 %v3970_v7 }
 0x7be   :  { %3504 = vmatpush3.bf16.msra.mxu0 %v3503_v53 }
 0x7bf   :  { %3505 = vmatprep.subr.bf16.mxu0 %v3970_v7 }
 0x7c2   :  { %3507 = vmatpush3.bf16.msra.mxu0 %v3506_v63 }
 0x878   :  { %v2553_v54 = vpop.f32.mrb[4].mxu0 }
 0x879   :  { %v2554_v56 = vpop.f32.mrb[5].mxu0 }
 0x87a   :  { %v2555_v57 = vadd.f32 %v2554_v56, %v2553_v54 }
 0x87c   :  { %v2237_v58 = vadd.f32 %v2555_v57, %v2448_v55 }
 0x87e   :  { %v2241_v59 = vmul.f32 0.1, %v2237_v58  ;;  %vm2240_vm10 = vcmp.gt.f32.partialorder %v2237_v58, 0.0 }
 0x880   :  { %v2242_v60 = vsel %vm2240_vm10, %v2237_v58, %v2241_v59 }
 0x881   :  { %2623 = vmatmul.mubr.f32.vlgmr.msra.gmra.mrb[10].mxu1 %v2242_v60 }
 0x954   :  { %v2332_v1 = vpop.f32.mrb[10].mxu1 }
 0x955   :  { %v2333_v2 = vadd.f32 %v2449_v0, %v2332_v1  ;;  %v2624_v3 = vpop.f32.mrb[11].mxu1 }
 0x957   :  { %vm2336_vm11 = vcmp.gt.f32.partialorder %v2333_v2, 0.0  ;;  %v2337_v4 = vmul.f32 0.1, %v2333_v2 }
 0x959   :  { %v2338_v5 = vsel %vm2336_vm11, %v2333_v2, %v2337_v4 }
 0x95a   :  { %2658 = vmatmul.mubr.f32.vlgmr.msra.gmra.mrb[6].mxu0 %v2338_v5 }
 0xa2d   :  { %v2428_v7 = vpop.f32.mrb[6].mxu0 }
 0xa2e   :  { %v2429_v16 = vadd.f32 %v2450_v6, %v2428_v7  ;;  %v2659_v8 = vpop.f32.mrb[7].mxu0 }
 0xa30   :  { %2432 = vst [vmem:[%s4407_s18] sm:$0xff] %v2429_v16 }
 0xa31   :  { %2437 = vsyncpa [#allocation3], 1 }
 0xa32   :  { %2438 = vsyncpa [#allocation5], 1 }
 0xa33   :  { %2439 = vsyncpa [#allocation8], 1 }
 0xa34   :  { %2440 = vsyncpa [#allocation11], 1 }
 0xa35   :  { %2441 = vsyncpa [#allocation14], 1 }
 0xa36   :  { %2442 = vsyncpa [#allocation17], 1 }
 0xa37   :  { %2443 = vsyncpa [#allocation20], 1 }
 0xa38   :  { %2444 = vsyncpa [#allocation23], 1 }
 0xa39   :  { %2445 = vsyncpa [#allocation26], 1 }

</bundles_post_ra>
